<compile_context>
chip_gen: v5e
topology: v5e:2x2
jax: 0.10.0
libtpu: 0.0.40
codegen_flags: <defaults>
</compile_context>

<pallas_src>
import functools

import jax
import jax.numpy as jnp
from jax import lax
from jax.experimental import pallas as pl
from jax.experimental.pallas import tpu as pltpu


def _round_up(x, m):
    return (x + m - 1) // m * m


def _pick_vmem_limit():
    """Generation-aware scoped-VMEM limit (v5e/v6e: 128 MiB parts, v7x: 64)."""
    default = 64 * 1024 * 1024
    try:
        cap = getattr(pltpu.get_tpu_info(), "vmem_capacity_bytes", None)
        if cap is None:
            return default
        return max(32 * 1024 * 1024, min(int(cap) * 3 // 4, 96 * 1024 * 1024))
    except Exception:  # pragma: no cover - conservative fallback
        return default


def _pick_row_tile(H, W, cmid_p):
    """Largest divisor TH of H keeping the f32 accumulator (TH*W, Cmid_p)
    around <= 8 MiB, with TH*W sublane-aligned (or TH == H)."""
    target_rows = max(256, min(4096, (8 * 1024 * 1024) // (cmid_p * 4)))
    cands = [t for t in range(1, H + 1)
             if H % t == 0 and (t == H or (t * W) % 8 == 0)]
    fit = [t for t in cands if t * W <= target_rows]
    return max(fit) if fit else min(cands)


def _scale_pred_kernel(xs_ref, w1_ref, b1_ref, w2_ref, b2_ref, o_ref, acc_ref,
                       *, TH, W, Cin):
    """Grid = (batch, row-strip, kernel-row dh).

    xs_ref : (1, 1, TH+2, W+2, Cin)  zero-padded row strip (compute dtype)
    w1_ref : (1, 3, Cin, Cmid_p)     3x3 weights for kernel row dh, BN-scaled
    b1_ref : (1, Cmid_p)             folded BN bias (f32)
    w2_ref : (Cmid_p, Cout_p)        1x1 conv weight (compute dtype)
    b2_ref : (1, Cout_p)             1x1 conv bias (f32)
    o_ref  : (1, TH*W, Cout_p)       lane-dense output tile (f32)
    acc_ref: (TH*W, Cmid_p) f32      conv1 accumulator across the dh axis
    """
    dh = pl.program_id(2)

    @pl.when(dh == 0)
    def _init():
        acc_ref[...] = jnp.zeros_like(acc_ref)

    # Rows dh .. dh+TH-1 of the padded strip.  Dynamic offset is on a
    # non-minor dim (pure address arithmetic); the three column taps are
    # static slices, unrolled, summed once into the f32 accumulator.
    xrow = xs_ref[0, 0, pl.ds(dh, TH), :, :]                # (TH, W+2, Cin)
    partial = None
    for dw in range(3):                                     # static unroll
        tap = xrow[:, dw:dw + W, :].reshape(TH * W, Cin)
        contrib = jnp.dot(tap, w1_ref[0, dw, :, :],
                          preferred_element_type=jnp.float32)
        partial = contrib if partial is None else partial + contrib
    acc_ref[...] += partial

    @pl.when(dh == pl.num_programs(2) - 1)
    def _epilogue():
        y = acc_ref[...] + b1_ref[...]                      # folded BN bias
        y = jnp.maximum(y, 0.1 * y)                         # LeakyReLU(0.1)
        out = jnp.dot(y.astype(w2_ref.dtype), w2_ref[...],
                      preferred_element_type=jnp.float32) + b2_ref[...]
        o_ref[0] = out.astype(o_ref.dtype)


def scale_prediction_pallas(x_nchw, params, num_classes,
                            compute_dtype=jnp.bfloat16, row_tile=None):
    """x_nchw: (B, Cin, H, W) float32.  Returns (B, 3, H, W, num_classes+5)."""
    B, Cin, H, W = x_nchw.shape
    Cmid = 2 * Cin
    Cout = 3 * (num_classes + 5)
    Cmid_p = _round_up(Cmid, 128)    # lane-dense intermediate channels
    Cout_p = _round_up(Cout, 128)    # lane-dense output channels / stores

    TH = _pick_row_tile(H, W, Cmid_p) if row_tile is None else int(row_tile)
    if H % TH != 0 or (TH != H and (TH * W) % 8 != 0):
        raise ValueError(f"row_tile={TH} must divide H={H} and keep TH*W "
                         f"sublane-aligned (or equal H)")
    n_strips = H // TH

    eps = 1e-5
    w1_oihw = params["w1"]           # (Cmid, Cin, 3, 3)  PyTorch OIHW
    gamma, beta = params["bn_gamma"], params["bn_beta"]
    mean, var = params["bn_mean"], params["bn_var"]
    w2_oihw = params["w2"]           # (Cout, Cmid, 1, 1)
    b2 = params["b2"]                # (Cout,)

    # Fold eval-mode BN into per-channel scale/bias; fold the scale into the
    # 3x3 weights (saves a (TH*W, Cmid_p) VPU multiply per strip).
    scale1 = gamma / jnp.sqrt(var + eps)
    bias1 = beta - mean * scale1

    # (Cmid, Cin, 3, 3) -> (3, 3, Cin, Cmid): kernel-row-major, so the dh grid
    # axis indexes dim 0 and dw is a static index inside the kernel.
    w1_t = jnp.transpose(w1_oihw, (2, 3, 1, 0)) * scale1
    w1_p = jnp.pad(w1_t, ((0, 0), (0, 0), (0, 0), (0, Cmid_p - Cmid)))
    w1_p = w1_p.astype(compute_dtype)
    b1_p = jnp.pad(bias1, (0, Cmid_p - Cmid)).reshape(1, Cmid_p)
    b1_p = b1_p.astype(jnp.float32)

    w2_io = jnp.transpose(w2_oihw[:, :, 0, 0], (1, 0))      # (Cmid, Cout)
    w2_p = jnp.pad(w2_io, ((0, Cmid_p - Cmid), (0, Cout_p - Cout)))
    w2_p = w2_p.astype(compute_dtype)
    b2_p = jnp.pad(b2, (0, Cout_p - Cout)).reshape(1, Cout_p)
    b2_p = b2_p.astype(jnp.float32)

    # NCHW -> NHWC, zero-pad spatial dims (padding=1), cast to compute dtype
    # (halves activation DMA for bf16), then split into overlapping row
    # strips (2 halo rows each) so every grid step is self-contained.
    xp = jnp.pad(jnp.transpose(x_nchw, (0, 2, 3, 1)),
                 ((0, 0), (1, 1), (1, 1), (0, 0))).astype(compute_dtype)
    if n_strips == 1:
        xs = xp[:, None]
    else:
        xs = jnp.stack([xp[:, s * TH:s * TH + TH + 2] for s in range(n_strips)],
                       axis=1)                               # (B, S, TH+2, W+2, Cin)

    kernel = functools.partial(_scale_pred_kernel, TH=TH, W=W, Cin=Cin)
    vmem_limit = _pick_vmem_limit()

    def build(single_buffer_invariants):
        def inv(shape, imap):
            if single_buffer_invariants:
                return pl.BlockSpec(shape, imap, pipeline_mode=pl.Buffered(1))
            return pl.BlockSpec(shape, imap)

        grid_spec = pltpu.PrefetchScalarGridSpec(
            num_scalar_prefetch=0,
            grid=(B, n_strips, 3),
            in_specs=[
                # Input strip: same block across the dh axis -> fetched once.
                pl.BlockSpec((1, 1, TH + 2, W + 2, Cin),
                             lambda b, s, k: (b, s, 0, 0, 0)),
                # 3x3 weights: one kernel row per reduction step (pipelined,
                # only a third resident -> fits v7x VMEM at large Cin).
                pl.BlockSpec((1, 3, Cin, Cmid_p),
                             lambda b, s, k: (k, 0, 0, 0)),
                # Grid-invariant operands: single-buffered.
                inv((1, Cmid_p), lambda b, s, k: (0, 0)),
                inv((Cmid_p, Cout_p), lambda b, s, k: (0, 0)),
                inv((1, Cout_p), lambda b, s, k: (0, 0)),
            ],
            out_specs=pl.BlockSpec((1, TH * W, Cout_p),
                                   lambda b, s, k: (b, s, 0)),
            scratch_shapes=[pltpu.VMEM((TH * W, Cmid_p), jnp.float32)],
        )
        return pl.pallas_call(
            kernel,
            out_shape=jax.ShapeDtypeStruct((B, H * W, Cout_p), jnp.float32),
            grid_spec=grid_spec,
            compiler_params=pltpu.CompilerParams(
                dimension_semantics=("parallel", "parallel", "arbitrary"),
                vmem_limit_bytes=vmem_limit,
            ),
        )

    try:
        out_k = build(True)(xs, w1_p, b1_p, w2_p, b2_p)
    except Exception:
        # Fallback if this runtime rejects single-buffered (Buffered(1)) specs.
        out_k = build(False)(xs, w1_p, b1_p, w2_p, b2_p)

    # Drop padded channels; channel c = a*(nc+5)+k carries PyTorch's ordering.
    # (B, H*W, Cout) -> (B, H, W, 3, nc+5) -> permute to the module's layout.
    out = out_k[:, :, :Cout].reshape(B, H, W, 3, num_classes + 5)
    return jnp.transpose(out, (0, 3, 1, 2, 4))


def _reference_jax(x_nchw, params, num_classes):
    """Pure-JAX reference mirroring the PyTorch forward (eval-mode BN)."""
    eps = 1e-5
    y = lax.conv_general_dilated(
        x_nchw, params["w1"], window_strides=(1, 1), padding=((1, 1), (1, 1)),
        dimension_numbers=("NCHW", "OIHW", "NCHW"))
    scale = params["bn_gamma"] / jnp.sqrt(params["bn_var"] + eps)
    bias = params["bn_beta"] - params["bn_mean"] * scale
    y = y * scale[None, :, None, None] + bias[None, :, None, None]
    y = jnp.where(y > 0, y, 0.1 * y)
    y = lax.conv_general_dilated(
        y, params["w2"], window_strides=(1, 1), padding=((0, 0), (0, 0)),
        dimension_numbers=("NCHW", "OIHW", "NCHW"))
    y = y + params["b2"][None, :, None, None]
    B, _, H, W = x_nchw.shape
    y = y.reshape(B, 3, num_classes + 5, H, W)
    return jnp.transpose(y, (0, 1, 3, 4, 2))


if __name__ == "__main__":
    B, Cin, H, W = 2, 4, 16, 16
    num_classes = 3
    Cmid = 2 * Cin
    Cout = 3 * (num_classes + 5)

    key = jax.random.PRNGKey(0)
    k = jax.random.split(key, 8)
    params = {
        "w1": jax.random.normal(k[0], (Cmid, Cin, 3, 3), jnp.float32) * 0.1,
        "bn_gamma": jax.random.uniform(k[1], (Cmid,), jnp.float32, 0.5, 1.5),
        "bn_beta": jax.random.normal(k[2], (Cmid,), jnp.float32) * 0.1,
        "bn_mean": jax.random.normal(k[3], (Cmid,), jnp.float32) * 0.1,
        "bn_var": jax.random.uniform(k[4], (Cmid,), jnp.float32, 0.5, 1.5),
        "w2": jax.random.normal(k[5], (Cout, Cmid, 1, 1), jnp.float32) * 0.1,
        "b2": jax.random.normal(k[6], (Cout,), jnp.float32) * 0.1,
    }
    x = jax.random.normal(k[7], (B, Cin, H, W), jnp.float32)

    # Fast path: bf16 activations/weights into the MXU, f32 accumulation.
    out_bf16 = jax.block_until_ready(
        scale_prediction_pallas(x, params, num_classes))
    # Same fast path with explicit row-strip tiling (exercises 2 strips).
    out_bf16_strips = jax.block_until_ready(
        scale_prediction_pallas(x, params, num_classes, row_tile=8))
    # Verification path: full f32 compute, strip-tiled.
    out_f32 = jax.block_until_ready(
        scale_prediction_pallas(x, params, num_classes,
                                compute_dtype=jnp.float32, row_tile=8))
    ref = jax.block_until_ready(_reference_jax(x, params, num_classes))

    expected_shape = (B, 3, H, W, num_classes + 5)
    assert out_bf16.shape == expected_shape, out_bf16.shape
    assert out_bf16_strips.shape == expected_shape, out_bf16_strips.shape
    assert out_f32.shape == expected_shape, out_f32.shape
    assert jnp.allclose(out_f32, ref, atol=1e-4, rtol=1e-4), \
        float(jnp.max(jnp.abs(out_f32 - ref)))
    assert jnp.allclose(out_bf16, ref, atol=5e-2, rtol=5e-2), \
        float(jnp.max(jnp.abs(out_bf16 - ref)))
    assert jnp.allclose(out_bf16_strips, ref, atol=5e-2, rtol=5e-2), \
        float(jnp.max(jnp.abs(out_bf16_strips - ref)))
    assert jnp.allclose(out_bf16, out_bf16_strips, atol=1e-5, rtol=1e-5), \
        float(jnp.max(jnp.abs(out_bf16 - out_bf16_strips)))

    print("KERNEL_OK")
</pallas_src>

<mosaic_0001>
module attributes {stable_mosaic.version = 11 : i64} {
  func.func @_scale_pred_kernel(%arg0: i32, %arg1: i32, %arg2: i32, %arg3: memref<1x1x18x18x4xbf16, #tpu.memory_space<vmem>>, %arg4: memref<1x3x4x128xbf16, #tpu.memory_space<vmem>>, %arg5: memref<1x128xf32, #tpu.memory_space<vmem>>, %arg6: memref<128x128xbf16, #tpu.memory_space<vmem>>, %arg7: memref<1x128xf32, #tpu.memory_space<vmem>>, %arg8: memref<1x256x128xf32, #tpu.memory_space<vmem>>, %arg9: memref<256x128xf32, #tpu.memory_space<vmem>>) attributes {dimension_semantics = [#tpu.dimension_semantics<parallel>, #tpu.dimension_semantics<parallel>, #tpu.dimension_semantics<arbitrary>], iteration_bounds = array<i64: 2, 1, 3>, scalar_prefetch = 0 : i64, scratch_operands = 1 : i64, tpu.core_type = #tpu.core_type<tc>, window_params = [{transform_indices = @transform_0, window_bounds = array<i64: 1, 1, 18, 18, 4>}, {transform_indices = @transform_1, window_bounds = array<i64: 1, 3, 4, 128>}, {pipeline_mode = #tpu.pipeline_mode<synchronous>, transform_indices = @transform_2, window_bounds = array<i64: 1, 128>}, {pipeline_mode = #tpu.pipeline_mode<synchronous>, transform_indices = @transform_3, window_bounds = array<i64: 128, 128>}, {pipeline_mode = #tpu.pipeline_mode<synchronous>, transform_indices = @transform_4, window_bounds = array<i64: 1, 128>}, {transform_indices = @transform_5, window_bounds = array<i64: 1, 256, 128>}]} {
    %c0_i32 = arith.constant 0 : i32
    %0 = arith.cmpi eq, %arg2, %c0_i32 : i32
    %1 = arith.extui %0 : i1 to i32
    %c0_i32_0 = arith.constant 0 : i32
    %2 = arith.cmpi ne, %1, %c0_i32_0 : i32
    scf.if %2 {
      %cst_21 = arith.constant 0.000000e+00 : f32
      %29 = vector.broadcast %cst_21 : f32 to vector<256x128xf32>
      %c0_22 = arith.constant 0 : index
      %c0_23 = arith.constant 0 : index
      %30 = vector.load %arg9[%c0_22, %c0_23] : memref<256x128xf32, #tpu.memory_space<vmem>>, vector<256x128xf32>
      tpu.vector_store %arg9[%c0_22, %c0_23], %29 {strides = array<i32>} : memref<256x128xf32, #tpu.memory_space<vmem>>, vector<256x128xf32>,
    } else {
    }
    %c0 = arith.constant 0 : index
    %c0_1 = arith.constant 0 : index
    %3 = arith.index_cast %arg2 : i32 to index
    %c0_2 = arith.constant 0 : index
    %c0_3 = arith.constant 0 : index
    %4 = vector.load %arg3[%c0, %c0_1, %3, %c0_2, %c0_3] : memref<1x1x18x18x4xbf16, #tpu.memory_space<vmem>>, vector<1x1x16x18x4xbf16>
    %5 = vector.shape_cast %4 : vector<1x1x16x18x4xbf16> to vector<16x18x4xbf16>
    %6 = vector.extract_strided_slice %5 {offsets = [0, 0, 0], sizes = [16, 16, 4], strides = [1, 1, 1]} : vector<16x18x4xbf16> to vector<16x16x4xbf16>
    %7 = vector.shape_cast %6 : vector<16x16x4xbf16> to vector<256x4xbf16>
    %c0_4 = arith.constant 0 : index
    %c0_5 = arith.constant 0 : index
    %c0_6 = arith.constant 0 : index
    %c0_7 = arith.constant 0 : index
    %8 = vector.load %arg4[%c0_4, %c0_5, %c0_6, %c0_7] : memref<1x3x4x128xbf16, #tpu.memory_space<vmem>>, vector<1x1x4x128xbf16>
    %9 = vector.shape_cast %8 : vector<1x1x4x128xbf16> to vector<4x128xbf16>
    %cst = arith.constant dense<0.000000e+00> : vector<256x128xf32>
    %10 = tpu.matmul %7, %9, %cst {dimension_numbers = #tpu.dot_dimension_numbers<[1], [0], [0], [1], [0, 0, 1, 1], [], []>} : vector<256x4xbf16>, vector<4x128xbf16>, vector<256x128xf32> -> vector<256x128xf32>
    %11 = vector.extract_strided_slice %5 {offsets = [0, 1, 0], sizes = [16, 16, 4], strides = [1, 1, 1]} : vector<16x18x4xbf16> to vector<16x16x4xbf16>
    %12 = vector.shape_cast %11 : vector<16x16x4xbf16> to vector<256x4xbf16>
    %c0_8 = arith.constant 0 : index
    %c1 = arith.constant 1 : index
    %c0_9 = arith.constant 0 : index
    %c0_10 = arith.constant 0 : index
    %13 = vector.load %arg4[%c0_8, %c1, %c0_9, %c0_10] : memref<1x3x4x128xbf16, #tpu.memory_space<vmem>>, vector<1x1x4x128xbf16>
    %14 = vector.shape_cast %13 : vector<1x1x4x128xbf16> to vector<4x128xbf16>
    %cst_11 = arith.constant dense<0.000000e+00> : vector<256x128xf32>
    %15 = tpu.matmul %12, %14, %cst_11 {dimension_numbers = #tpu.dot_dimension_numbers<[1], [0], [0], [1], [0, 0, 1, 1], [], []>} : vector<256x4xbf16>, vector<4x128xbf16>, vector<256x128xf32> -> vector<256x128xf32>
    %16 = arith.addf %10, %15 : vector<256x128xf32>
    %17 = vector.extract_strided_slice %5 {offsets = [0, 2, 0], sizes = [16, 16, 4], strides = [1, 1, 1]} : vector<16x18x4xbf16> to vector<16x16x4xbf16>
    %18 = vector.shape_cast %17 : vector<16x16x4xbf16> to vector<256x4xbf16>
    %c0_12 = arith.constant 0 : index
    %c2 = arith.constant 2 : index
    %c0_13 = arith.constant 0 : index
    %c0_14 = arith.constant 0 : index
    %19 = vector.load %arg4[%c0_12, %c2, %c0_13, %c0_14] : memref<1x3x4x128xbf16, #tpu.memory_space<vmem>>, vector<1x1x4x128xbf16>
    %20 = vector.shape_cast %19 : vector<1x1x4x128xbf16> to vector<4x128xbf16>
    %cst_15 = arith.constant dense<0.000000e+00> : vector<256x128xf32>
    %21 = tpu.matmul %18, %20, %cst_15 {dimension_numbers = #tpu.dot_dimension_numbers<[1], [0], [0], [1], [0, 0, 1, 1], [], []>} : vector<256x4xbf16>, vector<4x128xbf16>, vector<256x128xf32> -> vector<256x128xf32>
    %22 = arith.addf %16, %21 : vector<256x128xf32>
    %c0_16 = arith.constant 0 : index
    %c0_17 = arith.constant 0 : index
    %23 = vector.load %arg9[%c0_16, %c0_17] : memref<256x128xf32, #tpu.memory_space<vmem>>, vector<256x128xf32>
    %24 = arith.addf %23, %22 : vector<256x128xf32>
    %c0_18 = arith.constant 0 : index
    %c0_19 = arith.constant 0 : index
    %25 = vector.load %arg9[%c0_18, %c0_19] : memref<256x128xf32, #tpu.memory_space<vmem>>, vector<256x128xf32>
    tpu.vector_store %arg9[%c0_18, %c0_19], %24 {strides = array<i32>} : memref<256x128xf32, #tpu.memory_space<vmem>>, vector<256x128xf32>,
    %c2_i32 = arith.constant 2 : i32
    %26 = arith.cmpi eq, %arg2, %c2_i32 : i32
    %27 = arith.extui %26 : i1 to i32
    %c0_i32_20 = arith.constant 0 : i32
    %28 = arith.cmpi ne, %27, %c0_i32_20 : i32
    scf.if %28 {
      %c0_21 = arith.constant 0 : index
      %c0_22 = arith.constant 0 : index
      %29 = vector.load %arg9[%c0_21, %c0_22] : memref<256x128xf32, #tpu.memory_space<vmem>>, vector<256x128xf32>
      %c0_23 = arith.constant 0 : index
      %c0_24 = arith.constant 0 : index
      %30 = vector.load %arg5[%c0_23, %c0_24] : memref<1x128xf32, #tpu.memory_space<vmem>>, vector<1x128xf32>
      %31 = vector.broadcast %30 : vector<1x128xf32> to vector<256x128xf32>
      %32 = arith.addf %29, %31 : vector<256x128xf32>
      %cst_25 = arith.constant 1.000000e-01 : f32
      %33 = vector.broadcast %cst_25 : f32 to vector<256x128xf32>
      %34 = arith.mulf %33, %32 : vector<256x128xf32>
      %35 = arith.maximumf %32, %34 : vector<256x128xf32>
      %36 = arith.truncf %35 : vector<256x128xf32> to vector<256x128xbf16>
      %c0_26 = arith.constant 0 : index
      %c0_27 = arith.constant 0 : index
      %37 = vector.load %arg6[%c0_26, %c0_27] : memref<128x128xbf16, #tpu.memory_space<vmem>>, vector<128x128xbf16>
      %cst_28 = arith.constant dense<0.000000e+00> : vector<256x128xf32>
      %38 = tpu.matmul %36, %37, %cst_28 {dimension_numbers = #tpu.dot_dimension_numbers<[1], [0], [0], [1], [0, 0, 1, 1], [], []>} : vector<256x128xbf16>, vector<128x128xbf16>, vector<256x128xf32> -> vector<256x128xf32>
      %c0_29 = arith.constant 0 : index
      %c0_30 = arith.constant 0 : index
      %39 = vector.load %arg7[%c0_29, %c0_30] : memref<1x128xf32, #tpu.memory_space<vmem>>, vector<1x128xf32>
      %40 = vector.broadcast %39 : vector<1x128xf32> to vector<256x128xf32>
      %41 = arith.addf %38, %40 : vector<256x128xf32>
      %c0_31 = arith.constant 0 : index
      %c0_32 = arith.constant 0 : index
      %c0_33 = arith.constant 0 : index
      %42 = vector.load %arg8[%c0_31, %c0_32, %c0_33] : memref<1x256x128xf32, #tpu.memory_space<vmem>>, vector<1x256x128xf32>
      %43 = vector.shape_cast %42 : vector<1x256x128xf32> to vector<256x128xf32>
      %44 = vector.shape_cast %41 : vector<256x128xf32> to vector<1x256x128xf32>
      tpu.vector_store %arg8[%c0_31, %c0_32, %c0_33], %44 {strides = array<i32>} : memref<1x256x128xf32, #tpu.memory_space<vmem>>, vector<1x256x128xf32>,
    } else {
    }
    return
  }
  func.func @transform_0(%arg0: i32, %arg1: i32, %arg2: i32) -> (i32, i32, i32, i32, i32) {
    %c0_i32 = arith.constant 0 : i32
    %c0_i32_0 = arith.constant 0 : i32
    %c0_i32_1 = arith.constant 0 : i32
    %c0_i32_2 = arith.constant 0 : i32
    return %arg0, %arg1, %c0_i32, %c0_i32_0, %c0_i32_1 : i32, i32, i32, i32, i32
  }
  func.func @transform_1(%arg0: i32, %arg1: i32, %arg2: i32) -> (i32, i32, i32, i32) {
    %c0_i32 = arith.constant 0 : i32
    %c0_i32_0 = arith.constant 0 : i32
    %c0_i32_1 = arith.constant 0 : i32
    %c0_i32_2 = arith.constant 0 : i32
    return %arg2, %c0_i32, %c0_i32_0, %c0_i32_1 : i32, i32, i32, i32
  }
  func.func @transform_2(%arg0: i32, %arg1: i32, %arg2: i32) -> (i32, i32) {
    %c0_i32 = arith.constant 0 : i32
    %c0_i32_0 = arith.constant 0 : i32
    %c0_i32_1 = arith.constant 0 : i32
    return %c0_i32, %c0_i32_0 : i32, i32
  }
  func.func @transform_3(%arg0: i32, %arg1: i32, %arg2: i32) -> (i32, i32) {
    %c0_i32 = arith.constant 0 : i32
    %c0_i32_0 = arith.constant 0 : i32
    %c0_i32_1 = arith.constant 0 : i32
    return %c0_i32, %c0_i32_0 : i32, i32
  }
  func.func @transform_4(%arg0: i32, %arg1: i32, %arg2: i32) -> (i32, i32) {
    %c0_i32 = arith.constant 0 : i32
    %c0_i32_0 = arith.constant 0 : i32
    %c0_i32_1 = arith.constant 0 : i32
    return %c0_i32, %c0_i32_0 : i32, i32
  }
  func.func @transform_5(%arg0: i32, %arg1: i32, %arg2: i32) -> (i32, i32, i32) {
    %c0_i32 = arith.constant 0 : i32
    %c0_i32_0 = arith.constant 0 : i32
    return %arg0, %arg1, %c0_i32 : i32, i32, i32
  }
}

module attributes {stable_mosaic.version = 11 : i64} {
  func.func @_scale_pred_kernel(%arg0: i32, %arg1: i32, %arg2: i32, %arg3: memref<1x1x18x18x4xbf16, #tpu.memory_space<vmem>>, %arg4: memref<1x3x4x128xbf16, #tpu.memory_space<vmem>>, %arg5: memref<1x128xf32, #tpu.memory_space<vmem>>, %arg6: memref<128x128xbf16, #tpu.memory_space<vmem>>, %arg7: memref<1x128xf32, #tpu.memory_space<vmem>>, %arg8: memref<1x256x128xf32, #tpu.memory_space<vmem>>, %arg9: memref<256x128xf32, #tpu.memory_space<vmem>>) attributes {dimension_semantics = [#tpu.dimension_semantics<parallel>, #tpu.dimension_semantics<parallel>, #tpu.dimension_semantics<arbitrary>], iteration_bounds = array<i64: 2, 1, 3>, scalar_prefetch = 0 : i64, scratch_operands = 1 : i64, tpu.core_type = #tpu.core_type<tc>, window_params = [{transform_indices = @transform_0, window_bounds = array<i64: 1, 1, 18, 18, 4>}, {transform_indices = @transform_1, window_bounds = array<i64: 1, 3, 4, 128>}, {pipeline_mode = #tpu.pipeline_mode<synchronous>, transform_indices = @transform_2, window_bounds = array<i64: 1, 128>}, {pipeline_mode = #tpu.pipeline_mode<synchronous>, transform_indices = @transform_3, window_bounds = array<i64: 128, 128>}, {pipeline_mode = #tpu.pipeline_mode<synchronous>, transform_indices = @transform_4, window_bounds = array<i64: 1, 128>}, {transform_indices = @transform_5, window_bounds = array<i64: 1, 256, 128>}]} {
    %c0_i32 = arith.constant 0 : i32
    %0 = arith.cmpi eq, %arg2, %c0_i32 : i32
    %1 = arith.extui %0 : i1 to i32
    %c0_i32_0 = arith.constant 0 : i32
    %2 = arith.cmpi ne, %1, %c0_i32_0 : i32
    scf.if %2 {
      %cst_21 = arith.constant 0.000000e+00 : f32
      %29 = vector.broadcast %cst_21 : f32 to vector<256x128xf32>
      %c0_22 = arith.constant 0 : index
      %c0_23 = arith.constant 0 : index
      %30 = vector.load %arg9[%c0_22, %c0_23] : memref<256x128xf32, #tpu.memory_space<vmem>>, vector<256x128xf32>
      tpu.vector_store %arg9[%c0_22, %c0_23], %29 {strides = array<i32>} : memref<256x128xf32, #tpu.memory_space<vmem>>, vector<256x128xf32>,
    } else {
    }
    %c0 = arith.constant 0 : index
    %c0_1 = arith.constant 0 : index
    %3 = arith.index_cast %arg2 : i32 to index
    %c0_2 = arith.constant 0 : index
    %c0_3 = arith.constant 0 : index
    %4 = vector.load %arg3[%c0, %c0_1, %3, %c0_2, %c0_3] : memref<1x1x18x18x4xbf16, #tpu.memory_space<vmem>>, vector<1x1x16x18x4xbf16>
    %5 = vector.shape_cast %4 : vector<1x1x16x18x4xbf16> to vector<16x18x4xbf16>
    %6 = vector.extract_strided_slice %5 {offsets = [0, 0, 0], sizes = [16, 16, 4], strides = [1, 1, 1]} : vector<16x18x4xbf16> to vector<16x16x4xbf16>
    %7 = vector.shape_cast %6 : vector<16x16x4xbf16> to vector<256x4xbf16>
    %c0_4 = arith.constant 0 : index
    %c0_5 = arith.constant 0 : index
    %c0_6 = arith.constant 0 : index
    %c0_7 = arith.constant 0 : index
    %8 = vector.load %arg4[%c0_4, %c0_5, %c0_6, %c0_7] : memref<1x3x4x128xbf16, #tpu.memory_space<vmem>>, vector<1x1x4x128xbf16>
    %9 = vector.shape_cast %8 : vector<1x1x4x128xbf16> to vector<4x128xbf16>
    %cst = arith.constant dense<0.000000e+00> : vector<256x128xf32>
    %10 = tpu.matmul %7, %9, %cst {dimension_numbers = #tpu.dot_dimension_numbers<[1], [0], [0], [1], [0, 0, 1, 1], [], []>} : vector<256x4xbf16>, vector<4x128xbf16>, vector<256x128xf32> -> vector<256x128xf32>
    %11 = vector.extract_strided_slice %5 {offsets = [0, 1, 0], sizes = [16, 16, 4], strides = [1, 1, 1]} : vector<16x18x4xbf16> to vector<16x16x4xbf16>
    %12 = vector.shape_cast %11 : vector<16x16x4xbf16> to vector<256x4xbf16>
    %c0_8 = arith.constant 0 : index
    %c1 = arith.constant 1 : index
    %c0_9 = arith.constant 0 : index
    %c0_10 = arith.constant 0 : index
    %13 = vector.load %arg4[%c0_8, %c1, %c0_9, %c0_10] : memref<1x3x4x128xbf16, #tpu.memory_space<vmem>>, vector<1x1x4x128xbf16>
    %14 = vector.shape_cast %13 : vector<1x1x4x128xbf16> to vector<4x128xbf16>
    %cst_11 = arith.constant dense<0.000000e+00> : vector<256x128xf32>
    %15 = tpu.matmul %12, %14, %cst_11 {dimension_numbers = #tpu.dot_dimension_numbers<[1], [0], [0], [1], [0, 0, 1, 1], [], []>} : vector<256x4xbf16>, vector<4x128xbf16>, vector<256x128xf32> -> vector<256x128xf32>
    %16 = arith.addf %10, %15 : vector<256x128xf32>
    %17 = vector.extract_strided_slice %5 {offsets = [0, 2, 0], sizes = [16, 16, 4], strides = [1, 1, 1]} : vector<16x18x4xbf16> to vector<16x16x4xbf16>
    %18 = vector.shape_cast %17 : vector<16x16x4xbf16> to vector<256x4xbf16>
    %c0_12 = arith.constant 0 : index
    %c2 = arith.constant 2 : index
    %c0_13 = arith.constant 0 : index
    %c0_14 = arith.constant 0 : index
    %19 = vector.load %arg4[%c0_12, %c2, %c0_13, %c0_14] : memref<1x3x4x128xbf16, #tpu.memory_space<vmem>>, vector<1x1x4x128xbf16>
    %20 = vector.shape_cast %19 : vector<1x1x4x128xbf16> to vector<4x128xbf16>
    %cst_15 = arith.constant dense<0.000000e+00> : vector<256x128xf32>
    %21 = tpu.matmul %18, %20, %cst_15 {dimension_numbers = #tpu.dot_dimension_numbers<[1], [0], [0], [1], [0, 0, 1, 1], [], []>} : vector<256x4xbf16>, vector<4x128xbf16>, vector<256x128xf32> -> vector<256x128xf32>
    %22 = arith.addf %16, %21 : vector<256x128xf32>
    %c0_16 = arith.constant 0 : index
    %c0_17 = arith.constant 0 : index
    %23 = vector.load %arg9[%c0_16, %c0_17] : memref<256x128xf32, #tpu.memory_space<vmem>>, vector<256x128xf32>
    %24 = arith.addf %23, %22 : vector<256x128xf32>
    %c0_18 = arith.constant 0 : index
    %c0_19 = arith.constant 0 : index
    %25 = vector.load %arg9[%c0_18, %c0_19] : memref<256x128xf32, #tpu.memory_space<vmem>>, vector<256x128xf32>
    tpu.vector_store %arg9[%c0_18, %c0_19], %24 {strides = array<i32>} : memref<256x128xf32, #tpu.memory_space<vmem>>, vector<256x128xf32>,
    %c2_i32 = arith.constant 2 : i32
    %26 = arith.cmpi eq, %arg2, %c2_i32 : i32
    %27 = arith.extui %26 : i1 to i32
    %c0_i32_20 = arith.constant 0 : i32
    %28 = arith.cmpi ne, %27, %c0_i32_20 : i32
    scf.if %28 {
      %c0_21 = arith.constant 0 : index
      %c0_22 = arith.constant 0 : index
      %29 = vector.load %arg9[%c0_21, %c0_22] : memref<256x128xf32, #tpu.memory_space<vmem>>, vector<256x128xf32>
      %c0_23 = arith.constant 0 : index
      %c0_24 = arith.constant 0 : index
      %30 = vector.load %arg5[%c0_23, %c0_24] : memref<1x128xf32, #tpu.memory_space<vmem>>, vector<1x128xf32>
      %31 = vector.broadcast %30 : vector<1x128xf32> to vector<256x128xf32>
      %32 = arith.addf %29, %31 : vector<256x128xf32>
      %cst_25 = arith.constant 1.000000e-01 : f32
      %33 = vector.broadcast %cst_25 : f32 to vector<256x128xf32>
      %34 = arith.mulf %33, %32 : vector<256x128xf32>
      %35 = arith.maximumf %32, %34 : vector<256x128xf32>
      %36 = arith.truncf %35 : vector<256x128xf32> to vector<256x128xbf16>
      %c0_26 = arith.constant 0 : index
      %c0_27 = arith.constant 0 : index
      %37 = vector.load %arg6[%c0_26, %c0_27] : memref<128x128xbf16, #tpu.memory_space<vmem>>, vector<128x128xbf16>
      %cst_28 = arith.constant dense<0.000000e+00> : vector<256x128xf32>
      %38 = tpu.matmul %36, %37, %cst_28 {dimension_numbers = #tpu.dot_dimension_numbers<[1], [0], [0], [1], [0, 0, 1, 1], [], []>} : vector<256x128xbf16>, vector<128x128xbf16>, vector<256x128xf32> -> vector<256x128xf32>
      %c0_29 = arith.constant 0 : index
      %c0_30 = arith.constant 0 : index
      %39 = vector.load %arg7[%c0_29, %c0_30] : memref<1x128xf32, #tpu.memory_space<vmem>>, vector<1x128xf32>
      %40 = vector.broadcast %39 : vector<1x128xf32> to vector<256x128xf32>
      %41 = arith.addf %38, %40 : vector<256x128xf32>
      %c0_31 = arith.constant 0 : index
      %c0_32 = arith.constant 0 : index
      %c0_33 = arith.constant 0 : index
      %42 = vector.load %arg8[%c0_31, %c0_32, %c0_33] : memref<1x256x128xf32, #tpu.memory_space<vmem>>, vector<1x256x128xf32>
      %43 = vector.shape_cast %42 : vector<1x256x128xf32> to vector<256x128xf32>
      %44 = vector.shape_cast %41 : vector<256x128xf32> to vector<1x256x128xf32>
      tpu.vector_store %arg8[%c0_31, %c0_32, %c0_33], %44 {strides = array<i32>} : memref<1x256x128xf32, #tpu.memory_space<vmem>>, vector<1x256x128xf32>,
    } else {
    }
    return
  }
  func.func @transform_0(%arg0: i32, %arg1: i32, %arg2: i32) -> (i32, i32, i32, i32, i32) {
    %c0_i32 = arith.constant 0 : i32
    %c0_i32_0 = arith.constant 0 : i32
    %c0_i32_1 = arith.constant 0 : i32
    %c0_i32_2 = arith.constant 0 : i32
    return %arg0, %arg1, %c0_i32, %c0_i32_0, %c0_i32_1 : i32, i32, i32, i32, i32
  }
  func.func @transform_1(%arg0: i32, %arg1: i32, %arg2: i32) -> (i32, i32, i32, i32) {
    %c0_i32 = arith.constant 0 : i32
    %c0_i32_0 = arith.constant 0 : i32
    %c0_i32_1 = arith.constant 0 : i32
    %c0_i32_2 = arith.constant 0 : i32
    return %arg2, %c0_i32, %c0_i32_0, %c0_i32_1 : i32, i32, i32, i32
  }
  func.func @transform_2(%arg0: i32, %arg1: i32, %arg2: i32) -> (i32, i32) {
    %c0_i32 = arith.constant 0 : i32
    %c0_i32_0 = arith.constant 0 : i32
    %c0_i32_1 = arith.constant 0 : i32
    return %c0_i32, %c0_i32_0 : i32, i32
  }
  func.func @transform_3(%arg0: i32, %arg1: i32, %arg2: i32) -> (i32, i32) {
    %c0_i32 = arith.constant 0 : i32
    %c0_i32_0 = arith.constant 0 : i32
    %c0_i32_1 = arith.constant 0 : i32
    return %c0_i32, %c0_i32_0 : i32, i32
  }
  func.func @transform_4(%arg0: i32, %arg1: i32, %arg2: i32) -> (i32, i32) {
    %c0_i32 = arith.constant 0 : i32
    %c0_i32_0 = arith.constant 0 : i32
    %c0_i32_1 = arith.constant 0 : i32
    return %c0_i32, %c0_i32_0 : i32, i32
  }
  func.func @transform_5(%arg0: i32, %arg1: i32, %arg2: i32) -> (i32, i32, i32) {
    %c0_i32 = arith.constant 0 : i32
    %c0_i32_0 = arith.constant 0 : i32
    return %arg0, %arg1, %c0_i32 : i32, i32, i32
  }
}

</mosaic_0001>

<bundles_post_ra>
// kernel: tpu_custom_call.1
= control target key start
LH: loop header
LB: loop body
LE: loop exit
PB: predicated region body
PF: predicated region fallthrough
CT: control target
= control target key end

     0   :  { %10 = vsyncpa [#allocation4], 0  ;;  %s3149_s0 = inlined_call_operand.vmem [shape: bf16[2,1,18,18,4], index: 0, kind: input, shape index: {}]   ;;  %s3150_s1 = inlined_call_operand.vmem [shape: bf16[3,3,4,128], index: 1, kind: input, shape index: {}]   ;;  %s3151_s2 = inlined_call_operand.vmem [shape: f32[1,128], index: 2, kind: input, shape index: {}]   ;;  %s3152_s3 = inlined_call_operand.vmem [shape: bf16[128,128], index: 3, kind: input, shape index: {}]   ;;  %s3153_s4 = inlined_call_operand.vmem [shape: f32[1,128], index: 4, kind: input, shape index: {}]   ;;  %s3154_s5 = inlined_call_operand.hbm [shape: f32[2,256,128], index: 5, kind: output, shape index: {}]  }
   0x1   :  { %12 = vsyncpa [#allocation4 + $0x1], 0  ;;  %s2515_s18 = smov 0   ;;  %s2517_s19 = smov 0  }
   0x2   :  { %s2519_s20 = smov 0   ;;  %s2521_s21 = smov 0  }
   0x3   :  { %s2523_s22 = smov 0   ;;  %s2525_s23 = smov 0  }
   0x4   :  { %s2527_s24 = smov 0   ;;  %s2529_s25 = smov 0  }
   0x5 LB: > { %s2077_s26 = sadd.s32 4294967295, %s2480_s25   ;;  %s2078_s27 = sadd.s32 4294967294, %s2480_s25   ;;  %s2480_s25 = sphi %s2529_s25, %s18_s25   ;;  %s2476_s24 = sphi %s2527_s24, %s3170_s24   ;;  %s2472_s23 = sphi %s2525_s23, %s3169_s23   ;;  %s2468_s22 = sphi %s2523_s22, %s3168_s22   ;;  %s2464_s21 = sphi %s2521_s21, %s3167_s21   ;;  %s2460_s20 = sphi %s2519_s20, %s3166_s20   ;;  %s2456_s19 = sphi %s2517_s19, %s3165_s19   ;;  %s2452_s18 = sphi %s2515_s18, %s3164_s18  }
   0x6   : > { %s30_s28 = sadd.s32 1, %s2472_s23  ;;  %s37_s29 = sadd.s32 1, %s2476_s24 }
   0x7   : > { %p31_p0 = scmp.ge.s32.totalorder %s30_s28, 3  ;;  %p173_p1 = scmp.ne.s32.totalorder %s2460_s20, %s2456_s19 }
   0x8   : > { %p174_p2 = scmp.eq.s32.totalorder %s2077_s26, 5  ;;  %p179_p4 = scmp.ne.s32.totalorder %s2456_s19, %s2452_s18 }
   0x9   : > { %s3172_s28 = smov (%p31_p0, %s30_s28), 0  ;;  %s3174_s29 = smov (!%p31_p0, %s37_s29), %s2476_s24 }
   0xa   : > { %p2564_p3 = por %p174_p2, %p173_p1  ;;  %p39_p5 = scmp.ge.s32.totalorder %s3174_s29, 2 }
   0xb   : > { %p180_p6 = scmp.eq.s32.totalorder %s2078_s27, 5  ;;  %p2081_p7 = scmp.ge.s32.totalorder %s2480_s25, 1 }
   0xc   : > { %p227_p8 = scmp.lt.s32.totalorder %s2480_s25, 7  ;;  %s3176_s29 = smov (%p39_p5, %s3174_s29), 0 }
   0xd   : > { %3157 = sst [smem:[#allocation6_spill]] %s3176_s29  ;;  %p2574_p9 = por %p180_p6, %p179_p4 }
   0xe   : > { %p228_p10 = pnand %p2081_p7, %p227_p8  ;;  %s158_s7 = ssub.s32 %s2476_s24, %s3176_s29 }
   0xf   : > { %s163_s8 = sadd.s32 1, %s2460_s20  ;;  %p161_p11 = scmp.eq.s32.totalorder %s158_s7, 0 }
  0x10   : > { %231 = sbr.rel (%p228_p10) target bundleno = 647 (0x287), region = 40  ;;  %s261_s10 = sand.u32 (!%p228_p10), 1, %s2456_s19  }
  0x11   : > { %s2582_s9 = scalar_select %p161_p11, %s2460_s20, %s163_s8  }
  0x12   : > { %p264_p12 = scmp.lt.s32.totalorder (!%p228_p10), %s2468_s22, 1  ;;  %s2082_s11 = sshll.u32 (!%p228_p10), %s261_s10, 8 }
  0x13   : > { %p273_p13 = scmp.lt.s32.totalorder (!%p228_p10), %s2464_s21, 2  ;;  %s2601_s29 = scalar_lea.vmem (!%p228_p10), [#allocation3], %s2082_s11 }
  0x14   : > { %p2085_p0 = scmp.ne.s32.totalorder (!%p228_p10), %s2464_s21, 0 }
  0x15   : > { %s265_s12 = scalar_select %p264_p12, %s2468_s22, 1 }
  0x16   : > { %s274_s13 = scalar_select %p273_p13, %s2464_s21, 2 }
  0x17   : > { %s2308_s14 = smul.u32 216, %s265_s12 }
  0x18   : > { %s2309_s15 = smul.u32 6, %s274_s13 }
  0x19   : > { %s2594_s26 = scalar_lea.vmem %s3149_s0, %s2308_s14  ;;  %283 = sbr.rel (%p2085_p0) target bundleno = 63 (0x3f), region = 44 }
  0x1a   : > { %s2599_s8 = scalar_lea.vmem %s3150_s1, %s2309_s15 }
  0x1e   : > { %v2482_v0 = vmov 0.0  }
  0x1f   : > { %284 = vst [vmem:[#allocation2 + $0xb0] sm:$0xff] %v2482_v0 }
  0x20   : > { %285 = vst [vmem:[#allocation2] sm:$0xff] %v2482_v0 }
  0x21   : > { %286 = vst [vmem:[#allocation2 + $0xd8] sm:$0xff] %v2482_v0 }
  0x22   : > { %287 = vst [vmem:[#allocation2 + $0x18] sm:$0xff] %v2482_v0 }
  0x23   : > { %288 = vst [vmem:[#allocation2 + $0x50] sm:$0xff] %v2482_v0 }
  0x24   : > { %289 = vst [vmem:[#allocation2 + $0x68] sm:$0xff] %v2482_v0 }
  0x25   : > { %290 = vst [vmem:[#allocation2 + $0x30] sm:$0xff] %v2482_v0 }
  0x26   : > { %291 = vst [vmem:[#allocation2 + $0x48] sm:$0xff] %v2482_v0 }
  0x27   : > { %292 = vst [vmem:[#allocation2 + $0x80] sm:$0xff] %v2482_v0 }
  0x28   : > { %293 = vst [vmem:[#allocation2 + $0x88] sm:$0xff] %v2482_v0 }
  0x29   : > { %294 = vst [vmem:[#allocation2 + $0xe8] sm:$0xff] %v2482_v0 }
  0x2a   : > { %295 = vst [vmem:[#allocation2 + $0xb8] sm:$0xff] %v2482_v0 }
  0x2b   : > { %296 = vst [vmem:[#allocation2 + $0x60] sm:$0xff] %v2482_v0 }
  0x2c   : > { %297 = vst [vmem:[#allocation2 + $0xf0] sm:$0xff] %v2482_v0 }
  0x2d   : > { %298 = vst [vmem:[#allocation2 + $0x8] sm:$0xff] %v2482_v0 }
  0x2e   : > { %299 = vst [vmem:[#allocation2 + $0x78] sm:$0xff] %v2482_v0 }
  0x2f   : > { %300 = vst [vmem:[#allocation2 + $0x38] sm:$0xff] %v2482_v0 }
  0x30   : > { %301 = vst [vmem:[#allocation2 + $0x58] sm:$0xff] %v2482_v0 }
  0x31   : > { %302 = vst [vmem:[#allocation2 + $0x40] sm:$0xff] %v2482_v0 }
  0x32   : > { %303 = vst [vmem:[#allocation2 + $0xc8] sm:$0xff] %v2482_v0 }
  0x33   : > { %304 = vst [vmem:[#allocation2 + $0xe0] sm:$0xff] %v2482_v0 }
  0x34   : > { %305 = vst [vmem:[#allocation2 + $0x90] sm:$0xff] %v2482_v0 }
  0x35   : > { %306 = vst [vmem:[#allocation2 + $0x70] sm:$0xff] %v2482_v0 }
  0x36   : > { %307 = vst [vmem:[#allocation2 + $0xc0] sm:$0xff] %v2482_v0 }
  0x37   : > { %308 = vst [vmem:[#allocation2 + $0xa8] sm:$0xff] %v2482_v0 }
  0x38   : > { %309 = vst [vmem:[#allocation2 + $0xd0] sm:$0xff] %v2482_v0 }
  0x39   : > { %310 = vst [vmem:[#allocation2 + $0x10] sm:$0xff] %v2482_v0 }
  0x3a   : > { %311 = vst [vmem:[#allocation2 + $0x28] sm:$0xff] %v2482_v0 }
  0x3b   : > { %312 = vst [vmem:[#allocation2 + $0xa0] sm:$0xff] %v2482_v0 }
  0x3c   : > { %313 = vst [vmem:[#allocation2 + $0xf8] sm:$0xff] %v2482_v0 }
  0x3d   : > { %314 = vst [vmem:[#allocation2 + $0x20] sm:$0xff] %v2482_v0 }
  0x3e   : > { %315 = vst [vmem:[#allocation2 + $0x98] sm:$0xff] %v2482_v0 }
  0x3f PF: > { %v367_v1 = vld [vmem:[%s2599_s8] sm:$0x3]  ;;  %vm854_vm0 = vcmask 1041408   ;;  %v2200_v2 = vld [vmem:[%s2599_s8 + $0x4] sm:$0x3]  ;;  %s2255_s11 = smul.u32 12, %s2464_s21 }
  0x40   : > { %v1076_v3 = vsel %vm854_vm0, %v367_v1, 0  ;;  %v2607_v4 = vsel %vm854_vm0, %v2200_v2, 0  ;;  %vm805_vm1 = vcmask 31744   ;;  %vm1183_vm2 = vcmask 1042432   ;;  %v2087_v5 = vld [vmem:[%s2599_s8 + $0x2] sm:$0x3] }
  0x41   : > { %1085 = vmatpush.bf16.msra.mxu1 %v1076_v3  ;;  %1406 = vmatpush.bf16.msra.mxu2 %v2607_v4  ;;  %s2612_s12 = scalar_lea.vmem %s2594_s26, %s2255_s11  ;;  %vm1184_vm3 = vcmask 1046532   ;;  %v856_v6 = vsel %vm854_vm0, %v2087_v5, 0  ;;  %vm368_vm4 = vsmask.f32 3328  ;;  %vm369_vm5 = vsmask.f32 7440 }
  0x42   : > { %v2256_v7 = vld [vmem:[%s2612_s12] sm:$0xff]  ;;  %865 = vmatpush.bf16.msra.mxu0 %v856_v6  ;;  %2281 = vmatpush.bf16.msra.mxu3 %v856_v6  ;;  %v321_v10 = vld [vmem:[%s2612_s12 + $0x8] sm:$0x1]  ;;  %vm2619_vm6 = vmor %vm1183_vm2, %vm1184_vm3  ;;  %p2217_p1 = scmp.ne.s32.totalorder %s2464_s21, 2 }
  0x43   : > { %v319_v8 = vld [vmem:[%s2612_s12] sm:$0xf]  ;;  %v320_v9 = vld [vmem:[%s2612_s12 + $0x4] sm:$0xf]  ;;  %v1191_v16 = vrot.slane %v321_v10, 5  ;;  %v391_v19 = vshll.u32 %v321_v10, 16  ;;  %vm2641_vm7 = vmor %vm368_vm4, %vm369_vm5 }
  0x44   : > { %v2184_v12 = vrot.slane %v319_v8, 9  ;;  %v1188_v13 = vrot.slane %v320_v9, 5  ;;  %v372_v14 = vshrl.u32 %v319_v8, 16  ;;  %v375_v15 = vshll.u32 %v319_v8, 16  ;;  %2168 = vmatmul.msk.bf16.vlgmr.msra.gmra.mxu1 %vm805_vm1, %v2256_v7  ;;  %v2625_v20 = vld [vmem:[%s2612_s12 + $0x90] sm:$0xf] }
  0x45   : > { %v381_v17 = vshll.u32 %v320_v9, 16  ;;  %v385_v18 = vshrl.u32 %v320_v9, 16  ;;  %v2630_v25 = vld [vmem:[%s2612_s12 + $0x94] sm:$0xf]  ;;  %v393_v29 = vrot.slane %v391_v19, 5  ;;  %v660_v33 = vshrl.u32 %v2625_v20, 16 }
  0x46   : > { %2282 = vmatpush.bf16.msrb.mxu3 %v1076_v3  ;;  %v1189_v21 = vsel %vm2619_vm6, %v2184_v12, %v1188_v13  ;;  %v1190_v22 = vrot.slane %v1188_v13, 4  ;;  %v374_v23 = vrot.slane %v372_v14, 4  ;;  %v377_v24 = vrot.slane %v375_v15, 5  ;;  %v2633_v30 = vld [vmem:[%s2612_s12 + $0x98] sm:$0x1]  ;;  %v2257_v6 = vld [vmem:[%s2612_s12 + $0xc] sm:$0xff] }
  0x47   : > { %v1300_v26 = vunpack.c.l.b16 %v1189_v21  ;;  %v383_v27 = vrot.slane %v381_v17, 5  ;;  %v387_v28 = vrot.slane %v385_v18, 4  ;;  %v663_v34 = vshll.u32 %v2625_v20, 16  ;;  %v323_v50 = vld [vmem:[%s2612_s12 + $0x10] sm:$0xf] }
  0x48   : > { %v1192_v31 = vsel %vm2619_vm6, %v1190_v22, %v1191_v16  ;;  %v378_v32 = vor.u32 %v377_v24, %v374_v23  ;;  %v669_v38 = vshll.u32 %v2630_v25, 16  ;;  %v673_v39 = vshrl.u32 %v2630_v25, 16  ;;  %v324_v51 = vld [vmem:[%s2612_s12 + $0x14] sm:$0x1]  ;;  %v322_v56 = vld [vmem:[%s2612_s12 + $0xc] sm:$0xf] }
  0x49   : > { %v1301_v35 = vunpack.c.l.b16 %v1192_v31  ;;  %v388_v37 = vor.u32 %v387_v28, %v383_v27  ;;  %v662_v41 = vrot.slane %v660_v33, 4  ;;  %v665_v42 = vrot.slane %v663_v34, 5  ;;  %v2664_v9 = vld [vmem:[%s2612_s12 + $0x9c] sm:$0xf]  ;;  %v2670_v19 = vld [vmem:[%s2612_s12 + $0xa0] sm:$0xf] }
  0x4a   : > { %v379_v40 = vrot.slane %v378_v32, 4  ;;  %v679_v43 = vshll.u32 %v2633_v30, 16  ;;  %v671_v46 = vrot.slane %v669_v38, 5  ;;  %v675_v47 = vrot.slane %v673_v39, 4  ;;  %v2673_v24 = vld [vmem:[%s2612_s12 + $0xa4] sm:$0x1] }
  0x4b   : > { %v1332_v44 = vpack.c.b16 %v1301_v35, %v1300_v26  ;;  %v389_v45 = vrot.slane %v388_v37, 4  ;;  %v666_v49 = vor.u32 %v665_v42, %v662_v41  ;;  %v2185_v59 = vrot.slane %v322_v56, 9  ;;  %v326_v31 = vld [vmem:[%s2612_s12 + $0x1c] sm:$0xf] }
  0x4c   : > { %v384_v48 = vsel %vm2641_vm7, %v379_v40, %v383_v27  ;;  %v676_v54 = vor.u32 %v675_v47, %v671_v46  ;;  %v681_v55 = vrot.slane %v679_v43, 5  ;;  %v1195_v61 = vrot.slane %v323_v50, 5 }
  0x4d   : > { %2201 = vmatmul.msk.bf16.vlgmr.msra.gmra.mxu2 %vm805_vm1, %v1332_v44  ;;  %v394_v52 = vsel %vm2641_vm7, %v389_v45, %v393_v29  ;;  %v757_v53 = vunpack.c.l.b16 %v384_v48  ;;  %v667_v58 = vrot.slane %v666_v49, 4  ;;  %v1198_v62 = vrot.slane %v324_v51, 5  ;;  %v325_v44 = vld [vmem:[%s2612_s12 + $0x18] sm:$0xf]  ;;  %v327_v45 = vld [vmem:[%s2612_s12 + $0x20] sm:$0x1] }
  0x4e   : > { %v758_v57 = vunpack.c.l.b16 %v394_v52  ;;  %v677_v60 = vrot.slane %v676_v54, 4  ;;  %v396_v1 = vshrl.u32 %v322_v56, 16  ;;  %v399_v2 = vshll.u32 %v322_v56, 16 }
  0x4f   : > { %v672_v0 = vsel %vm2641_vm7, %v667_v58, %v671_v46  ;;  %v1196_v7 = vsel %vm2619_vm6, %v2185_v59, %v1195_v61  ;;  %v1197_v8 = vrot.slane %v1195_v61, 4  ;;  %v405_v16 = vshll.u32 %v323_v50, 16 }
  0x50   : > { %v789_v63 = vpack.c.b16 %v758_v57, %v757_v53  ;;  %v682_v3 = vsel %vm2641_vm7, %v677_v60, %v681_v55  ;;  %v781_v5 = vunpack.c.l.b16 %v672_v0  ;;  %v1302_v12 = vunpack.c.l.b16 %v1196_v7  ;;  %v2696_v0 = vld [vmem:[%s2612_s12 + $0xa8] sm:$0xf] }
  0x51   : > { %v782_v10 = vunpack.c.l.b16 %v682_v3  ;;  %v398_v13 = vrot.slane %v396_v1, 4  ;;  %v401_v14 = vrot.slane %v399_v2, 5  ;;  %v1199_v15 = vsel %vm2619_vm6, %v1197_v8, %v1198_v62 }
  0x52   : > { %2088 = vmatmul.msk.bf16.vlgmr.msra.gmra.mxu0 %vm805_vm1, %v789_v63  ;;  %v409_v17 = vshrl.u32 %v323_v50, 16  ;;  %v415_v18 = vshll.u32 %v324_v51, 16  ;;  %v1303_v22 = vunpack.c.l.b16 %v1199_v15  ;;  %v684_v26 = vshrl.u32 %v2664_v9, 16 }
  0x53   : > { %v801_v21 = vpack.c.b16 %v782_v10, %v781_v5  ;;  %v402_v23 = vor.u32 %v401_v14, %v398_v13  ;;  %v407_v27 = vrot.slane %v405_v16, 5  ;;  %v687_v29 = vshll.u32 %v2664_v9, 16  ;;  %v2258_v14 = vld [vmem:[%s2612_s12 + $0x18] sm:$0xff] }
  0x54   : > { %2169 = vmatmul.msk.bf16.gmra.mxu1 %vm805_vm1, %v2257_v6  ;;  %v411_v28 = vrot.slane %v409_v17, 4  ;;  %v417_v33 = vrot.slane %v415_v18, 5  ;;  %v686_v34 = vrot.slane %v684_v26, 4  ;;  %v693_v35 = vshll.u32 %v2670_v19, 16  ;;  %v2699_v6 = vld [vmem:[%s2612_s12 + $0xac] sm:$0xf] }
  0x55   : > { %2100 = vmatmul.msk.bf16.vlgmr.msra.gmra.mxu3 %vm805_vm1, %v801_v21  ;;  %v403_v32 = vrot.slane %v402_v23, 4  ;;  %v689_v38 = vrot.slane %v687_v29, 5  ;;  %v697_v39 = vshrl.u32 %v2670_v19, 16  ;;  %v703_v40 = vshll.u32 %v2673_v24, 16  ;;  %v2708_v21 = vld [vmem:[%s2612_s12 + $0xb0] sm:$0x1] }
  0x56   : > { %v412_v37 = vor.u32 %v411_v28, %v407_v27  ;;  %2283 = vmatpush.bf16.msra.mxu3 %v2607_v4  ;;  %v1333_v41 = vpack.c.b16 %v1303_v22, %v1302_v12  ;;  %v695_v43 = vrot.slane %v693_v35, 5  ;;  %v1202_v46 = vrot.slane %v326_v31, 5 }
  0x57   : > { %v408_v42 = vsel %vm2641_vm7, %v403_v32, %v407_v27  ;;  %v690_v48 = vor.u32 %v689_v38, %v686_v34  ;;  %v699_v49 = vrot.slane %v697_v39, 4  ;;  %v2186_v50 = vrot.slane %v325_v44, 9 }
  0x58   : > { %v413_v47 = vrot.slane %v412_v37, 4  ;;  %v759_v51 = vunpack.c.l.b16 %v408_v42  ;;  %v705_v52 = vrot.slane %v703_v40, 5  ;;  %v1204_v53 = vrot.slane %v1202_v46, 4  ;;  %v329_v37 = vld [vmem:[%s2612_s12 + $0x28] sm:$0xf] }
  0x59   : > { %v691_v4 = vrot.slane %v690_v48, 4  ;;  %v700_v55 = vor.u32 %v699_v49, %v695_v43  ;;  %v1205_v56 = vrot.slane %v327_v45, 5  ;;  %v420_v58 = vshrl.u32 %v325_v44, 16 }
  0x5a   : > { %v418_v54 = vsel %vm2641_vm7, %v413_v47, %v417_v33  ;;  %v423_v59 = vshll.u32 %v325_v44, 16  ;;  %v1203_v62 = vsel %vm2619_vm6, %v2186_v50, %v1202_v46  ;;  %v429_v63 = vshll.u32 %v326_v31, 16  ;;  %v328_v44 = vld [vmem:[%s2612_s12 + $0x24] sm:$0xf] }
  0x5b   : > { %v760_v57 = vunpack.c.l.b16 %v418_v54  ;;  %v696_v60 = vsel %vm2641_vm7, %v691_v4, %v695_v43  ;;  %v701_v61 = vrot.slane %v700_v55, 4  ;;  %v422_v3 = vrot.slane %v420_v58, 4  ;;  %v2729_v58 = vld [vmem:[%s2612_s12 + $0xb4] sm:$0xf] }
  0x5c   : > { %v783_v2 = vunpack.c.l.b16 %v696_v60  ;;  %v425_v5 = vrot.slane %v423_v59, 5  ;;  %v1206_v8 = vsel %vm2619_vm6, %v1204_v53, %v1205_v56  ;;  %v431_v10 = vrot.slane %v429_v63, 5  ;;  %v2732_v63 = vld [vmem:[%s2612_s12 + $0xb8] sm:$0xf] }
  0x5d   : > { %2202 = vmatmul.msk.bf16.gmra.mxu2 %vm805_vm1, %v1333_v41  ;;  %v790_v1 = vpack.c.b16 %v760_v57, %v759_v51  ;;  %v706_v7 = vsel %vm2641_vm7, %v701_v61, %v705_v52  ;;  %v433_v12 = vshrl.u32 %v326_v31, 16  ;;  %v439_v16 = vshll.u32 %v327_v45, 16  ;;  %v330_v52 = vld [vmem:[%s2612_s12 + $0x2c] sm:$0x1] }
  0x5e   : > { %v784_v13 = vunpack.c.l.b16 %v706_v7  ;;  %v426_v15 = vor.u32 %v425_v5, %v422_v3  ;;  %v708_v17 = vshrl.u32 %v2696_v0, 16  ;;  %v711_v22 = vshll.u32 %v2696_v0, 16 }
  0x5f   : > { %v435_v18 = vrot.slane %v433_v12, 4  ;;  %v717_v23 = vshll.u32 %v2699_v6, 16  ;;  %v721_v26 = vshrl.u32 %v2699_v6, 16  ;;  %v441_v29 = vrot.slane %v439_v16, 5 }
  0x60   : > { %v802_v27 = vpack.c.b16 %v784_v13, %v783_v2  ;;  %v427_v28 = vrot.slane %v426_v15, 4  ;;  %v710_v31 = vrot.slane %v708_v17, 4  ;;  %v713_v33 = vrot.slane %v711_v22, 5  ;;  %v2740_v22 = vld [vmem:[%s2612_s12 + $0xbc] sm:$0x1] }
  0x61   : > { %v436_v32 = vor.u32 %v435_v18, %v431_v10  ;;  %v719_v34 = vrot.slane %v717_v23, 5  ;;  %v723_v35 = vrot.slane %v721_v26, 4  ;;  %v1304_v38 = vunpack.c.l.b16 %v1203_v62 }
  0x62   : > { %2089 = vmatmul.msk.bf16.gmra.mxu0 %vm805_vm1, %v790_v1  ;;  %v1305_v39 = vunpack.c.l.b16 %v1206_v8  ;;  %v727_v40 = vshll.u32 %v2708_v21, 16  ;;  %v714_v42 = vor.u32 %v713_v33, %v710_v31  ;;  %v1209_v46 = vrot.slane %v329_v37, 5  ;;  %v2259_v33 = vld [vmem:[%s2612_s12 + $0x24] sm:$0xff] }
  0x63   : > { %v437_v41 = vrot.slane %v436_v32, 4  ;;  %v724_v43 = vor.u32 %v723_v35, %v719_v34  ;;  %v432_v47 = vsel %vm2641_vm7, %v427_v28, %v431_v10  ;;  %v444_v53 = vshrl.u32 %v328_v44, 16 }
  0x64   : > { %2170 = vmatmul.msk.bf16.gmra.mxu1 %vm805_vm1, %v2258_v14  ;;  %v729_v45 = vrot.slane %v727_v40, 5  ;;  %v715_v49 = vrot.slane %v714_v42, 4  ;;  %v1334_v51 = vpack.c.b16 %v1305_v39, %v1304_v38  ;;  %v447_v54 = vshll.u32 %v328_v44, 16  ;;  %v331_v42 = vld [vmem:[%s2612_s12 + $0x30] sm:$0xf] }
  0x65   : > { %2101 = vmatmul.msk.bf16.gmra.mxu3 %vm805_vm1, %v802_v27  ;;  %v442_v48 = vsel %vm2641_vm7, %v437_v41, %v441_v29  ;;  %v725_v50 = vrot.slane %v724_v43, 4  ;;  %v2187_v56 = vrot.slane %v328_v44, 9  ;;  %v453_v57 = vshll.u32 %v329_v37, 16  ;;  %v332_v43 = vld [vmem:[%s2612_s12 + $0x34] sm:$0xf] }
  0x66   : > { %v720_v4 = vsel %vm2641_vm7, %v715_v49, %v719_v34  ;;  %v761_v59 = vunpack.c.l.b16 %v432_v47  ;;  %v762_v60 = vunpack.c.l.b16 %v442_v48  ;;  %v1211_v61 = vrot.slane %v1209_v46, 4 }
  0x67   : > { %v730_v55 = vsel %vm2641_vm7, %v725_v50, %v729_v45  ;;  %v446_v62 = vrot.slane %v444_v53, 4  ;;  %v1212_v1 = vrot.slane %v330_v52, 5  ;;  %v449_v2 = vrot.slane %v447_v54, 5 }
  0x68   : > { %v455_v3 = vrot.slane %v453_v57, 5  ;;  %v457_v5 = vshrl.u32 %v329_v37, 16  ;;  %v785_v7 = vunpack.c.l.b16 %v720_v4  ;;  %v786_v8 = vunpack.c.l.b16 %v730_v55 }
  0x69   : > { %v732_v10 = vshrl.u32 %v2729_v58, 16  ;;  %v735_v12 = vshll.u32 %v2729_v58, 16  ;;  %v463_v14 = vshll.u32 %v330_v52, 16  ;;  %v741_v15 = vshll.u32 %v2732_v63, 16 }
  0x6a   : > { %v459_v13 = vrot.slane %v457_v5, 4  ;;  %v745_v16 = vshrl.u32 %v2732_v63, 16  ;;  %v791_v17 = vpack.c.b16 %v762_v60, %v761_v59  ;;  %v450_v18 = vor.u32 %v449_v2, %v446_v62 }
  0x6b   : > { %v734_v23 = vrot.slane %v732_v10, 4  ;;  %v737_v26 = vrot.slane %v735_v12, 5  ;;  %v743_v28 = vrot.slane %v741_v15, 5  ;;  %v1210_v31 = vsel %vm2619_vm6, %v2187_v56, %v1209_v46 }
  0x6c   : > { %v460_v27 = vor.u32 %v459_v13, %v455_v3  ;;  %v747_v29 = vrot.slane %v745_v16, 4  ;;  %v803_v32 = vpack.c.b16 %v786_v8, %v785_v7  ;;  %v1213_v34 = vsel %vm2619_vm6, %v1211_v61, %v1212_v1  ;;  %v333_v61 = vld [vmem:[%s2612_s12 + $0x38] sm:$0x1] }
  0x6d   : > { %2203 = vmatmul.msk.bf16.gmra.mxu2 %vm805_vm1, %v1334_v51  ;;  %v465_v35 = vrot.slane %v463_v14, 5  ;;  %v751_v37 = vshll.u32 %v2740_v22, 16  ;;  %v451_v38 = vrot.slane %v450_v18, 4  ;;  %v738_v40 = vor.u32 %v737_v26, %v734_v23 }
  0x6e   : > { %v461_v39 = vrot.slane %v460_v27, 4  ;;  %v748_v41 = vor.u32 %v747_v29, %v743_v28  ;;  %v1306_v44 = vunpack.c.l.b16 %v1210_v31  ;;  %v1307_v45 = vunpack.c.l.b16 %v1213_v34  ;;  %v334_v27 = vld [vmem:[%s2612_s12 + $0x3c] sm:$0xf] }
  0x6f   : > { %v753_v46 = vrot.slane %v751_v37, 5  ;;  %v456_v47 = vsel %vm2641_vm7, %v451_v38, %v455_v3  ;;  %v739_v49 = vrot.slane %v738_v40, 4  ;;  %v468_v51 = vshrl.u32 %v331_v42, 16 }
  0x70   : > { %v466_v48 = vsel %vm2641_vm7, %v461_v39, %v465_v35  ;;  %v749_v50 = vrot.slane %v748_v41, 4  ;;  %v471_v52 = vshll.u32 %v331_v42, 16  ;;  %v477_v53 = vshll.u32 %v332_v43, 16 }
  0x71   : > { %v481_v54 = vshrl.u32 %v332_v43, 16  ;;  %v1335_v4 = vpack.c.b16 %v1307_v45, %v1306_v44  ;;  %v1216_v55 = vrot.slane %v332_v43, 5  ;;  %v763_v56 = vunpack.c.l.b16 %v456_v47 }
  0x72   : > { %2090 = vmatmul.msk.bf16.gmra.mxu0 %vm805_vm1, %v791_v17  ;;  %v764_v57 = vunpack.c.l.b16 %v466_v48  ;;  %v744_v59 = vsel %vm2641_vm7, %v739_v49, %v743_v28  ;;  %v754_v60 = vsel %vm2641_vm7, %v749_v50, %v753_v46  ;;  %v470_v62 = vrot.slane %v468_v51, 4  ;;  %v2260_v17 = vld [vmem:[%s2612_s12 + $0x30] sm:$0xff]  ;;  %v336_v48 = vld [vmem:[%s2612_s12 + $0x44] sm:$0x1] }
  0x73   : > { %v473_v1 = vrot.slane %v471_v52, 5  ;;  %v479_v2 = vrot.slane %v477_v53, 5  ;;  %v483_v3 = vrot.slane %v481_v54, 4  ;;  %v2188_v5 = vrot.slane %v331_v42, 9 }
  0x74   : > { %2171 = vmatmul.msk.bf16.gmra.mxu1 %vm805_vm1, %v2259_v33  ;;  %v1219_v7 = vrot.slane %v333_v61, 5  ;;  %v792_v8 = vpack.c.b16 %v764_v57, %v763_v56  ;;  %v787_v10 = vunpack.c.l.b16 %v744_v59  ;;  %v788_v12 = vunpack.c.l.b16 %v754_v60  ;;  %v2261_v57 = vld [vmem:[%s2612_s12 + $0x3c] sm:$0xff]  ;;  %v2268_v60 = vld [vmem:[%s2612_s12 + $0x90] sm:$0xff] }
  0x75   : > { %2102 = vmatmul.msk.bf16.gmra.mxu3 %vm805_vm1, %v803_v32  ;;  %v1218_v13 = vrot.slane %v1216_v55, 4  ;;  %v474_v14 = vor.u32 %v473_v1, %v470_v62  ;;  %v484_v15 = vor.u32 %v483_v3, %v479_v2  ;;  %v487_v16 = vshll.u32 %v333_v61, 16  ;;  %v335_v32 = vld [vmem:[%s2612_s12 + $0x40] sm:$0xf]  ;;  %v337_v3 = vld [vmem:[%s2612_s12 + $0x48] sm:$0xf] }
  0x76   : > { %v804_v18 = vpack.c.b16 %v788_v12, %v787_v10  ;;  %v1217_v23 = vsel %vm2619_vm6, %v2188_v5, %v1216_v55  ;;  %v492_v35 = vshrl.u32 %v334_v27, 16  ;;  %v495_v37 = vshll.u32 %v334_v27, 16  ;;  %v338_v5 = vld [vmem:[%s2612_s12 + $0x4c] sm:$0xf] }
  0x77   : > { %v1220_v26 = vsel %vm2619_vm6, %v1218_v13, %v1219_v7  ;;  %v475_v28 = vrot.slane %v474_v14, 4  ;;  %v485_v29 = vrot.slane %v484_v15, 4  ;;  %v489_v31 = vrot.slane %v487_v16, 5 }
  0x78   : > { %v1308_v33 = vunpack.c.l.b16 %v1217_v23  ;;  %v1309_v34 = vunpack.c.l.b16 %v1220_v26  ;;  %v501_v38 = vshll.u32 %v335_v32, 16  ;;  %v505_v39 = vshrl.u32 %v335_v32, 16 }
  0x79   : > { %v480_v40 = vsel %vm2641_vm7, %v475_v28, %v479_v2  ;;  %v490_v41 = vsel %vm2641_vm7, %v485_v29, %v489_v31  ;;  %v1223_v43 = vrot.slane %v335_v32, 5  ;;  %v494_v44 = vrot.slane %v492_v35, 4 }
  0x7a   : > { %v1336_v42 = vpack.c.b16 %v1309_v34, %v1308_v33  ;;  %v497_v45 = vrot.slane %v495_v37, 5  ;;  %v765_v46 = vunpack.c.l.b16 %v480_v40  ;;  %v766_v47 = vunpack.c.l.b16 %v490_v41  ;;  %v2262_v41 = vld [vmem:[%s2612_s12 + $0x48] sm:$0xff] }
  0x7b   : > { %v503_v49 = vrot.slane %v501_v38, 5  ;;  %v507_v50 = vrot.slane %v505_v39, 4  ;;  %v2189_v51 = vrot.slane %v334_v27, 9  ;;  %v1225_v52 = vrot.slane %v1223_v43, 4  ;;  %v339_v27 = vld [vmem:[%s2612_s12 + $0x50] sm:$0x1] }
  0x7c   : > { %v1226_v53 = vrot.slane %v336_v48, 5  ;;  %v793_v54 = vpack.c.b16 %v766_v47, %v765_v46  ;;  %v511_v56 = vshll.u32 %v336_v48, 16  ;;  %v516_v13 = vshrl.u32 %v337_v3, 16 }
  0x7d   : > { %2204 = vmatmul.msk.bf16.gmra.mxu2 %vm805_vm1, %v1335_v4  ;;  %v498_v4 = vor.u32 %v497_v45, %v494_v44  ;;  %v508_v55 = vor.u32 %v507_v50, %v503_v49  ;;  %v1224_v59 = vsel %vm2619_vm6, %v2189_v51, %v1223_v43  ;;  %v519_v14 = vshll.u32 %v337_v3, 16  ;;  %v340_v45 = vld [vmem:[%s2612_s12 + $0x54] sm:$0xf] }
  0x7e   : > { %v1227_v61 = vsel %vm2619_vm6, %v1225_v52, %v1226_v53  ;;  %v513_v2 = vrot.slane %v511_v56, 5  ;;  %v1310_v7 = vunpack.c.l.b16 %v1224_v59  ;;  %v525_v15 = vshll.u32 %v338_v5, 16 }
  0x7f   : > { %v499_v62 = vrot.slane %v498_v4, 4  ;;  %v509_v1 = vrot.slane %v508_v55, 4  ;;  %v529_v16 = vshrl.u32 %v338_v5, 16  ;;  %v1230_v26 = vrot.slane %v338_v5, 5 }
  0x80   : > { %v518_v28 = vrot.slane %v516_v13, 4  ;;  %v521_v29 = vrot.slane %v519_v14, 5  ;;  %v527_v31 = vrot.slane %v525_v15, 5  ;;  %v2190_v34 = vrot.slane %v337_v3, 9  ;;  %v342_v3 = vld [vmem:[%s2612_s12 + $0x5c] sm:$0x1] }
  0x81   : > { %v504_v10 = vsel %vm2641_vm7, %v499_v62, %v503_v49  ;;  %v514_v12 = vsel %vm2641_vm7, %v509_v1, %v513_v2  ;;  %v531_v32 = vrot.slane %v529_v16, 4  ;;  %v1232_v35 = vrot.slane %v1230_v26, 4  ;;  %v341_v49 = vld [vmem:[%s2612_s12 + $0x58] sm:$0xf] }
  0x82   : > { %2091 = vmatmul.msk.bf16.gmra.mxu0 %vm805_vm1, %v792_v8  ;;  %v1311_v8 = vunpack.c.l.b16 %v1227_v61  ;;  %v768_v23 = vunpack.c.l.b16 %v514_v12  ;;  %v1233_v37 = vrot.slane %v339_v27, 5  ;;  %v522_v38 = vor.u32 %v521_v29, %v518_v28  ;;  %v2270_v29 = vld [vmem:[%s2612_s12 + $0xa8] sm:$0xff] }
  0x83   : > { %v532_v39 = vor.u32 %v531_v32, %v527_v31  ;;  %v535_v40 = vshll.u32 %v339_v27, 16  ;;  %v1231_v43 = vsel %vm2619_vm6, %v2190_v34, %v1230_v26  ;;  %v540_v52 = vshrl.u32 %v340_v45, 16  ;;  %v2263_v26 = vld [vmem:[%s2612_s12 + $0x54] sm:$0xff] }
  0x84   : > { %2172 = vmatmul.msk.bf16.gmra.mxu1 %vm805_vm1, %v2260_v17  ;;  %v1337_v17 = vpack.c.b16 %v1311_v8, %v1310_v7  ;;  %v1234_v44 = vsel %vm2619_vm6, %v1232_v35, %v1233_v37  ;;  %v523_v46 = vrot.slane %v522_v38, 4  ;;  %v1312_v50 = vunpack.c.l.b16 %v1231_v43  ;;  %v343_v35 = vld [vmem:[%s2612_s12 + $0x60] sm:$0xf]  ;;  %v344_v37 = vld [vmem:[%s2612_s12 + $0x64] sm:$0xf] }
  0x85   : > { %2103 = vmatmul.msk.bf16.gmra.mxu3 %vm805_vm1, %v804_v18  ;;  %v767_v18 = vunpack.c.l.b16 %v504_v10  ;;  %v533_v47 = vrot.slane %v532_v39, 4  ;;  %v537_v48 = vrot.slane %v535_v40, 5  ;;  %v1313_v51 = vunpack.c.l.b16 %v1234_v44 }
  0x86   : > { %v543_v53 = vshll.u32 %v340_v45, 16  ;;  %v553_v4 = vshrl.u32 %v341_v49, 16  ;;  %v528_v55 = vsel %vm2641_vm7, %v523_v46, %v527_v31  ;;  %v542_v61 = vrot.slane %v540_v52, 4 }
  0x87   : > { %v794_v33 = vpack.c.b16 %v768_v23, %v767_v18  ;;  %v538_v56 = vsel %vm2641_vm7, %v533_v47, %v537_v48  ;;  %v1338_v59 = vpack.c.b16 %v1313_v51, %v1312_v50  ;;  %v769_v1 = vunpack.c.l.b16 %v528_v55  ;;  %v345_v51 = vld [vmem:[%s2612_s12 + $0x68] sm:$0x1] }
  0x88   : > { %v545_v62 = vrot.slane %v543_v53, 5  ;;  %v770_v2 = vunpack.c.l.b16 %v538_v56  ;;  %v555_v7 = vrot.slane %v553_v4, 4  ;;  %v2196_v8 = vrot.slane %v2625_v20, 9 }
  0x89   : > { %v1275_v10 = vrot.slane %v2633_v30, 5  ;;  %v2191_v12 = vrot.slane %v340_v45, 9  ;;  %v1240_v14 = vrot.slane %v342_v3, 5  ;;  %v559_v18 = vshll.u32 %v342_v3, 16 }
  0x8a   : > { %v546_v15 = vor.u32 %v545_v62, %v542_v61  ;;  %v795_v16 = vpack.c.b16 %v770_v2, %v769_v1  ;;  %v564_v43 = vshrl.u32 %v343_v35, 16  ;;  %v567_v44 = vshll.u32 %v343_v35, 16  ;;  %v2264_v1 = vld [vmem:[%s2612_s12 + $0x60] sm:$0xff]  ;;  %v2271_v2 = vld [vmem:[%s2612_s12 + $0xb4] sm:$0xff] }
  0x8b   : > { %v561_v32 = vrot.slane %v559_v18, 5  ;;  %v573_v45 = vshll.u32 %v344_v37, 16  ;;  %v577_v46 = vshrl.u32 %v344_v37, 16  ;;  %v1244_v50 = vrot.slane %v344_v37, 5 }
  0x8c   : > { %v547_v30 = vrot.slane %v546_v15, 4  ;;  %v566_v52 = vrot.slane %v564_v43, 4  ;;  %v569_v53 = vrot.slane %v567_v44, 5  ;;  %v2192_v56 = vrot.slane %v343_v35, 9 }
  0x8d   : > { %2205 = vmatmul.msk.bf16.gmra.mxu2 %vm805_vm1, %v1336_v42  ;;  %v2269_v42 = vld [vmem:[%s2612_s12 + $0x9c] sm:$0xff]  ;;  %v579_v4 = vrot.slane %v577_v46, 4  ;;  %v583_v62 = vshll.u32 %v345_v51, 16 }
  0x92   : > { %2092 = vmatmul.msk.bf16.gmra.mxu0 %vm805_vm1, %v793_v54  ;;  %v549_v54 = vshll.u32 %v341_v49, 16 }
  0x94   : > { %2173 = vmatmul.msk.bf16.gmra.mxu1 %vm805_vm1, %v2261_v57  ;;  %v1272_v57 = vrot.slane %v2630_v25, 5  ;;  %v551_v5 = vrot.slane %v549_v54, 5  ;;  %v575_v54 = vrot.slane %v573_v45, 5 }
  0x95   : > { %2180 = vmatmul.msk.bf16.vlgmr.msrb.gmra.mxu3 %vm805_vm1, %v2268_v60  ;;  %v1237_v60 = vrot.slane %v341_v49, 5 }
  0x96   : > { %v1274_v13 = vrot.slane %v1272_v57, 4  ;;  %v1273_v27 = vsel %vm2619_vm6, %v2196_v8, %v1272_v57  ;;  %v1246_v57 = vrot.slane %v1244_v50, 4  ;;  %v580_v61 = vor.u32 %v579_v4, %v575_v54  ;;  %v346_v8 = vld [vmem:[%s2612_s12 + $0x6c] sm:$0xf] }
  0x97   : > { %v1239_v25 = vrot.slane %v1237_v60, 4  ;;  %v1238_v23 = vsel %vm2619_vm6, %v2191_v12, %v1237_v60  ;;  %v570_v60 = vor.u32 %v569_v53, %v566_v52  ;;  %v1520_v52 = vld [vmem:[#allocation2 + $0xb0] sm:$0xff] }
  0x98   : > { %v1276_v28 = vsel %vm2619_vm6, %v1274_v13, %v1275_v10  ;;  %v1314_v39 = vunpack.c.l.b16 %v1238_v23  ;;  %v581_v12 = vrot.slane %v580_v61, 4  ;;  %v585_v13 = vrot.slane %v583_v62, 5  ;;  %v2265_v53 = vld [vmem:[%s2612_s12 + $0x6c] sm:$0xff]  ;;  %v350_v62 = vld [vmem:[%s2612_s12 + $0x7c] sm:$0xf] }
  0x99   : > { %v1241_v20 = vsel %vm2619_vm6, %v1239_v25, %v1240_v14  ;;  %v1325_v34 = vunpack.c.l.b16 %v1276_v28  ;;  %v571_v10 = vrot.slane %v570_v60, 4  ;;  %v347_v25 = vld [vmem:[%s2612_s12 + $0x70] sm:$0xf]  ;;  %v348_v28 = vld [vmem:[%s2612_s12 + $0x74] sm:$0x1] }
  0x9a   : > { %v1315_v40 = vunpack.c.l.b16 %v1241_v20  ;;  %v597_v18 = vshll.u32 %v347_v25, 16  ;;  %v601_v23 = vshrl.u32 %v347_v25, 16  ;;  %v586_v20 = vsel %vm2641_vm7, %v581_v12, %v585_v13 }
  0x9b   : > { %v607_v45 = vshll.u32 %v348_v28, 16  ;;  %v621_v12 = vshll.u32 %v350_v62, 16 }
  0x9c   : > { %v1339_v47 = vpack.c.b16 %v1315_v40, %v1314_v39  ;;  %v599_v35 = vrot.slane %v597_v18, 5  ;;  %v603_v37 = vrot.slane %v601_v23, 4  ;;  %v2193_v39 = vrot.slane %v346_v8, 9 }
  0x9d   : > { %2206 = vmatmul.msk.bf16.gmra.mxu2 %vm805_vm1, %v1337_v17  ;;  %v556_v17 = vor.u32 %v555_v7, %v551_v5 }
  0x9e   : > { %v604_v44 = vor.u32 %v603_v37, %v599_v35 }
  0x9f   : > { %v557_v31 = vrot.slane %v556_v17, 4  ;;  %v591_v17 = vshll.u32 %v346_v8, 16 }
  0xa2   : > { %2093 = vmatmul.msk.bf16.gmra.mxu0 %vm805_vm1, %v794_v33  ;;  %v1324_v33 = vunpack.c.l.b16 %v1273_v27 }
  0xa4   : > { %2174 = vmatmul.msk.bf16.gmra.mxu1 %vm805_vm1, %v2262_v41  ;;  %v2829_v38 = vpack.c.b16 %v1325_v34, %v1324_v33  ;;  %v552_v41 = vsel %vm2641_vm7, %v547_v30, %v551_v5  ;;  %v1245_v5 = vsel %vm2619_vm6, %v2192_v56, %v1244_v50  ;;  %v1251_v30 = vrot.slane %v347_v25, 5 }
  0xa5   : > { %2181 = vmatmul.msk.bf16.gmra.mxu3 %vm805_vm1, %v2269_v42  ;;  %v562_v42 = vsel %vm2641_vm7, %v557_v31, %v561_v32  ;;  %v771_v48 = vunpack.c.l.b16 %v552_v41  ;;  %v1316_v14 = vunpack.c.l.b16 %v1245_v5  ;;  %v593_v31 = vrot.slane %v591_v17, 5 }
  0xa6   : > { %v772_v49 = vunpack.c.l.b16 %v562_v42  ;;  %v774_v33 = vunpack.c.l.b16 %v586_v20  ;;  %v1253_v40 = vrot.slane %v1251_v30, 4  ;;  %v1254_v41 = vrot.slane %v348_v28, 5  ;;  %v351_v28 = vld [vmem:[%s2612_s12 + $0x80] sm:$0x1] }
  0xa7   : > { %v605_v56 = vrot.slane %v604_v44, 4  ;;  %v1282_v5 = vrot.slane %v2673_v24, 5  ;;  %v631_v44 = vshll.u32 %v351_v28, 16 }
  0xa8   : > { %v796_v55 = vpack.c.b16 %v772_v49, %v771_v48  ;;  %v1252_v49 = vsel %vm2619_vm6, %v2193_v39, %v1251_v30  ;;  %v1255_v50 = vsel %vm2619_vm6, %v1253_v40, %v1254_v41  ;;  %v1261_v40 = vrot.slane %v351_v28, 5 }
  0xa9   : > { %v1318_v60 = vunpack.c.l.b16 %v1252_v49  ;;  %v1319_v61 = vunpack.c.l.b16 %v1255_v50  ;;  %v1522_v49 = vld [vmem:[#allocation2 + $0xd8] sm:$0xff] }
  0xad   : > { %2207 = vmatmul.msk.bf16.gmra.mxu2 %vm805_vm1, %v1338_v59  ;;  %v1247_v59 = vrot.slane %v345_v51, 5  ;;  %v1279_v51 = vrot.slane %v2670_v19, 5 }
  0xaf   : > { %v1248_v7 = vsel %vm2619_vm6, %v1246_v57, %v1247_v59  ;;  %v609_v57 = vrot.slane %v607_v45, 5  ;;  %v349_v59 = vld [vmem:[%s2612_s12 + $0x78] sm:$0xf] }
  0xb0   : > { %v1317_v15 = vunpack.c.l.b16 %v1248_v7  ;;  %v612_v7 = vshrl.u32 %v349_v59, 16  ;;  %v2194_v37 = vrot.slane %v349_v59, 9 }
  0xb2   : > { %2094 = vmatmul.msk.bf16.gmra.mxu0 %vm805_vm1, %v795_v16  ;;  %v588_v16 = vshrl.u32 %v346_v8, 16  ;;  %v1340_v27 = vpack.c.b16 %v1317_v15, %v1316_v14  ;;  %v610_v8 = vsel %vm2641_vm7, %v605_v56, %v609_v57  ;;  %v1341_v14 = vpack.c.b16 %v1319_v61, %v1318_v60 }
  0xb3   : > { %v776_v23 = vunpack.c.l.b16 %v610_v8  ;;  %v614_v20 = vrot.slane %v612_v7, 4 }
  0xb4   : > { %2175 = vmatmul.msk.bf16.gmra.mxu1 %vm805_vm1, %v2263_v26  ;;  %v576_v26 = vsel %vm2641_vm7, %v571_v10, %v575_v54  ;;  %v615_v10 = vshll.u32 %v349_v59, 16  ;;  %v633_v59 = vrot.slane %v631_v44, 5 }
  0xb5   : > { %2182 = vmatmul.msk.bf16.gmra.mxu3 %vm805_vm1, %v2270_v29  ;;  %v590_v29 = vrot.slane %v588_v16, 4  ;;  %v773_v32 = vunpack.c.l.b16 %v576_v26  ;;  %v1258_v26 = vrot.slane %v350_v62, 5 }
  0xb7   : > { %v594_v42 = vor.u32 %v593_v31, %v590_v29  ;;  %v797_v43 = vpack.c.b16 %v774_v33, %v773_v32  ;;  %v617_v29 = vrot.slane %v615_v10, 5  ;;  %v623_v31 = vrot.slane %v621_v12, 5 }
  0xb8   : > { %v1260_v39 = vrot.slane %v1258_v26, 4 }
  0xb9   : > { %v595_v54 = vrot.slane %v594_v42, 4  ;;  %v618_v42 = vor.u32 %v617_v29, %v614_v20 }
  0xbb   : > { %v600_v19 = vsel %vm2641_vm7, %v595_v54, %v599_v35  ;;  %v1286_v54 = vrot.slane %v2699_v6, 5  ;;  %v619_v56 = vrot.slane %v618_v42, 4 }
  0xbc   : > { %v775_v18 = vunpack.c.l.b16 %v600_v19  ;;  %v1289_v19 = vrot.slane %v2708_v21, 5  ;;  %v1523_v21 = vld [vmem:[#allocation2 + $0x18] sm:$0xff] }
  0xbd   : > { %2208 = vmatmul.msk.bf16.gmra.mxu2 %vm805_vm1, %v1339_v47  ;;  %v624_v6 = vsel %vm2641_vm7, %v619_v56, %v623_v31 }
  0xbe   : > { %v798_v41 = vpack.c.b16 %v776_v23, %v775_v18  ;;  %v777_v18 = vunpack.c.l.b16 %v624_v6 }
  0xc1   : > { %v1087_v3 = vpop.f32.mrf.mxu1 }
  0xc2   : > { %2095 = vmatmul.msk.bf16.gmra.mxu0 %vm805_vm1, %v796_v55 }
  0xc4   : > { %2176 = vmatmul.msk.bf16.gmra.mxu1 %vm805_vm1, %v2264_v1 }
  0xc5   : > { %2183 = vmatmul.msk.bf16.gmra.mxu3 %vm805_vm1, %v2271_v2  ;;  %v2197_v2 = vrot.slane %v2664_v9, 9  ;;  %v625_v9 = vshrl.u32 %v350_v62, 16  ;;  %v352_v62 = vld [vmem:[%s2612_s12 + $0x84] sm:$0xf] }
  0xc6   : > { %v636_v10 = vshrl.u32 %v352_v62, 16  ;;  %v639_v12 = vshll.u32 %v352_v62, 16 }
  0xc7   : > { %v1280_v15 = vsel %vm2619_vm6, %v2197_v2, %v1279_v51  ;;  %v627_v32 = vrot.slane %v625_v9, 4 }
  0xc8   : > { %v638_v28 = vrot.slane %v636_v10, 4  ;;  %v641_v29 = vrot.slane %v639_v12, 5  ;;  %v1525_v10 = vld [vmem:[#allocation2 + $0x68] sm:$0xff] }
  0xc9   : > { %v1089_v34 = vpop.f32.mrf.mxu1 }
  0xca   : > { %v642_v42 = vor.u32 %v641_v29, %v638_v28 }
  0xcc   : > { %v643_v56 = vrot.slane %v642_v42, 4 }
  0xcd   : > { %2209 = vmatmul.msk.bf16.gmra.mxu2 %vm805_vm1, %v1340_v27 }
  0xcf   : > { %v867_v46 = vpop.f32.mrf.mxu0 }
  0xd0   : > { %v1088_v47 = vadd.f32 %v1087_v3, %v867_v46  ;;  %v1408_v48 = vpop.f32.mrf.mxu2  ;;  %v1281_v3 = vrot.slane %v1279_v51, 4  ;;  %v2266_v51 = vld [vmem:[%s2612_s12 + $0x78] sm:$0xff] }
  0xd1   : > { %v1092_v55 = vpop.f32.mrf.mxu1 }
  0xd2   : > { %v1488_v4 = vadd.f32 %v1408_v48, %v1088_v47  ;;  %2096 = vmatmul.msk.bf16.gmra.mxu0 %vm805_vm1, %v797_v43  ;;  %v1283_v16 = vsel %vm2619_vm6, %v1281_v3, %v1282_v5  ;;  %v628_v43 = vor.u32 %v627_v32, %v623_v31  ;;  %v2198_v3 = vrot.slane %v2696_v0, 9 }
  0xd3   : > { %v1327_v35 = vunpack.c.l.b16 %v1283_v16  ;;  %v1288_v5 = vrot.slane %v1286_v54, 4 }
  0xd4   : > { %v1552_v1 = vadd.f32 %v1520_v52, %v1488_v4  ;;  %2177 = vmatmul.msk.bf16.gmra.mxu1 %vm805_vm1, %v2265_v53  ;;  %v1259_v52 = vsel %vm2619_vm6, %v2194_v37, %v1258_v26  ;;  %v1262_v53 = vsel %vm2619_vm6, %v1260_v39, %v1261_v40  ;;  %v629_v57 = vrot.slane %v628_v43, 4 }
  0xd5   : > { %2213 = vmatmul.msk.bf16.vlgmr.msra.gmra.mxu3 %vm805_vm1, %v2829_v38  ;;  %v1521_v38 = vld [vmem:[#allocation2] sm:$0xff]  ;;  %v1320_v61 = vunpack.c.l.b16 %v1259_v52  ;;  %v1321_v2 = vunpack.c.l.b16 %v1262_v53  ;;  %v1290_v16 = vsel %vm2619_vm6, %v1288_v5, %v1289_v19  ;;  %v2195_v37 = vrot.slane %v352_v62, 9 }
  0xd6   : > { %1584 = vst [vmem:[#allocation2 + $0xb0] sm:$0xff] %v1552_v1  ;;  %v353_v1 = vld [vmem:[%s2612_s12 + $0x88] sm:$0xf]  ;;  %v634_v7 = vsel %vm2641_vm7, %v629_v57, %v633_v59 }
  0xd7   : > { %v869_v13 = vpop.f32.mrf.mxu0  ;;  %v645_v9 = vshll.u32 %v353_v1, 16  ;;  %v778_v23 = vunpack.c.l.b16 %v634_v7  ;;  %v1265_v20 = vrot.slane %v353_v1, 5 }
  0xd8   : > { %v1090_v25 = vadd.f32 %v1089_v34, %v869_v13  ;;  %v1410_v24 = vpop.f32.mrf.mxu2  ;;  %v2878_v17 = vpop.f32.mrf.mxu3  ;;  %v1326_v34 = vunpack.c.l.b16 %v1280_v15  ;;  %v649_v13 = vshrl.u32 %v353_v1, 16  ;;  %v1287_v15 = vsel %vm2619_vm6, %v2198_v3, %v1286_v54 }
  0xd9   : > { %v1094_v27 = vpop.f32.mrf.mxu1  ;;  %v1267_v39 = vrot.slane %v1265_v20, 4  ;;  %v1266_v54 = vsel %vm2619_vm6, %v2195_v37, %v1265_v20  ;;  %v2199_v1 = vrot.slane %v2729_v58, 9 }
  0xda   : > { %v1489_v30 = vadd.f32 %v1410_v24, %v1090_v25  ;;  %v1345_v50 = vpack.c.b16 %v1327_v35, %v1326_v34  ;;  %v651_v31 = vrot.slane %v649_v13, 4  ;;  %v1329_v34 = vunpack.c.l.b16 %v1290_v16 }
  0xdb   : > { %v799_v35 = vpack.c.b16 %v778_v23, %v777_v18 }
  0xdc   : > { %v1553_v33 = vadd.f32 %v1521_v38, %v1489_v30  ;;  %v354_v30 = vld [vmem:[%s2612_s12 + $0x8c] sm:$0x1] }
  0xdd   : > { %2210 = vmatmul.msk.bf16.gmra.mxu2 %vm805_vm1, %v1341_v14  ;;  %v1342_v14 = vpack.c.b16 %v1321_v2, %v1320_v61  ;;  %v1268_v40 = vrot.slane %v354_v30, 5  ;;  %v655_v44 = vshll.u32 %v354_v30, 16  ;;  %v1322_v61 = vunpack.c.l.b16 %v1266_v54 }
  0xde   : > { %1585 = vst [vmem:[#allocation2] sm:$0xff] %v1553_v33  ;;  %v1328_v33 = vunpack.c.l.b16 %v1287_v15 }
  0xdf   : > { %v872_v45 = vpop.f32.mrf.mxu0  ;;  %v657_v59 = vrot.slane %v655_v44, 5 }
  0xe0   : > { %v1093_v46 = vadd.f32 %v1092_v55, %v872_v45  ;;  %v1413_v47 = vpop.f32.mrf.mxu2  ;;  %v2882_v48 = vpop.f32.mrf.mxu3  ;;  %v1346_v52 = vpack.c.b16 %v1329_v34, %v1328_v33  ;;  %v1527_v33 = vld [vmem:[#allocation2 + $0x48] sm:$0xff] }
  0xe1   : > { %v1097_v55 = vpop.f32.mrf.mxu1 }
  0xe2   : > { %v1490_v4 = vadd.f32 %v1413_v47, %v1093_v46  ;;  %2097 = vmatmul.msk.bf16.gmra.mxu0 %vm805_vm1, %v798_v41 }
  0xe4   : > { %v1554_v60 = vadd.f32 %v1522_v49, %v1490_v4  ;;  %2178 = vmatmul.msk.bf16.gmra.mxu1 %vm805_vm1, %v2266_v51  ;;  %v1524_v49 = vld [vmem:[#allocation2 + $0x50] sm:$0xff]  ;;  %v1269_v4 = vsel %vm2619_vm6, %v1267_v39, %v1268_v40 }
  0xe5   : > { %2214 = vmatmul.msk.bf16.gmra.mxu3 %vm805_vm1, %v1345_v50  ;;  %v2267_v50 = vld [vmem:[%s2612_s12 + $0x84] sm:$0xff]  ;;  %v1323_v62 = vunpack.c.l.b16 %v1269_v4 }
  0xe6   : > { %1586 = vst [vmem:[#allocation2 + $0xd8] sm:$0xff] %v1554_v60 }
  0xe7   : > { %v874_v8 = vpop.f32.mrf.mxu0  ;;  %v1343_v12 = vpack.c.b16 %v1323_v62, %v1322_v61  ;;  %v1530_v61 = vld [vmem:[#allocation2 + $0xe8] sm:$0xff] }
  0xe8   : > { %v1095_v25 = vadd.f32 %v1094_v27, %v874_v8  ;;  %v1415_v0 = vpop.f32.mrf.mxu2  ;;  %v2901_v24 = vpop.f32.mrf.mxu3  ;;  %v647_v27 = vrot.slane %v645_v9, 5 }
  0xe9   : > { %v1099_v26 = vpop.f32.mrf.mxu1 }
  0xea   : > { %v1491_v38 = vadd.f32 %v1415_v0, %v1095_v25  ;;  %v652_v43 = vor.u32 %v651_v31, %v647_v27  ;;  %v648_v3 = vsel %vm2641_vm7, %v643_v56, %v647_v27 }
  0xeb   : > { %v779_v13 = vunpack.c.l.b16 %v648_v3 }
  0xec   : > { %v1555_v32 = vadd.f32 %v1523_v21, %v1491_v38  ;;  %v653_v57 = vrot.slane %v652_v43, 4  ;;  %v1528_v43 = vld [vmem:[#allocation2 + $0x80] sm:$0xff] }
  0xed   : > { %2211 = vmatmul.msk.bf16.gmra.mxu2 %vm805_vm1, %v1342_v14 }
  0xee   : > { %1587 = vst [vmem:[#allocation2 + $0x18] sm:$0xff] %v1555_v32  ;;  %v658_v5 = vsel %vm2641_vm7, %v653_v57, %v657_v59 }
  0xef   : > { %v877_v41 = vpop.f32.mrf.mxu0  ;;  %v780_v25 = vunpack.c.l.b16 %v658_v5 }
  0xf0   : > { %v1098_v45 = vadd.f32 %v1097_v55, %v877_v41  ;;  %v1418_v46 = vpop.f32.mrf.mxu2  ;;  %v2909_v47 = vpop.f32.mrf.mxu3  ;;  %v1293_v55 = vrot.slane %v2732_v63, 5  ;;  %v1296_v63 = vrot.slane %v2740_v22, 5 }
  0xf1   : > { %v1102_v53 = vpop.f32.mrf.mxu1  ;;  %v800_v22 = vpack.c.b16 %v780_v25, %v779_v13 }
  0xf2   : > { %v1492_v51 = vadd.f32 %v1418_v46, %v1098_v45  ;;  %2098 = vmatmul.msk.bf16.gmra.mxu0 %vm805_vm1, %v799_v35  ;;  %v1295_v19 = vrot.slane %v1293_v55, 4  ;;  %v1294_v0 = vsel %vm2619_vm6, %v2199_v1, %v1293_v55 }
  0xf3   : > { %v1330_v14 = vunpack.c.l.b16 %v1294_v0  ;;  %v1532_v0 = vld [vmem:[#allocation2 + $0x60] sm:$0xff] }
  0xf4   : > { %v1556_v60 = vadd.f32 %v1524_v49, %v1492_v51  ;;  %2179 = vmatmul.msk.bf16.gmra.mxu1 %vm805_vm1, %v2267_v50  ;;  %v1297_v36 = vsel %vm2619_vm6, %v1295_v19, %v1296_v63 }
  0xf5   : > { %2215 = vmatmul.msk.bf16.gmra.mxu3 %vm805_vm1, %v1346_v52  ;;  %v1331_v15 = vunpack.c.l.b16 %v1297_v36 }
  0xf6   : > { %1588 = vst [vmem:[#allocation2 + $0x50] sm:$0xff] %v1556_v60 }
  0xf7   : > { %v879_v2 = vpop.f32.mrf.mxu0  ;;  %v1347_v30 = vpack.c.b16 %v1331_v15, %v1330_v14 }
  0xf8   : > { %v1100_v6 = vadd.f32 %v1099_v26, %v879_v2  ;;  %v1420_v7 = vpop.f32.mrf.mxu2  ;;  %v2926_v8 = vpop.f32.mrf.mxu3  ;;  %v1526_v26 = vld [vmem:[#allocation2 + $0x30] sm:$0xff] }
  0xf9   : > { %v1104_v58 = vpop.f32.mrf.mxu1 }
  0xfa   : > { %v1493_v9 = vadd.f32 %v1420_v7, %v1100_v6  ;;  %v1531_v6 = vld [vmem:[#allocation2 + $0xb8] sm:$0xff] }
  0xfc   : > { %v1557_v21 = vadd.f32 %v1525_v10, %v1493_v9 }
  0xfd   : > { %2212 = vmatmul.msk.bf16.gmra.mxu2 %vm805_vm1, %v1343_v12 }
  0xfe   : > { %1589 = vst [vmem:[#allocation2 + $0x68] sm:$0xff] %v1557_v21 }
  0xff   : > { %v882_v16 = vpop.f32.mrf.mxu0 }
 0x100   : > { %v1103_v38 = vadd.f32 %v1102_v53, %v882_v16  ;;  %v1423_v18 = vpop.f32.mrf.mxu2  ;;  %v2933_v23 = vpop.f32.mrf.mxu3  ;;  %v1529_v53 = vld [vmem:[#allocation2 + $0x88] sm:$0xff] }
 0x101   : > { %v1107_v28 = vpop.f32.mrf.mxu1 }
 0x102   : > { %v1494_v20 = vadd.f32 %v1423_v18, %v1103_v38  ;;  %2099 = vmatmul.msk.bf16.gmra.mxu0 %vm805_vm1, %v800_v22  ;;  %v1533_v18 = vld [vmem:[#allocation2 + $0xf0] sm:$0xff] }
 0x104   : > { %v1558_v11 = vadd.f32 %v1526_v26, %v1494_v20 }
 0x105   : > { %2216 = vmatmul.msk.bf16.gmra.mxu3 %vm805_vm1, %v1347_v30 }
 0x106   : > { %1590 = vst [vmem:[#allocation2 + $0x30] sm:$0xff] %v1558_v11 }
 0x107   : > { %v884_v29 = vpop.f32.mrf.mxu0 }
 0x108   : > { %v1105_v27 = vadd.f32 %v1104_v58, %v884_v29  ;;  %v1425_v31 = vpop.f32.mrf.mxu2  ;;  %v2937_v32 = vpop.f32.mrf.mxu3 }
 0x109   : > { %v1109_v35 = vpop.f32.mrf.mxu1 }
 0x10a   : > { %v1495_v34 = vadd.f32 %v1425_v31, %v1105_v27  ;;  %v1534_v31 = vld [vmem:[#allocation2 + $0x8] sm:$0xff] }
 0x10c   : > { %v1559_v37 = vadd.f32 %v1527_v33, %v1495_v34 }
 0x10e   : > { %1591 = vst [vmem:[#allocation2 + $0x48] sm:$0xff] %v1559_v37 }
 0x10f   : > { %v887_v39 = vpop.f32.mrf.mxu0 }
 0x110   : > { %v1108_v40 = vadd.f32 %v1107_v28, %v887_v39  ;;  %v1428_v41 = vpop.f32.mrf.mxu2  ;;  %v2939_v42 = vpop.f32.mrf.mxu3 }
 0x111   : > { %v1112_v45 = vpop.f32.mrf.mxu1 }
 0x112   : > { %v1496_v44 = vadd.f32 %v1428_v41, %v1108_v40 }
 0x114   : > { %v1560_v46 = vadd.f32 %v1528_v43, %v1496_v44  ;;  %v1535_v43 = vld [vmem:[#allocation2 + $0x78] sm:$0xff] }
 0x116   : > { %1592 = vst [vmem:[#allocation2 + $0x80] sm:$0xff] %v1560_v46 }
 0x117   : > { %v889_v49 = vpop.f32.mrf.mxu0 }
 0x118   : > { %v1110_v50 = vadd.f32 %v1109_v35, %v889_v49  ;;  %v1430_v51 = vpop.f32.mrf.mxu2  ;;  %v2941_v52 = vpop.f32.mrf.mxu3 }
 0x119   : > { %v1114_v4 = vpop.f32.mrf.mxu1 }
 0x11a   : > { %v1497_v54 = vadd.f32 %v1430_v51, %v1110_v50 }
 0x11c   : > { %v1561_v56 = vadd.f32 %v1529_v53, %v1497_v54  ;;  %v1536_v54 = vld [vmem:[#allocation2 + $0x38] sm:$0xff] }
 0x11e   : > { %1593 = vst [vmem:[#allocation2 + $0x88] sm:$0xff] %v1561_v56 }
 0x11f   : > { %v892_v57 = vpop.f32.mrf.mxu0 }
 0x120   : > { %v1113_v59 = vadd.f32 %v1112_v45, %v892_v57  ;;  %v1433_v55 = vpop.f32.mrf.mxu2  ;;  %v2943_v60 = vpop.f32.mrf.mxu3 }
 0x121   : > { %v1117_v1 = vpop.f32.mrf.mxu1 }
 0x122   : > { %v1498_v62 = vadd.f32 %v1433_v55, %v1113_v59  ;;  %v1148_v55 = vadd.f32 %v2941_v52, %v2878_v17  ;;  %v1545_v17 = vld [vmem:[#allocation2 + $0xd0] sm:$0xff]  ;;  %v1538_v52 = vld [vmem:[#allocation2 + $0x40] sm:$0xff] }
 0x124   : > { %v1562_v2 = vadd.f32 %v1530_v61, %v1498_v62 }
 0x126   : > { %1594 = vst [vmem:[#allocation2 + $0xe8] sm:$0xff] %v1562_v2  ;;  %v1544_v2 = vld [vmem:[#allocation2 + $0xa8] sm:$0xff] }
 0x127   : > { %v894_v3 = vpop.f32.mrf.mxu0 }
 0x128   : > { %v1115_v5 = vadd.f32 %v1114_v4, %v894_v3  ;;  %v1435_v19 = vpop.f32.mrf.mxu2  ;;  %v2945_v63 = vpop.f32.mrf.mxu3  ;;  %v1537_v3 = vld [vmem:[#allocation2 + $0x58] sm:$0xff] }
 0x129   : > { %v1119_v10 = vpop.f32.mrf.mxu1 }
 0x12a   : > { %v1499_v7 = vadd.f32 %v1435_v19, %v1115_v5 }
 0x12c   : > { %v1563_v12 = vadd.f32 %v1531_v6, %v1499_v7 }
 0x12e   : > { %1595 = vst [vmem:[#allocation2 + $0xb8] sm:$0xff] %v1563_v12 }
 0x12f   : > { %v897_v9 = vpop.f32.mrf.mxu0 }
 0x130   : > { %v1118_v13 = vadd.f32 %v1117_v1, %v897_v9  ;;  %v1438_v25 = vpop.f32.mrf.mxu2  ;;  %v2947_v58 = vpop.f32.mrf.mxu3  ;;  %v1150_v9 = vadd.f32 %v2943_v60, %v2882_v48  ;;  %v1539_v48 = vld [vmem:[#allocation2 + $0xc8] sm:$0xff] }
 0x131   : > { %v1122_v21 = vpop.f32.mrf.mxu1 }
 0x132   : > { %v1500_v36 = vadd.f32 %v1438_v25, %v1118_v13 }
 0x134   : > { %v1564_v22 = vadd.f32 %v1532_v0, %v1500_v36 }
 0x136   : > { %1596 = vst [vmem:[#allocation2 + $0x60] sm:$0xff] %v1564_v22 }
 0x137   : > { %v899_v14 = vpop.f32.mrf.mxu0 }
 0x138   : > { %v1120_v15 = vadd.f32 %v1119_v10, %v899_v14  ;;  %v1440_v16 = vpop.f32.mrf.mxu2  ;;  %v2949_v38 = vpop.f32.mrf.mxu3 }
 0x139   : > { %v1124_v20 = vpop.f32.mrf.mxu1 }
 0x13a   : > { %v1501_v26 = vadd.f32 %v1440_v16, %v1120_v15  ;;  %v1153_v16 = vadd.f32 %v2945_v63, %v2901_v24  ;;  %v1547_v24 = vld [vmem:[#allocation2 + $0x28] sm:$0xff]  ;;  %v1540_v63 = vld [vmem:[#allocation2 + $0xe0] sm:$0xff] }
 0x13c   : > { %v1565_v30 = vadd.f32 %v1533_v18, %v1501_v26 }
 0x13e   : > { %1597 = vst [vmem:[#allocation2 + $0xf0] sm:$0xff] %v1565_v30  ;;  %v1546_v30 = vld [vmem:[#allocation2 + $0x10] sm:$0xff] }
 0x13f   : > { %v902_v28 = vpop.f32.mrf.mxu0 }
 0x140   : > { %v1123_v11 = vadd.f32 %v1122_v21, %v902_v28  ;;  %v1443_v29 = vpop.f32.mrf.mxu2  ;;  %v2951_v27 = vpop.f32.mrf.mxu3 }
 0x141   : > { %v1127_v34 = vpop.f32.mrf.mxu1 }
 0x142   : > { %v1502_v33 = vadd.f32 %v1443_v29, %v1123_v11 }
 0x144   : > { %v1566_v35 = vadd.f32 %v1534_v31, %v1502_v33 }
 0x146   : > { %1598 = vst [vmem:[#allocation2 + $0x8] sm:$0xff] %v1566_v35 }
 0x147   : > { %v904_v37 = vpop.f32.mrf.mxu0 }
 0x148   : > { %v1125_v39 = vadd.f32 %v1124_v20, %v904_v37  ;;  %v1445_v40 = vpop.f32.mrf.mxu2  ;;  %v2953_v41 = vpop.f32.mrf.mxu3 }
 0x149   : > { %v1129_v45 = vpop.f32.mrf.mxu1 }
 0x14a   : > { %v1503_v44 = vadd.f32 %v1445_v40, %v1125_v39 }
 0x14c   : > { %v1567_v46 = vadd.f32 %v1535_v43, %v1503_v44 }
 0x14e   : > { %1599 = vst [vmem:[#allocation2 + $0x78] sm:$0xff] %v1567_v46 }
 0x14f   : > { %v907_v49 = vpop.f32.mrf.mxu0 }
 0x150   : > { %v1128_v50 = vadd.f32 %v1127_v34, %v907_v49  ;;  %v1448_v51 = vpop.f32.mrf.mxu2  ;;  %v2955_v53 = vpop.f32.mrf.mxu3  ;;  %v1155_v34 = vadd.f32 %v2947_v58, %v2909_v47  ;;  %v1548_v47 = vld [vmem:[#allocation2 + $0xa0] sm:$0xff]  ;;  %v1541_v58 = vld [vmem:[#allocation2 + $0x90] sm:$0xff] }
 0x151   : > { %v1132_v57 = vpop.f32.mrf.mxu1 }
 0x152   : > { %v1504_v4 = vadd.f32 %v1448_v51, %v1128_v50  ;;  %v1158_v50 = vadd.f32 %v2949_v38, %v2926_v8  ;;  %v1549_v8 = vld [vmem:[#allocation2 + $0xf8] sm:$0xff]  ;;  %v1542_v38 = vld [vmem:[#allocation2 + $0x70] sm:$0xff] }
 0x154   : > { %v1568_v56 = vadd.f32 %v1536_v54, %v1504_v4 }
 0x156   : > { %1600 = vst [vmem:[#allocation2 + $0x38] sm:$0xff] %v1568_v56 }
 0x157   : > { %v909_v59 = vpop.f32.mrf.mxu0 }
 0x158   : > { %v1130_v61 = vadd.f32 %v1129_v45, %v909_v59  ;;  %v1450_v62 = vpop.f32.mrf.mxu2  ;;  %v1468_v1 = vpop.f32.mrf.mxu3 }
 0x159   : > { %v1512_v5 = vadd.f32 %v1468_v1, %v1148_v55  ;;  %v1134_v12 = vpop.f32.mrf.mxu1  ;;  %v1160_v1 = vadd.f32 %v2951_v27, %v2933_v23  ;;  %v1550_v23 = vld [vmem:[#allocation2 + $0x20] sm:$0xff] }
 0x15a   : > { %v1505_v19 = vadd.f32 %v1450_v62, %v1130_v61  ;;  %v1543_v27 = vld [vmem:[#allocation2 + $0xc0] sm:$0xff] }
 0x15b   : > { %v1576_v6 = vadd.f32 %v1544_v2, %v1512_v5 }
 0x15c   : > { %v1569_v7 = vadd.f32 %v1537_v3, %v1505_v19 }
 0x15d   : > { %1608 = vst [vmem:[#allocation2 + $0xa8] sm:$0xff] %v1576_v6 }
 0x15e   : > { %1601 = vst [vmem:[#allocation2 + $0x58] sm:$0xff] %v1569_v7 }
 0x15f   : > { %v912_v10 = vpop.f32.mrf.mxu0 }
 0x160   : > { %v1133_v13 = vadd.f32 %v1132_v57, %v912_v10  ;;  %v1453_v25 = vpop.f32.mrf.mxu2  ;;  %v1470_v0 = vpop.f32.mrf.mxu3 }
 0x161   : > { %v1513_v36 = vadd.f32 %v1470_v0, %v1150_v9  ;;  %v1137_v60 = vpop.f32.mrf.mxu1 }
 0x162   : > { %v1506_v21 = vadd.f32 %v1453_v25, %v1133_v13  ;;  %v1163_v13 = vadd.f32 %v2953_v41, %v2937_v32 }
 0x163   : > { %v1577_v22 = vadd.f32 %v1545_v17, %v1513_v36 }
 0x164   : > { %v1570_v14 = vadd.f32 %v1538_v52, %v1506_v21 }
 0x165   : > { %1609 = vst [vmem:[#allocation2 + $0xd0] sm:$0xff] %v1577_v22 }
 0x166   : > { %1602 = vst [vmem:[#allocation2 + $0x40] sm:$0xff] %v1570_v14  ;;  %v1165_v14 = vadd.f32 %v2955_v53, %v2939_v42 }
 0x167   : > { %v914_v15 = vpop.f32.mrf.mxu0 }
 0x168   : > { %v1135_v18 = vadd.f32 %v1134_v12, %v914_v15  ;;  %v1455_v26 = vpop.f32.mrf.mxu2  ;;  %v1473_v20 = vpop.f32.mrf.mxu3 }
 0x169   : > { %v1514_v28 = vadd.f32 %v1473_v20, %v1153_v16  ;;  %v1139_v44 = vpop.f32.mrf.mxu1  ;;  %v1551_v16 = vld [vmem:[#allocation2 + $0x98] sm:$0xff] }
 0x16a   : > { %v1507_v11 = vadd.f32 %v1455_v26, %v1135_v18 }
 0x16b   : > { %v1578_v29 = vadd.f32 %v1546_v30, %v1514_v28 }
 0x16c   : > { %v1571_v31 = vadd.f32 %v1539_v48, %v1507_v11 }
 0x16d   : > { %1610 = vst [vmem:[#allocation2 + $0x10] sm:$0xff] %v1578_v29 }
 0x16e   : > { %1603 = vst [vmem:[#allocation2 + $0xc8] sm:$0xff] %v1571_v31 }
 0x16f   : > { %v917_v33 = vpop.f32.mrf.mxu0 }
 0x170   : > { %v1138_v35 = vadd.f32 %v1137_v60, %v917_v33  ;;  %v1458_v37 = vpop.f32.mrf.mxu2  ;;  %v1475_v39 = vpop.f32.mrf.mxu3 }
 0x171   : > { %v1515_v40 = vadd.f32 %v1475_v39, %v1155_v34  ;;  %v1142_v61 = vpop.f32.mrf.mxu1 }
 0x172   : > { %v1508_v43 = vadd.f32 %v1458_v37, %v1138_v35 }
 0x173   : > { %v1579_v45 = vadd.f32 %v1547_v24, %v1515_v40 }
 0x174   : > { %v1572_v46 = vadd.f32 %v1540_v63, %v1508_v43 }
 0x175   : > { %1611 = vst [vmem:[#allocation2 + $0x28] sm:$0xff] %v1579_v45 }
 0x176   : > { %1604 = vst [vmem:[#allocation2 + $0xe0] sm:$0xff] %v1572_v46 }
 0x177   : > { %v919_v49 = vpop.f32.mrf.mxu0 }
 0x178   : > { %v1140_v51 = vadd.f32 %v1139_v44, %v919_v49  ;;  %v1460_v54 = vpop.f32.mrf.mxu2  ;;  %v1478_v4 = vpop.f32.mrf.mxu3 }
 0x179   : > { %v1516_v56 = vadd.f32 %v1478_v4, %v1158_v50  ;;  %v1144_v12 = vpop.f32.mrf.mxu1 }
 0x17a   : > { %v1509_v57 = vadd.f32 %v1460_v54, %v1140_v51 }
 0x17b   : > { %v1580_v59 = vadd.f32 %v1548_v47, %v1516_v56 }
 0x17c   : > { %v1573_v55 = vadd.f32 %v1541_v58, %v1509_v57 }
 0x17d   : > { %1612 = vst [vmem:[#allocation2 + $0xa0] sm:$0xff] %v1580_v59 }
 0x17e   : > { %1605 = vst [vmem:[#allocation2 + $0x90] sm:$0xff] %v1573_v55 }
 0x17f   : > { %v922_v62 = vpop.f32.mrf.mxu0 }
 0x180   : > { %v1143_v2 = vadd.f32 %v1142_v61, %v922_v62  ;;  %v1463_v3 = vpop.f32.mrf.mxu2  ;;  %v1480_v5 = vpop.f32.mrf.mxu3 }
 0x181   : > { %v1517_v19 = vadd.f32 %v1480_v5, %v1160_v1 }
 0x182   : > { %v1510_v6 = vadd.f32 %v1463_v3, %v1143_v2 }
 0x183   : > { %v1581_v7 = vadd.f32 %v1549_v8, %v1517_v19 }
 0x184   : > { %v1574_v10 = vadd.f32 %v1542_v38, %v1510_v6 }
 0x185   : > { %1613 = vst [vmem:[#allocation2 + $0xf8] sm:$0xff] %v1581_v7 }
 0x186   : > { %1606 = vst [vmem:[#allocation2 + $0x70] sm:$0xff] %v1574_v10 }
 0x187   : > { %v924_v9 = vpop.f32.mrf.mxu0 }
 0x188   : > { %v1145_v25 = vadd.f32 %v1144_v12, %v924_v9  ;;  %v1465_v0 = vpop.f32.mrf.mxu2  ;;  %v1483_v17 = vpop.f32.mrf.mxu3 }
 0x189   : > { %v1518_v52 = vadd.f32 %v1483_v17, %v1163_v13 }
 0x18a   : > { %v1511_v36 = vadd.f32 %v1465_v0, %v1145_v25 }
 0x18b   : > { %v1582_v21 = vadd.f32 %v1550_v23, %v1518_v52 }
 0x18c   : > { %v1575_v22 = vadd.f32 %v1543_v27, %v1511_v36 }
 0x18d   : > { %1614 = vst [vmem:[#allocation2 + $0x20] sm:$0xff] %v1582_v21 }
 0x18e   : > { %1607 = vst [vmem:[#allocation2 + $0xc0] sm:$0xff] %v1575_v22 }
 0x190   : > { %v1485_v15 = vpop.f32.mrf.mxu3 }
 0x191   : > { %v1519_v18 = vadd.f32 %v1485_v15, %v1165_v14  ;;  %1619 = sbr.rel (%p2217_p1) target bundleno = 631 (0x277), region = 48 }
 0x193   : > { %v1583_v26 = vadd.f32 %v1551_v16, %v1519_v18 }
 0x195   : > { %1615 = vst [vmem:[#allocation2 + $0x98] sm:$0xff] %v1583_v26 }
 0x196   : > { %v2279_v32 = vld [vmem:[%s3152_s3 + $0x38] sm:$0xff]  ;;  %v2278_v41 = vld [vmem:[%s3152_s3 + $0x30] sm:$0xff]  ;;  %v2277_v42 = vld [vmem:[%s3152_s3 + $0x28] sm:$0xff] }
 0x197   : > { %1836 = vmatpush.bf16.msra.mxu0 %v2279_v32  ;;  %2284 = vmatpush.bf16.msra.mxu1 %v2279_v32  ;;  %v2276_v53 = vld [vmem:[%s3152_s3 + $0x20] sm:$0xff]  ;;  %v2275_v30 = vld [vmem:[%s3152_s3 + $0x18] sm:$0xff]  ;;  %v1620_v48 = vld [vmem:[#allocation2 + $0xb0] sm:$0xff] }
 0x198   : > { %2285 = vmatpush.bf16.msra.mxu2 %v2279_v32  ;;  %2286 = vmatpush.bf16.msra.mxu3 %v2279_v32  ;;  %v2989_v20 = vld [vmem:[%s3151_s2] ss:$0 sm:$0xff]  ;;  %v1629_v11 = vld [vmem:[#allocation2 + $0x88] sm:$0xff]  ;;  %v1636_v29 = vld [vmem:[#allocation2 + $0x38] sm:$0xff] }
 0x199   : > { %v1621_v60 = vld [vmem:[#allocation2] sm:$0xff]  ;;  %v1637_v31 = vld [vmem:[#allocation2 + $0x58] sm:$0xff]  ;;  %v1644_v33 = vld [vmem:[#allocation2 + $0xa8] sm:$0xff]  ;;  %v1656_v35 = vadd.f32 %v2989_v20, %v1620_v48  ;;  %v1665_v24 = vadd.f32 %v2989_v20, %v1629_v11  ;;  %v1672_v63 = vadd.f32 %v2989_v20, %v1636_v29 }
 0x19a   : > { %v1628_v28 = vld [vmem:[#allocation2 + $0x80] sm:$0xff]  ;;  %v1645_v34 = vld [vmem:[#allocation2 + $0xd0] sm:$0xff]  ;;  %v1657_v37 = vadd.f32 %v2989_v20, %v1621_v60  ;;  %v1673_v43 = vadd.f32 %v2989_v20, %v1637_v31  ;;  %v1680_v44 = vadd.f32 %v2989_v20, %v1644_v33  ;;  %v2273_v46 = vld [vmem:[%s3152_s3 + $0x8] sm:$0xff] }
 0x19b   : > { %1837 = vmatpush.bf16.msra.mxu0 %v2278_v41  ;;  %2287 = vmatpush.bf16.msra.mxu1 %v2278_v41  ;;  %v1664_v39 = vadd.f32 %v2989_v20, %v1628_v28  ;;  %v2274_v40 = vld [vmem:[%s3152_s3 + $0x10] sm:$0xff]  ;;  %v1681_v45 = vadd.f32 %v2989_v20, %v1645_v34  ;;  %v1688_v49 = vmul.f32 0.1, %v1656_v35  ;;  %v1697_v54 = vmul.f32 0.1, %v1665_v24  ;;  %v2272_v1 = vld [vmem:[%s3152_s3] sm:$0xff] }
 0x19c   : > { %2288 = vmatpush.bf16.msra.mxu2 %v2278_v41  ;;  %2289 = vmatpush.bf16.msra.mxu3 %v2278_v41  ;;  %v1689_v50 = vmul.f32 0.1, %v1657_v37  ;;  %v1704_v4 = vmul.f32 0.1, %v1672_v63  ;;  %v1705_v47 = vmul.f32 0.1, %v1673_v43 }
 0x19d   : > { %v1696_v51 = vmul.f32 0.1, %v1664_v39  ;;  %v1712_v58 = vmul.f32 0.1, %v1680_v44  ;;  %v1713_v56 = vmul.f32 0.1, %v1681_v45  ;;  %v1720_v57 = vmax.f32 %v1656_v35, %v1688_v49 }
 0x19e   : > { %v1721_v59 = vmax.f32 %v1657_v37, %v1689_v50  ;;  %v1729_v61 = vmax.f32 %v1665_v24, %v1697_v54  ;;  %v1736_v62 = vmax.f32 %v1672_v63, %v1704_v4  ;;  %v1737_v2 = vmax.f32 %v1673_v43, %v1705_v47  ;;  %v1622_v19 = vld [vmem:[#allocation2 + $0xd8] sm:$0xff]  ;;  %v1630_v12 = vld [vmem:[#allocation2 + $0xe8] sm:$0xff]  ;;  %v1638_v13 = vld [vmem:[#allocation2 + $0x40] sm:$0xff] }
 0x19f   : > { %1838 = vmatpush.bf16.msra.mxu0 %v2277_v42  ;;  %2290 = vmatpush.bf16.msra.mxu1 %v2277_v42  ;;  %v1728_v55 = vmax.f32 %v1664_v39, %v1696_v51  ;;  %v1744_v3 = vmax.f32 %v1680_v44, %v1712_v58  ;;  %v1745_v5 = vmax.f32 %v1681_v45, %v1713_v56  ;;  %v1623_v6 = vld [vmem:[#allocation2 + $0x18] sm:$0xff]  ;;  %v1639_v25 = vld [vmem:[#allocation2 + $0xc8] sm:$0xff]  ;;  %v1646_v0 = vld [vmem:[#allocation2 + $0x10] sm:$0xff] }
 0x1a0   : > { %2291 = vmatpush.bf16.msra.mxu2 %v2277_v42  ;;  %2292 = vmatpush.bf16.msra.mxu3 %v2277_v42  ;;  %v1752_v8 = vpack.c.bf16 %v1721_v59, %v1720_v57  ;;  %v1760_v7 = vpack.c.bf16 %v1737_v2, %v1736_v62  ;;  %v1631_v9 = vld [vmem:[#allocation2 + $0xb8] sm:$0xff]  ;;  %v1647_v17 = vld [vmem:[#allocation2 + $0x28] sm:$0xff]  ;;  %v1658_v23 = vadd.f32 %v2989_v20, %v1622_v19  ;;  %v1624_v39 = vld [vmem:[#allocation2 + $0x50] sm:$0xff] }
 0x1a1   : > { %v1756_v38 = vpack.c.bf16 %v1729_v61, %v1728_v55  ;;  %v1764_v10 = vpack.c.bf16 %v1745_v5, %v1744_v3  ;;  %v1659_v27 = vadd.f32 %v2989_v20, %v1623_v6  ;;  %v1666_v52 = vadd.f32 %v2989_v20, %v1630_v12  ;;  %v1625_v24 = vld [vmem:[#allocation2 + $0x68] sm:$0xff]  ;;  %v1632_v43 = vld [vmem:[#allocation2 + $0x60] sm:$0xff]  ;;  %v1633_v44 = vld [vmem:[#allocation2 + $0xf0] sm:$0xff] }
 0x1a2   : > { %v1667_v36 = vadd.f32 %v2989_v20, %v1631_v9  ;;  %v1674_v21 = vadd.f32 %v2989_v20, %v1638_v13  ;;  %v1675_v22 = vadd.f32 %v2989_v20, %v1639_v25  ;;  %v1682_v14 = vadd.f32 %v2989_v20, %v1646_v0  ;;  %v1640_v45 = vld [vmem:[#allocation2 + $0xe0] sm:$0xff]  ;;  %v1649_v50 = vld [vmem:[#allocation2 + $0xf8] sm:$0xff] }
 0x1a3   : > { %1839 = vmatpush.bf16.msra.mxu0 %v2276_v53  ;;  %2293 = vmatpush.bf16.msra.mxu1 %v2276_v53  ;;  %v1683_v15 = vadd.f32 %v2989_v20, %v1647_v17  ;;  %v1690_v16 = vmul.f32 0.1, %v1658_v23  ;;  %v1691_v18 = vmul.f32 0.1, %v1659_v27  ;;  %v1698_v26 = vmul.f32 0.1, %v1666_v52 }
 0x1a4   : > { %2294 = vmatpush.bf16.msra.mxu2 %v2276_v53  ;;  %2295 = vmatpush.bf16.msra.mxu3 %v2276_v53  ;;  %v1699_v32 = vmul.f32 0.1, %v1667_v36  ;;  %v1706_v41 = vmul.f32 0.1, %v1674_v21  ;;  %v1707_v42 = vmul.f32 0.1, %v1675_v22  ;;  %v1660_v51 = vadd.f32 %v2989_v20, %v1624_v39 }
 0x1a5   : > { %v1714_v53 = vmul.f32 0.1, %v1682_v14  ;;  %v1722_v48 = vmax.f32 %v1658_v23, %v1690_v16  ;;  %v1723_v60 = vmax.f32 %v1659_v27, %v1691_v18  ;;  %v1730_v28 = vmax.f32 %v1666_v52, %v1698_v26  ;;  %v1648_v49 = vld [vmem:[#allocation2 + $0xa0] sm:$0xff]  ;;  %v1626_v17 = vld [vmem:[#allocation2 + $0x30] sm:$0xff]  ;;  %v1627_v23 = vld [vmem:[#allocation2 + $0x48] sm:$0xff] }
 0x1a6   : > { %v1731_v11 = vmax.f32 %v1667_v36, %v1699_v32  ;;  %v1738_v29 = vmax.f32 %v1674_v21, %v1706_v41  ;;  %v1739_v31 = vmax.f32 %v1675_v22, %v1707_v42  ;;  %v1661_v54 = vadd.f32 %v2989_v20, %v1625_v24  ;;  %v1634_v36 = vld [vmem:[#allocation2 + $0x8] sm:$0xff]  ;;  %v1635_v21 = vld [vmem:[#allocation2 + $0x78] sm:$0xff]  ;;  %v1642_v22 = vld [vmem:[#allocation2 + $0x70] sm:$0xff] }
 0x1a7   : > { %1840 = vmatpush.bf16.msra.mxu0 %v2275_v30  ;;  %2296 = vmatpush.bf16.msra.mxu1 %v2275_v30  ;;  %v1746_v33 = vmax.f32 %v1682_v14, %v1714_v53  ;;  %v1753_v35 = vpack.c.bf16 %v1723_v60, %v1722_v48  ;;  %v1668_v4 = vadd.f32 %v2989_v20, %v1632_v43  ;;  %v1692_v55 = vmul.f32 0.1, %v1660_v51  ;;  %v1643_v14 = vld [vmem:[#allocation2 + $0xc0] sm:$0xff]  ;;  %v1651_v16 = vld [vmem:[#allocation2 + $0x98] sm:$0xff] }
 0x1a8   : > { %2297 = vmatpush.bf16.msra.mxu2 %v2275_v30  ;;  %2298 = vmatpush.bf16.msra.mxu3 %v2275_v30  ;;  %v1715_v30 = vmul.f32 0.1, %v1683_v15  ;;  %v1757_v37 = vpack.c.bf16 %v1731_v11, %v1730_v28  ;;  %v1761_v63 = vpack.c.bf16 %v1739_v31, %v1738_v29  ;;  %v1669_v47 = vadd.f32 %v2989_v20, %v1633_v44 }
 0x1a9   : > { %v1676_v58 = vadd.f32 %v2989_v20, %v1640_v45  ;;  %v1684_v57 = vadd.f32 %v2989_v20, %v1648_v49  ;;  %v1685_v59 = vadd.f32 %v2989_v20, %v1649_v50  ;;  %v1693_v61 = vmul.f32 0.1, %v1661_v54 }
 0x1aa   : > { %v1747_v34 = vmax.f32 %v1683_v15, %v1715_v30  ;;  %v1700_v62 = vmul.f32 0.1, %v1668_v4  ;;  %v1650_v15 = vld [vmem:[#allocation2 + $0x20] sm:$0xff]  ;;  %v1662_v18 = vadd.f32 %v2989_v20, %v1626_v17  ;;  %v1663_v26 = vadd.f32 %v2989_v20, %v1627_v23 }
 0x1ab   : > { %1841 = vmatpush.bf16.msra.mxu0 %v2274_v40  ;;  %2299 = vmatpush.bf16.msra.mxu1 %v2274_v40  ;;  %v1708_v2 = vmul.f32 0.1, %v1676_v58  ;;  %v1716_v5 = vmul.f32 0.1, %v1684_v57  ;;  %v1725_v19 = vmax.f32 %v1661_v54, %v1693_v61  ;;  %v1670_v32 = vadd.f32 %v2989_v20, %v1634_v36 }
 0x1ac   : > { %2300 = vmatpush.bf16.msra.mxu2 %v2274_v40  ;;  %2301 = vmatpush.bf16.msra.mxu3 %v2274_v40  ;;  %v1765_v40 = vpack.c.bf16 %v1747_v34, %v1746_v33  ;;  %v1732_v6 = vmax.f32 %v1668_v4, %v1700_v62  ;;  %v1671_v41 = vadd.f32 %v2989_v20, %v1635_v21  ;;  %v1694_v60 = vmul.f32 0.1, %v1662_v18 }
 0x1ad   : > { %v1748_v9 = vmax.f32 %v1684_v57, %v1716_v5  ;;  %v1678_v42 = vadd.f32 %v2989_v20, %v1642_v22  ;;  %v1679_v53 = vadd.f32 %v2989_v20, %v1643_v14  ;;  %v1686_v30 = vadd.f32 %v2989_v20, %v1650_v15 }
 0x1ae   : > { %v1687_v48 = vadd.f32 %v2989_v20, %v1651_v16  ;;  %v1695_v28 = vmul.f32 0.1, %v1663_v26  ;;  %v1702_v11 = vmul.f32 0.1, %v1670_v32  ;;  %v1703_v29 = vmul.f32 0.1, %v1671_v41 }
 0x1af   : > { %1842 = vmatpush.bf16.msra.mxu0 %v2273_v46  ;;  %2302 = vmatpush.bf16.msra.mxu1 %v2273_v46  ;;  %v1710_v31 = vmul.f32 0.1, %v1678_v42  ;;  %v1711_v33 = vmul.f32 0.1, %v1679_v53  ;;  %v1718_v34 = vmul.f32 0.1, %v1686_v30 }
 0x1b0   : > { %2303 = vmatpush.bf16.msra.mxu2 %v2273_v46  ;;  %2304 = vmatpush.bf16.msra.mxu3 %v2273_v46  ;;  %v1641_v46 = vld [vmem:[#allocation2 + $0x90] sm:$0xff]  ;;  %v1727_v39 = vmax.f32 %v1663_v26, %v1695_v28  ;;  %v1734_v24 = vmax.f32 %v1670_v32, %v1702_v11 }
 0x1b1   : > { %v1677_v56 = vadd.f32 %v2989_v20, %v1641_v46  ;;  %v1743_v43 = vmax.f32 %v1679_v53, %v1711_v33  ;;  %v1750_v44 = vmax.f32 %v1686_v30, %v1718_v34 }
 0x1b3   : > { %1843 = vmatpush.bf16.msra.mxu0 %v2272_v1  ;;  %2305 = vmatpush.bf16.msra.mxu1 %v2272_v1  ;;  %v1709_v3 = vmul.f32 0.1, %v1677_v56 }
 0x1b4   : > { %2306 = vmatpush.bf16.msra.mxu2 %v2272_v1  ;;  %2307 = vmatpush.bf16.msra.mxu3 %v2272_v1  ;;  %v1701_v1 = vmul.f32 0.1, %v1669_v47 }
 0x1b5   : > { %v1741_v12 = vmax.f32 %v1677_v56, %v1709_v3 }
 0x1b6   : > { %1844 = vmatmul.bf16.vlgmr.msra.gmra.mxu0 %v1752_v8  ;;  %1864 = vmatmul.bf16.vlgmr.msra.gmra.mxu1 %v1756_v38  ;;  %v1717_v8 = vmul.f32 0.1, %v1685_v59  ;;  %v1724_v38 = vmax.f32 %v1660_v51, %v1692_v55  ;;  %v3038_v51 = vld [vmem:[%s3153_s4] ss:$0 sm:$0xff] }
 0x1b7   : > { %1884 = vmatmul.bf16.vlgmr.msra.gmra.mxu2 %v1760_v7  ;;  %1904 = vmatmul.bf16.vlgmr.msra.gmra.mxu3 %v1764_v10  ;;  %v1733_v7 = vmax.f32 %v1669_v47, %v1701_v1  ;;  %v1740_v10 = vmax.f32 %v1676_v58, %v1708_v2 }
 0x1b8   : > { %v1749_v13 = vmax.f32 %v1685_v59, %v1717_v8  ;;  %v1754_v25 = vpack.c.bf16 %v1725_v19, %v1724_v38 }
 0x1b9   : > { %v1758_v0 = vpack.c.bf16 %v1733_v7, %v1732_v6  ;;  %v1762_v27 = vpack.c.bf16 %v1741_v12, %v1740_v10 }
 0x1ba   : > { %v1766_v52 = vpack.c.bf16 %v1749_v13, %v1748_v9 }
 0x1c6   : > { %1849 = vmatmul.bf16.gmra.mxu0 %v1753_v35  ;;  %1869 = vmatmul.bf16.gmra.mxu1 %v1757_v37  ;;  %v1719_v35 = vmul.f32 0.1, %v1687_v48  ;;  %v1726_v37 = vmax.f32 %v1662_v18, %v1694_v60 }
 0x1c7   : > { %1889 = vmatmul.bf16.gmra.mxu2 %v1761_v63  ;;  %1909 = vmatmul.bf16.gmra.mxu3 %v1765_v40  ;;  %v1735_v63 = vmax.f32 %v1671_v41, %v1703_v29  ;;  %v1742_v40 = vmax.f32 %v1678_v42, %v1710_v31 }
 0x1c8   : > { %v1751_v45 = vmax.f32 %v1687_v48, %v1719_v35  ;;  %v1755_v46 = vpack.c.bf16 %v1727_v39, %v1726_v37 }
 0x1c9   : > { %v1759_v20 = vpack.c.bf16 %v1735_v63, %v1734_v24  ;;  %v1763_v49 = vpack.c.bf16 %v1743_v43, %v1742_v40 }
 0x1ca   : > { %v1767_v50 = vpack.c.bf16 %v1751_v45, %v1750_v44 }
 0x1d6   : > { %1854 = vmatmul.bf16.gmra.mxu0 %v1754_v25  ;;  %1874 = vmatmul.bf16.gmra.mxu1 %v1758_v0 }
 0x1d7   : > { %1894 = vmatmul.bf16.gmra.mxu2 %v1762_v27  ;;  %1914 = vmatmul.bf16.gmra.mxu3 %v1766_v52 }
 0x1e6   : > { %1859 = vmatmul.bf16.gmra.mxu0 %v1755_v46  ;;  %1879 = vmatmul.bf16.gmra.mxu1 %v1759_v20 }
 0x1e7   : > { %1899 = vmatmul.bf16.gmra.mxu2 %v1763_v49  ;;  %1919 = vmatmul.bf16.gmra.mxu3 %v1767_v50 }
 0x233   : > { %v1845_v54 = vpop.f32.mrf.mxu0  ;;  %v1865_v4 = vpop.f32.mrf.mxu1 }
 0x234   : > { %v1846_v47 = vadd.f32 %v3038_v51, %v1845_v54  ;;  %v1866_v58 = vadd.f32 %v3038_v51, %v1865_v4 }
 0x236   : > { %1925 = vst [vmem:[%s2601_s29] sm:$0xff] %v1846_v47 }
 0x237   : > { %1933 = vst [vmem:[%s2601_s29 + $0x40] sm:$0xff] %v1866_v58 }
 0x23a   : > { %v1885_v56 = vpop.f32.mrf.mxu2  ;;  %v1905_v57 = vpop.f32.mrf.mxu3 }
 0x23b   : > { %v1886_v59 = vadd.f32 %v3038_v51, %v1885_v56  ;;  %v1906_v55 = vadd.f32 %v3038_v51, %v1905_v57  ;;  %v1847_v61 = vpop.f32.mrf.mxu0  ;;  %v1867_v62 = vpop.f32.mrf.mxu1 }
 0x23c   : > { %v1848_v1 = vadd.f32 %v3038_v51, %v1847_v61  ;;  %v1868_v2 = vadd.f32 %v3038_v51, %v1867_v62 }
 0x23d   : > { %1941 = vst [vmem:[%s2601_s29 + $0x80] sm:$0xff] %v1886_v59 }
 0x23e   : > { %1949 = vst [vmem:[%s2601_s29 + $0xc0] sm:$0xff] %v1906_v55 }
 0x23f   : > { %1926 = vst [vmem:[%s2601_s29 + $0x8] sm:$0xff] %v1848_v1 }
 0x240   : > { %1934 = vst [vmem:[%s2601_s29 + $0x48] sm:$0xff] %v1868_v2 }
 0x242   : > { %v1887_v3 = vpop.f32.mrf.mxu2  ;;  %v1907_v5 = vpop.f32.mrf.mxu3 }
 0x243   : > { %v1888_v8 = vadd.f32 %v3038_v51, %v1887_v3  ;;  %v1908_v38 = vadd.f32 %v3038_v51, %v1907_v5  ;;  %v1850_v19 = vpop.f32.mrf.mxu0  ;;  %v1870_v6 = vpop.f32.mrf.mxu1 }
 0x244   : > { %v1851_v7 = vadd.f32 %v3038_v51, %v1850_v19  ;;  %v1871_v10 = vadd.f32 %v3038_v51, %v1870_v6 }
 0x245   : > { %1942 = vst [vmem:[%s2601_s29 + $0x88] sm:$0xff] %v1888_v8 }
 0x246   : > { %1950 = vst [vmem:[%s2601_s29 + $0xc8] sm:$0xff] %v1908_v38 }
 0x247   : > { %1927 = vst [vmem:[%s2601_s29 + $0x10] sm:$0xff] %v1851_v7 }
 0x248   : > { %1935 = vst [vmem:[%s2601_s29 + $0x50] sm:$0xff] %v1871_v10 }
 0x24a   : > { %v1890_v12 = vpop.f32.mrf.mxu2  ;;  %v1910_v9 = vpop.f32.mrf.mxu3 }
 0x24b   : > { %v1891_v13 = vadd.f32 %v3038_v51, %v1890_v12  ;;  %v1911_v25 = vadd.f32 %v3038_v51, %v1910_v9  ;;  %v1852_v0 = vpop.f32.mrf.mxu0  ;;  %v1872_v17 = vpop.f32.mrf.mxu1 }
 0x24c   : > { %v1853_v23 = vadd.f32 %v3038_v51, %v1852_v0  ;;  %v1873_v27 = vadd.f32 %v3038_v51, %v1872_v17 }
 0x24d   : > { %1943 = vst [vmem:[%s2601_s29 + $0x90] sm:$0xff] %v1891_v13 }
 0x24e   : > { %1951 = vst [vmem:[%s2601_s29 + $0xd0] sm:$0xff] %v1911_v25 }
 0x24f   : > { %1928 = vst [vmem:[%s2601_s29 + $0x18] sm:$0xff] %v1853_v23 }
 0x250   : > { %1936 = vst [vmem:[%s2601_s29 + $0x58] sm:$0xff] %v1873_v27 }
 0x252   : > { %v1892_v52 = vpop.f32.mrf.mxu2  ;;  %v1912_v36 = vpop.f32.mrf.mxu3 }
 0x253   : > { %v1893_v21 = vadd.f32 %v3038_v51, %v1892_v52  ;;  %v1913_v22 = vadd.f32 %v3038_v51, %v1912_v36  ;;  %v1855_v14 = vpop.f32.mrf.mxu0  ;;  %v1875_v15 = vpop.f32.mrf.mxu1 }
 0x254   : > { %v1856_v16 = vadd.f32 %v3038_v51, %v1855_v14  ;;  %v1876_v18 = vadd.f32 %v3038_v51, %v1875_v15 }
 0x255   : > { %1944 = vst [vmem:[%s2601_s29 + $0x98] sm:$0xff] %v1893_v21 }
 0x256   : > { %1952 = vst [vmem:[%s2601_s29 + $0xd8] sm:$0xff] %v1913_v22 }
 0x257   : > { %1929 = vst [vmem:[%s2601_s29 + $0x20] sm:$0xff] %v1856_v16 }
 0x258   : > { %1937 = vst [vmem:[%s2601_s29 + $0x60] sm:$0xff] %v1876_v18 }
 0x25a   : > { %v1895_v26 = vpop.f32.mrf.mxu2  ;;  %v1915_v32 = vpop.f32.mrf.mxu3 }
 0x25b   : > { %v1896_v41 = vadd.f32 %v3038_v51, %v1895_v26  ;;  %v1916_v42 = vadd.f32 %v3038_v51, %v1915_v32  ;;  %v1857_v53 = vpop.f32.mrf.mxu0  ;;  %v1877_v30 = vpop.f32.mrf.mxu1 }
 0x25c   : > { %v1858_v48 = vadd.f32 %v3038_v51, %v1857_v53  ;;  %v1878_v60 = vadd.f32 %v3038_v51, %v1877_v30 }
 0x25d   : > { %1945 = vst [vmem:[%s2601_s29 + $0xa0] sm:$0xff] %v1896_v41 }
 0x25e   : > { %1953 = vst [vmem:[%s2601_s29 + $0xe0] sm:$0xff] %v1916_v42 }
 0x25f   : > { %1930 = vst [vmem:[%s2601_s29 + $0x28] sm:$0xff] %v1858_v48 }
 0x260   : > { %1938 = vst [vmem:[%s2601_s29 + $0x68] sm:$0xff] %v1878_v60 }
 0x262   : > { %v1897_v28 = vpop.f32.mrf.mxu2  ;;  %v1917_v11 = vpop.f32.mrf.mxu3 }
 0x263   : > { %v1898_v29 = vadd.f32 %v3038_v51, %v1897_v28  ;;  %v1918_v31 = vadd.f32 %v3038_v51, %v1917_v11  ;;  %v1860_v33 = vpop.f32.mrf.mxu0  ;;  %v1880_v34 = vpop.f32.mrf.mxu1 }
 0x264   : > { %v1861_v35 = vadd.f32 %v3038_v51, %v1860_v33  ;;  %v1881_v37 = vadd.f32 %v3038_v51, %v1880_v34 }
 0x265   : > { %1946 = vst [vmem:[%s2601_s29 + $0xa8] sm:$0xff] %v1898_v29 }
 0x266   : > { %1954 = vst [vmem:[%s2601_s29 + $0xe8] sm:$0xff] %v1918_v31 }
 0x267   : > { %1931 = vst [vmem:[%s2601_s29 + $0x30] sm:$0xff] %v1861_v35 }
 0x268   : > { %1939 = vst [vmem:[%s2601_s29 + $0x70] sm:$0xff] %v1881_v37 }
 0x26a   : > { %v1900_v39 = vpop.f32.mrf.mxu2  ;;  %v1920_v24 = vpop.f32.mrf.mxu3 }
 0x26b   : > { %v1901_v63 = vadd.f32 %v3038_v51, %v1900_v39  ;;  %v1921_v40 = vadd.f32 %v3038_v51, %v1920_v24  ;;  %v1862_v43 = vpop.f32.mrf.mxu0  ;;  %v1882_v44 = vpop.f32.mrf.mxu1 }
 0x26c   : > { %v1863_v45 = vadd.f32 %v3038_v51, %v1862_v43  ;;  %v1883_v46 = vadd.f32 %v3038_v51, %v1882_v44 }
 0x26d   : > { %1947 = vst [vmem:[%s2601_s29 + $0xb0] sm:$0xff] %v1901_v63 }
 0x26e   : > { %1955 = vst [vmem:[%s2601_s29 + $0xf0] sm:$0xff] %v1921_v40 }
 0x26f   : > { %1932 = vst [vmem:[%s2601_s29 + $0x38] sm:$0xff] %v1863_v45 }
 0x270   : > { %1940 = vst [vmem:[%s2601_s29 + $0x78] sm:$0xff] %v1883_v46 }
 0x272   : > { %v1902_v20 = vpop.f32.mrf.mxu2  ;;  %v1922_v49 = vpop.f32.mrf.mxu3 }
 0x273   : > { %v1903_v50 = vadd.f32 %v3038_v51, %v1902_v20  ;;  %v1923_v54 = vadd.f32 %v3038_v51, %v1922_v49 }
 0x275   : > { %1948 = vst [vmem:[%s2601_s29 + $0xb8] sm:$0xff] %v1903_v50 }
 0x276   : > { %1956 = vst [vmem:[%s2601_s29 + $0xf8] sm:$0xff] %v1923_v54 }
 0x277 PF: > { %s2280_s7 = sshll.u32 %s2468_s22, 8  ;;  %s1972_s13 = sshll.u32 %s2601_s29, 4  ;;  %s1973_s13 = int_to_ptr.vmem [resolvable:$true] %s1972_s13 }
 0x278   : > { %s1971_s12 = scalar_lea.hbm %s3154_s5, %s2280_s7  ;;  %s1958_s15 = scalar_lea.sflag [#allocation4], %s261_s10 }
 0x279   : > { %s1974_s14 = sshll.u32 %s1971_s12, 4  ;;  %s2406_s22 = scalar_lea.hbm %s3154_s5, 512  ;;  %s1975_s14 = int_to_ptr.hbm [resolvable:$true] %s1974_s14 }
 0x27a   : > { %s2400_s16 = sshra.s32 %s1975_s14, 4  ;;  %s2401_s16 = int_to_ptr.hbm [resolvable:$true] %s2400_s16 }
 0x27b   : > { %s2402_s17 = scalar_lea.hbm %s2401_s16, 256  ;;  %p2407_p6 = scmp.lt.s32.totalorder %s2401_s16, %s3154_s5 }
 0x27c   : > { %p2403_p2 = scmp.ne.s32.totalorder %s2401_s16, %s2402_s17  ;;  %p2408_p7 = scmp.lt.s32.totalorder %s2406_s22, %s2402_s17 }
 0x27e   : > { %p2404_p4 = pnand %p2403_p2, %p2564_p3  ;;  %p2409_p8 = por %p2408_p7, %p2407_p6 }
 0x280   : > { %p2405_p5 = pneg %p2404_p4 }
 0x282   : > { %p2410_p10 = pnand %p2409_p8, %p2405_p5 }
 0x284   : > { %2413 = shalt.err (!%p2410_p10)
}
 0x285   : > { %s2483_s29 = smov 128   ;;  %s2484_s10 = smov 8  }
 0x286   : > { %2310 = dma.vmem_to_hbm [thread:$0]  (%p2564_p3), %s1973_s13, 4096, %s1975_s14, %s1958_s15, %s2483_s29, %s2483_s29, %s2484_s10  }
 0x287 PF: > { %p2316_p11 = scmp.ge.s32.totalorder %s2480_s25, 2  ;;  %s1989_s7 = sand.u32 1, %s2452_s18  }
 0x288   : > { %s1990_s11 = scalar_lea.sflag [#allocation4], %s1989_s7 }
 0x289   : > { %p2313_p12 = pnand %p2316_p11, %p2574_p9 }
 0x28b   : > { %p2314_p13 = pneg %p2313_p12 }
 0x28d   : > { %2447 = dma.done.wait (%p2314_p13), %s1990_s11, 4096  }
 0x28e   : > { %2449 = vsyncadd (%p2314_p13), %s1990_s11, 4294963200  ;;  %s18_s25 = sadd.s32 1, %s2480_s25   ;;  %s3163_s30 = sld [smem:[#allocation6_spill]] }
 0x28f   : > { %p15_p0 = scmp.ge.s32.totalorder %s18_s25, 8   ;;  %s3164_s18 = smov %s2456_s19 }
 0x290   : > { %s3165_s19 = smov %s2460_s20  ;;  %s3166_s20 = smov %s2582_s9 }
 0x291   : > { %s3167_s21 = smov %s2472_s23  ;;  %s3168_s22 = smov %s2476_s24 }
 0x292   : > { %s3169_s23 = smov %s3172_s28  ;;  %17 = sbr.rel (!%p15_p0) target bundleno = 5 (0x5), region = 89 }
 0x294   : > { %s3170_s24 = smov %s3163_s30 }
 0x297   :  { %1996 = vsyncpa [#allocation4], 1 }
 0x298   :  { %1998 = vsyncpa [#allocation4 + $0x1], 1 }

// kernel: tpu_custom_call.1
= control target key start
LH: loop header
LB: loop body
LE: loop exit
PB: predicated region body
PF: predicated region fallthrough
CT: control target
= control target key end

     0   :  { %10 = vsyncpa [#allocation4], 0  ;;  %s3149_s0 = inlined_call_operand.vmem [shape: bf16[2,1,18,18,4], index: 0, kind: input, shape index: {}]   ;;  %s3150_s1 = inlined_call_operand.vmem [shape: bf16[3,3,4,128], index: 1, kind: input, shape index: {}]   ;;  %s3151_s2 = inlined_call_operand.vmem [shape: f32[1,128], index: 2, kind: input, shape index: {}]   ;;  %s3152_s3 = inlined_call_operand.vmem [shape: bf16[128,128], index: 3, kind: input, shape index: {}]   ;;  %s3153_s4 = inlined_call_operand.vmem [shape: f32[1,128], index: 4, kind: input, shape index: {}]   ;;  %s3154_s5 = inlined_call_operand.hbm [shape: f32[2,256,128], index: 5, kind: output, shape index: {}]  }
   0x1   :  { %12 = vsyncpa [#allocation4 + $0x1], 0  ;;  %s2515_s18 = smov 0   ;;  %s2517_s19 = smov 0  }
   0x2   :  { %s2519_s20 = smov 0   ;;  %s2521_s21 = smov 0  }
   0x3   :  { %s2523_s22 = smov 0   ;;  %s2525_s23 = smov 0  }
   0x4   :  { %s2527_s24 = smov 0   ;;  %s2529_s25 = smov 0  }
   0x5 LB: > { %s2077_s26 = sadd.s32 4294967295, %s2480_s25   ;;  %s2078_s27 = sadd.s32 4294967294, %s2480_s25   ;;  %s2480_s25 = sphi %s2529_s25, %s18_s25   ;;  %s2476_s24 = sphi %s2527_s24, %s3170_s24   ;;  %s2472_s23 = sphi %s2525_s23, %s3169_s23   ;;  %s2468_s22 = sphi %s2523_s22, %s3168_s22   ;;  %s2464_s21 = sphi %s2521_s21, %s3167_s21   ;;  %s2460_s20 = sphi %s2519_s20, %s3166_s20   ;;  %s2456_s19 = sphi %s2517_s19, %s3165_s19   ;;  %s2452_s18 = sphi %s2515_s18, %s3164_s18  }
   0x6   : > { %s30_s28 = sadd.s32 1, %s2472_s23  ;;  %s37_s29 = sadd.s32 1, %s2476_s24 }
   0x7   : > { %p31_p0 = scmp.ge.s32.totalorder %s30_s28, 3  ;;  %p173_p1 = scmp.ne.s32.totalorder %s2460_s20, %s2456_s19 }
   0x8   : > { %p174_p2 = scmp.eq.s32.totalorder %s2077_s26, 5  ;;  %p179_p4 = scmp.ne.s32.totalorder %s2456_s19, %s2452_s18 }
   0x9   : > { %s3172_s28 = smov (%p31_p0, %s30_s28), 0  ;;  %s3174_s29 = smov (!%p31_p0, %s37_s29), %s2476_s24 }
   0xa   : > { %p2564_p3 = por %p174_p2, %p173_p1  ;;  %p39_p5 = scmp.ge.s32.totalorder %s3174_s29, 2 }
   0xb   : > { %p180_p6 = scmp.eq.s32.totalorder %s2078_s27, 5  ;;  %p2081_p7 = scmp.ge.s32.totalorder %s2480_s25, 1 }
   0xc   : > { %p227_p8 = scmp.lt.s32.totalorder %s2480_s25, 7  ;;  %s3176_s29 = smov (%p39_p5, %s3174_s29), 0 }
   0xd   : > { %3157 = sst [smem:[#allocation6_spill]] %s3176_s29  ;;  %p2574_p9 = por %p180_p6, %p179_p4 }
   0xe   : > { %p228_p10 = pnand %p2081_p7, %p227_p8  ;;  %s158_s7 = ssub.s32 %s2476_s24, %s3176_s29 }
   0xf   : > { %s163_s8 = sadd.s32 1, %s2460_s20  ;;  %p161_p11 = scmp.eq.s32.totalorder %s158_s7, 0 }
  0x10   : > { %231 = sbr.rel (%p228_p10) target bundleno = 647 (0x287), region = 40  ;;  %s261_s10 = sand.u32 (!%p228_p10), 1, %s2456_s19  }
  0x11   : > { %s2582_s9 = scalar_select %p161_p11, %s2460_s20, %s163_s8  }
  0x12   : > { %p264_p12 = scmp.lt.s32.totalorder (!%p228_p10), %s2468_s22, 1  ;;  %s2082_s11 = sshll.u32 (!%p228_p10), %s261_s10, 8 }
  0x13   : > { %p273_p13 = scmp.lt.s32.totalorder (!%p228_p10), %s2464_s21, 2  ;;  %s2601_s29 = scalar_lea.vmem (!%p228_p10), [#allocation3], %s2082_s11 }
  0x14   : > { %p2085_p0 = scmp.ne.s32.totalorder (!%p228_p10), %s2464_s21, 0 }
  0x15   : > { %s265_s12 = scalar_select %p264_p12, %s2468_s22, 1 }
  0x16   : > { %s274_s13 = scalar_select %p273_p13, %s2464_s21, 2 }
  0x17   : > { %s2308_s14 = smul.u32 216, %s265_s12 }
  0x18   : > { %s2309_s15 = smul.u32 6, %s274_s13 }
  0x19   : > { %s2594_s26 = scalar_lea.vmem %s3149_s0, %s2308_s14  ;;  %283 = sbr.rel (%p2085_p0) target bundleno = 63 (0x3f), region = 44 }
  0x1a   : > { %s2599_s8 = scalar_lea.vmem %s3150_s1, %s2309_s15 }
  0x1e   : > { %v2482_v0 = vmov 0.0  }
  0x1f   : > { %284 = vst [vmem:[#allocation2 + $0xb0] sm:$0xff] %v2482_v0 }
  0x20   : > { %285 = vst [vmem:[#allocation2] sm:$0xff] %v2482_v0 }
  0x21   : > { %286 = vst [vmem:[#allocation2 + $0xd8] sm:$0xff] %v2482_v0 }
  0x22   : > { %287 = vst [vmem:[#allocation2 + $0x18] sm:$0xff] %v2482_v0 }
  0x23   : > { %288 = vst [vmem:[#allocation2 + $0x50] sm:$0xff] %v2482_v0 }
  0x24   : > { %289 = vst [vmem:[#allocation2 + $0x68] sm:$0xff] %v2482_v0 }
  0x25   : > { %290 = vst [vmem:[#allocation2 + $0x30] sm:$0xff] %v2482_v0 }
  0x26   : > { %291 = vst [vmem:[#allocation2 + $0x48] sm:$0xff] %v2482_v0 }
  0x27   : > { %292 = vst [vmem:[#allocation2 + $0x80] sm:$0xff] %v2482_v0 }
  0x28   : > { %293 = vst [vmem:[#allocation2 + $0x88] sm:$0xff] %v2482_v0 }
  0x29   : > { %294 = vst [vmem:[#allocation2 + $0xe8] sm:$0xff] %v2482_v0 }
  0x2a   : > { %295 = vst [vmem:[#allocation2 + $0xb8] sm:$0xff] %v2482_v0 }
  0x2b   : > { %296 = vst [vmem:[#allocation2 + $0x60] sm:$0xff] %v2482_v0 }
  0x2c   : > { %297 = vst [vmem:[#allocation2 + $0xf0] sm:$0xff] %v2482_v0 }
  0x2d   : > { %298 = vst [vmem:[#allocation2 + $0x8] sm:$0xff] %v2482_v0 }
  0x2e   : > { %299 = vst [vmem:[#allocation2 + $0x78] sm:$0xff] %v2482_v0 }
  0x2f   : > { %300 = vst [vmem:[#allocation2 + $0x38] sm:$0xff] %v2482_v0 }
  0x30   : > { %301 = vst [vmem:[#allocation2 + $0x58] sm:$0xff] %v2482_v0 }
  0x31   : > { %302 = vst [vmem:[#allocation2 + $0x40] sm:$0xff] %v2482_v0 }
  0x32   : > { %303 = vst [vmem:[#allocation2 + $0xc8] sm:$0xff] %v2482_v0 }
  0x33   : > { %304 = vst [vmem:[#allocation2 + $0xe0] sm:$0xff] %v2482_v0 }
  0x34   : > { %305 = vst [vmem:[#allocation2 + $0x90] sm:$0xff] %v2482_v0 }
  0x35   : > { %306 = vst [vmem:[#allocation2 + $0x70] sm:$0xff] %v2482_v0 }
  0x36   : > { %307 = vst [vmem:[#allocation2 + $0xc0] sm:$0xff] %v2482_v0 }
  0x37   : > { %308 = vst [vmem:[#allocation2 + $0xa8] sm:$0xff] %v2482_v0 }
  0x38   : > { %309 = vst [vmem:[#allocation2 + $0xd0] sm:$0xff] %v2482_v0 }
  0x39   : > { %310 = vst [vmem:[#allocation2 + $0x10] sm:$0xff] %v2482_v0 }
  0x3a   : > { %311 = vst [vmem:[#allocation2 + $0x28] sm:$0xff] %v2482_v0 }
  0x3b   : > { %312 = vst [vmem:[#allocation2 + $0xa0] sm:$0xff] %v2482_v0 }
  0x3c   : > { %313 = vst [vmem:[#allocation2 + $0xf8] sm:$0xff] %v2482_v0 }
  0x3d   : > { %314 = vst [vmem:[#allocation2 + $0x20] sm:$0xff] %v2482_v0 }
  0x3e   : > { %315 = vst [vmem:[#allocation2 + $0x98] sm:$0xff] %v2482_v0 }
  0x3f PF: > { %v367_v1 = vld [vmem:[%s2599_s8] sm:$0x3]  ;;  %vm854_vm0 = vcmask 1041408   ;;  %v2200_v2 = vld [vmem:[%s2599_s8 + $0x4] sm:$0x3]  ;;  %s2255_s11 = smul.u32 12, %s2464_s21 }
  0x40   : > { %v1076_v3 = vsel %vm854_vm0, %v367_v1, 0  ;;  %v2607_v4 = vsel %vm854_vm0, %v2200_v2, 0  ;;  %vm805_vm1 = vcmask 31744   ;;  %vm1183_vm2 = vcmask 1042432   ;;  %v2087_v5 = vld [vmem:[%s2599_s8 + $0x2] sm:$0x3] }
  0x41   : > { %1085 = vmatpush.bf16.msra.mxu1 %v1076_v3  ;;  %1406 = vmatpush.bf16.msra.mxu2 %v2607_v4  ;;  %s2612_s12 = scalar_lea.vmem %s2594_s26, %s2255_s11  ;;  %vm1184_vm3 = vcmask 1046532   ;;  %v856_v6 = vsel %vm854_vm0, %v2087_v5, 0  ;;  %vm368_vm4 = vsmask.f32 3328  ;;  %vm369_vm5 = vsmask.f32 7440 }
  0x42   : > { %v2256_v7 = vld [vmem:[%s2612_s12] sm:$0xff]  ;;  %865 = vmatpush.bf16.msra.mxu0 %v856_v6  ;;  %2281 = vmatpush.bf16.msra.mxu3 %v856_v6  ;;  %v321_v10 = vld [vmem:[%s2612_s12 + $0x8] sm:$0x1]  ;;  %vm2619_vm6 = vmor %vm1183_vm2, %vm1184_vm3  ;;  %p2217_p1 = scmp.ne.s32.totalorder %s2464_s21, 2 }
  0x43   : > { %v319_v8 = vld [vmem:[%s2612_s12] sm:$0xf]  ;;  %v320_v9 = vld [vmem:[%s2612_s12 + $0x4] sm:$0xf]  ;;  %v1191_v16 = vrot.slane %v321_v10, 5  ;;  %v391_v19 = vshll.u32 %v321_v10, 16  ;;  %vm2641_vm7 = vmor %vm368_vm4, %vm369_vm5 }
  0x44   : > { %v2184_v12 = vrot.slane %v319_v8, 9  ;;  %v1188_v13 = vrot.slane %v320_v9, 5  ;;  %v372_v14 = vshrl.u32 %v319_v8, 16  ;;  %v375_v15 = vshll.u32 %v319_v8, 16  ;;  %2168 = vmatmul.msk.bf16.vlgmr.msra.gmra.mxu1 %vm805_vm1, %v2256_v7  ;;  %v2625_v20 = vld [vmem:[%s2612_s12 + $0x90] sm:$0xf] }
  0x45   : > { %v381_v17 = vshll.u32 %v320_v9, 16  ;;  %v385_v18 = vshrl.u32 %v320_v9, 16  ;;  %v2630_v25 = vld [vmem:[%s2612_s12 + $0x94] sm:$0xf]  ;;  %v393_v29 = vrot.slane %v391_v19, 5  ;;  %v660_v33 = vshrl.u32 %v2625_v20, 16 }
  0x46   : > { %2282 = vmatpush.bf16.msrb.mxu3 %v1076_v3  ;;  %v1189_v21 = vsel %vm2619_vm6, %v2184_v12, %v1188_v13  ;;  %v1190_v22 = vrot.slane %v1188_v13, 4  ;;  %v374_v23 = vrot.slane %v372_v14, 4  ;;  %v377_v24 = vrot.slane %v375_v15, 5  ;;  %v2633_v30 = vld [vmem:[%s2612_s12 + $0x98] sm:$0x1]  ;;  %v2257_v6 = vld [vmem:[%s2612_s12 + $0xc] sm:$0xff] }
  0x47   : > { %v1300_v26 = vunpack.c.l.b16 %v1189_v21  ;;  %v383_v27 = vrot.slane %v381_v17, 5  ;;  %v387_v28 = vrot.slane %v385_v18, 4  ;;  %v663_v34 = vshll.u32 %v2625_v20, 16  ;;  %v323_v50 = vld [vmem:[%s2612_s12 + $0x10] sm:$0xf] }
  0x48   : > { %v1192_v31 = vsel %vm2619_vm6, %v1190_v22, %v1191_v16  ;;  %v378_v32 = vor.u32 %v377_v24, %v374_v23  ;;  %v669_v38 = vshll.u32 %v2630_v25, 16  ;;  %v673_v39 = vshrl.u32 %v2630_v25, 16  ;;  %v324_v51 = vld [vmem:[%s2612_s12 + $0x14] sm:$0x1]  ;;  %v322_v56 = vld [vmem:[%s2612_s12 + $0xc] sm:$0xf] }
  0x49   : > { %v1301_v35 = vunpack.c.l.b16 %v1192_v31  ;;  %v388_v37 = vor.u32 %v387_v28, %v383_v27  ;;  %v662_v41 = vrot.slane %v660_v33, 4  ;;  %v665_v42 = vrot.slane %v663_v34, 5  ;;  %v2664_v9 = vld [vmem:[%s2612_s12 + $0x9c] sm:$0xf]  ;;  %v2670_v19 = vld [vmem:[%s2612_s12 + $0xa0] sm:$0xf] }
  0x4a   : > { %v379_v40 = vrot.slane %v378_v32, 4  ;;  %v679_v43 = vshll.u32 %v2633_v30, 16  ;;  %v671_v46 = vrot.slane %v669_v38, 5  ;;  %v675_v47 = vrot.slane %v673_v39, 4  ;;  %v2673_v24 = vld [vmem:[%s2612_s12 + $0xa4] sm:$0x1] }
  0x4b   : > { %v1332_v44 = vpack.c.b16 %v1301_v35, %v1300_v26  ;;  %v389_v45 = vrot.slane %v388_v37, 4  ;;  %v666_v49 = vor.u32 %v665_v42, %v662_v41  ;;  %v2185_v59 = vrot.slane %v322_v56, 9  ;;  %v326_v31 = vld [vmem:[%s2612_s12 + $0x1c] sm:$0xf] }
  0x4c   : > { %v384_v48 = vsel %vm2641_vm7, %v379_v40, %v383_v27  ;;  %v676_v54 = vor.u32 %v675_v47, %v671_v46  ;;  %v681_v55 = vrot.slane %v679_v43, 5  ;;  %v1195_v61 = vrot.slane %v323_v50, 5 }
  0x4d   : > { %2201 = vmatmul.msk.bf16.vlgmr.msra.gmra.mxu2 %vm805_vm1, %v1332_v44  ;;  %v394_v52 = vsel %vm2641_vm7, %v389_v45, %v393_v29  ;;  %v757_v53 = vunpack.c.l.b16 %v384_v48  ;;  %v667_v58 = vrot.slane %v666_v49, 4  ;;  %v1198_v62 = vrot.slane %v324_v51, 5  ;;  %v325_v44 = vld [vmem:[%s2612_s12 + $0x18] sm:$0xf]  ;;  %v327_v45 = vld [vmem:[%s2612_s12 + $0x20] sm:$0x1] }
  0x4e   : > { %v758_v57 = vunpack.c.l.b16 %v394_v52  ;;  %v677_v60 = vrot.slane %v676_v54, 4  ;;  %v396_v1 = vshrl.u32 %v322_v56, 16  ;;  %v399_v2 = vshll.u32 %v322_v56, 16 }
  0x4f   : > { %v672_v0 = vsel %vm2641_vm7, %v667_v58, %v671_v46  ;;  %v1196_v7 = vsel %vm2619_vm6, %v2185_v59, %v1195_v61  ;;  %v1197_v8 = vrot.slane %v1195_v61, 4  ;;  %v405_v16 = vshll.u32 %v323_v50, 16 }
  0x50   : > { %v789_v63 = vpack.c.b16 %v758_v57, %v757_v53  ;;  %v682_v3 = vsel %vm2641_vm7, %v677_v60, %v681_v55  ;;  %v781_v5 = vunpack.c.l.b16 %v672_v0  ;;  %v1302_v12 = vunpack.c.l.b16 %v1196_v7  ;;  %v2696_v0 = vld [vmem:[%s2612_s12 + $0xa8] sm:$0xf] }
  0x51   : > { %v782_v10 = vunpack.c.l.b16 %v682_v3  ;;  %v398_v13 = vrot.slane %v396_v1, 4  ;;  %v401_v14 = vrot.slane %v399_v2, 5  ;;  %v1199_v15 = vsel %vm2619_vm6, %v1197_v8, %v1198_v62 }
  0x52   : > { %2088 = vmatmul.msk.bf16.vlgmr.msra.gmra.mxu0 %vm805_vm1, %v789_v63  ;;  %v409_v17 = vshrl.u32 %v323_v50, 16  ;;  %v415_v18 = vshll.u32 %v324_v51, 16  ;;  %v1303_v22 = vunpack.c.l.b16 %v1199_v15  ;;  %v684_v26 = vshrl.u32 %v2664_v9, 16 }
  0x53   : > { %v801_v21 = vpack.c.b16 %v782_v10, %v781_v5  ;;  %v402_v23 = vor.u32 %v401_v14, %v398_v13  ;;  %v407_v27 = vrot.slane %v405_v16, 5  ;;  %v687_v29 = vshll.u32 %v2664_v9, 16  ;;  %v2258_v14 = vld [vmem:[%s2612_s12 + $0x18] sm:$0xff] }
  0x54   : > { %2169 = vmatmul.msk.bf16.gmra.mxu1 %vm805_vm1, %v2257_v6  ;;  %v411_v28 = vrot.slane %v409_v17, 4  ;;  %v417_v33 = vrot.slane %v415_v18, 5  ;;  %v686_v34 = vrot.slane %v684_v26, 4  ;;  %v693_v35 = vshll.u32 %v2670_v19, 16  ;;  %v2699_v6 = vld [vmem:[%s2612_s12 + $0xac] sm:$0xf] }
  0x55   : > { %2100 = vmatmul.msk.bf16.vlgmr.msra.gmra.mxu3 %vm805_vm1, %v801_v21  ;;  %v403_v32 = vrot.slane %v402_v23, 4  ;;  %v689_v38 = vrot.slane %v687_v29, 5  ;;  %v697_v39 = vshrl.u32 %v2670_v19, 16  ;;  %v703_v40 = vshll.u32 %v2673_v24, 16  ;;  %v2708_v21 = vld [vmem:[%s2612_s12 + $0xb0] sm:$0x1] }
  0x56   : > { %v412_v37 = vor.u32 %v411_v28, %v407_v27  ;;  %2283 = vmatpush.bf16.msra.mxu3 %v2607_v4  ;;  %v1333_v41 = vpack.c.b16 %v1303_v22, %v1302_v12  ;;  %v695_v43 = vrot.slane %v693_v35, 5  ;;  %v1202_v46 = vrot.slane %v326_v31, 5 }
  0x57   : > { %v408_v42 = vsel %vm2641_vm7, %v403_v32, %v407_v27  ;;  %v690_v48 = vor.u32 %v689_v38, %v686_v34  ;;  %v699_v49 = vrot.slane %v697_v39, 4  ;;  %v2186_v50 = vrot.slane %v325_v44, 9 }
  0x58   : > { %v413_v47 = vrot.slane %v412_v37, 4  ;;  %v759_v51 = vunpack.c.l.b16 %v408_v42  ;;  %v705_v52 = vrot.slane %v703_v40, 5  ;;  %v1204_v53 = vrot.slane %v1202_v46, 4  ;;  %v329_v37 = vld [vmem:[%s2612_s12 + $0x28] sm:$0xf] }
  0x59   : > { %v691_v4 = vrot.slane %v690_v48, 4  ;;  %v700_v55 = vor.u32 %v699_v49, %v695_v43  ;;  %v1205_v56 = vrot.slane %v327_v45, 5  ;;  %v420_v58 = vshrl.u32 %v325_v44, 16 }
  0x5a   : > { %v418_v54 = vsel %vm2641_vm7, %v413_v47, %v417_v33  ;;  %v423_v59 = vshll.u32 %v325_v44, 16  ;;  %v1203_v62 = vsel %vm2619_vm6, %v2186_v50, %v1202_v46  ;;  %v429_v63 = vshll.u32 %v326_v31, 16  ;;  %v328_v44 = vld [vmem:[%s2612_s12 + $0x24] sm:$0xf] }
  0x5b   : > { %v760_v57 = vunpack.c.l.b16 %v418_v54  ;;  %v696_v60 = vsel %vm2641_vm7, %v691_v4, %v695_v43  ;;  %v701_v61 = vrot.slane %v700_v55, 4  ;;  %v422_v3 = vrot.slane %v420_v58, 4  ;;  %v2729_v58 = vld [vmem:[%s2612_s12 + $0xb4] sm:$0xf] }
  0x5c   : > { %v783_v2 = vunpack.c.l.b16 %v696_v60  ;;  %v425_v5 = vrot.slane %v423_v59, 5  ;;  %v1206_v8 = vsel %vm2619_vm6, %v1204_v53, %v1205_v56  ;;  %v431_v10 = vrot.slane %v429_v63, 5  ;;  %v2732_v63 = vld [vmem:[%s2612_s12 + $0xb8] sm:$0xf] }
  0x5d   : > { %2202 = vmatmul.msk.bf16.gmra.mxu2 %vm805_vm1, %v1333_v41  ;;  %v790_v1 = vpack.c.b16 %v760_v57, %v759_v51  ;;  %v706_v7 = vsel %vm2641_vm7, %v701_v61, %v705_v52  ;;  %v433_v12 = vshrl.u32 %v326_v31, 16  ;;  %v439_v16 = vshll.u32 %v327_v45, 16  ;;  %v330_v52 = vld [vmem:[%s2612_s12 + $0x2c] sm:$0x1] }
  0x5e   : > { %v784_v13 = vunpack.c.l.b16 %v706_v7  ;;  %v426_v15 = vor.u32 %v425_v5, %v422_v3  ;;  %v708_v17 = vshrl.u32 %v2696_v0, 16  ;;  %v711_v22 = vshll.u32 %v2696_v0, 16 }
  0x5f   : > { %v435_v18 = vrot.slane %v433_v12, 4  ;;  %v717_v23 = vshll.u32 %v2699_v6, 16  ;;  %v721_v26 = vshrl.u32 %v2699_v6, 16  ;;  %v441_v29 = vrot.slane %v439_v16, 5 }
  0x60   : > { %v802_v27 = vpack.c.b16 %v784_v13, %v783_v2  ;;  %v427_v28 = vrot.slane %v426_v15, 4  ;;  %v710_v31 = vrot.slane %v708_v17, 4  ;;  %v713_v33 = vrot.slane %v711_v22, 5  ;;  %v2740_v22 = vld [vmem:[%s2612_s12 + $0xbc] sm:$0x1] }
  0x61   : > { %v436_v32 = vor.u32 %v435_v18, %v431_v10  ;;  %v719_v34 = vrot.slane %v717_v23, 5  ;;  %v723_v35 = vrot.slane %v721_v26, 4  ;;  %v1304_v38 = vunpack.c.l.b16 %v1203_v62 }
  0x62   : > { %2089 = vmatmul.msk.bf16.gmra.mxu0 %vm805_vm1, %v790_v1  ;;  %v1305_v39 = vunpack.c.l.b16 %v1206_v8  ;;  %v727_v40 = vshll.u32 %v2708_v21, 16  ;;  %v714_v42 = vor.u32 %v713_v33, %v710_v31  ;;  %v1209_v46 = vrot.slane %v329_v37, 5  ;;  %v2259_v33 = vld [vmem:[%s2612_s12 + $0x24] sm:$0xff] }
  0x63   : > { %v437_v41 = vrot.slane %v436_v32, 4  ;;  %v724_v43 = vor.u32 %v723_v35, %v719_v34  ;;  %v432_v47 = vsel %vm2641_vm7, %v427_v28, %v431_v10  ;;  %v444_v53 = vshrl.u32 %v328_v44, 16 }
  0x64   : > { %2170 = vmatmul.msk.bf16.gmra.mxu1 %vm805_vm1, %v2258_v14  ;;  %v729_v45 = vrot.slane %v727_v40, 5  ;;  %v715_v49 = vrot.slane %v714_v42, 4  ;;  %v1334_v51 = vpack.c.b16 %v1305_v39, %v1304_v38  ;;  %v447_v54 = vshll.u32 %v328_v44, 16  ;;  %v331_v42 = vld [vmem:[%s2612_s12 + $0x30] sm:$0xf] }
  0x65   : > { %2101 = vmatmul.msk.bf16.gmra.mxu3 %vm805_vm1, %v802_v27  ;;  %v442_v48 = vsel %vm2641_vm7, %v437_v41, %v441_v29  ;;  %v725_v50 = vrot.slane %v724_v43, 4  ;;  %v2187_v56 = vrot.slane %v328_v44, 9  ;;  %v453_v57 = vshll.u32 %v329_v37, 16  ;;  %v332_v43 = vld [vmem:[%s2612_s12 + $0x34] sm:$0xf] }
  0x66   : > { %v720_v4 = vsel %vm2641_vm7, %v715_v49, %v719_v34  ;;  %v761_v59 = vunpack.c.l.b16 %v432_v47  ;;  %v762_v60 = vunpack.c.l.b16 %v442_v48  ;;  %v1211_v61 = vrot.slane %v1209_v46, 4 }
  0x67   : > { %v730_v55 = vsel %vm2641_vm7, %v725_v50, %v729_v45  ;;  %v446_v62 = vrot.slane %v444_v53, 4  ;;  %v1212_v1 = vrot.slane %v330_v52, 5  ;;  %v449_v2 = vrot.slane %v447_v54, 5 }
  0x68   : > { %v455_v3 = vrot.slane %v453_v57, 5  ;;  %v457_v5 = vshrl.u32 %v329_v37, 16  ;;  %v785_v7 = vunpack.c.l.b16 %v720_v4  ;;  %v786_v8 = vunpack.c.l.b16 %v730_v55 }
  0x69   : > { %v732_v10 = vshrl.u32 %v2729_v58, 16  ;;  %v735_v12 = vshll.u32 %v2729_v58, 16  ;;  %v463_v14 = vshll.u32 %v330_v52, 16  ;;  %v741_v15 = vshll.u32 %v2732_v63, 16 }
  0x6a   : > { %v459_v13 = vrot.slane %v457_v5, 4  ;;  %v745_v16 = vshrl.u32 %v2732_v63, 16  ;;  %v791_v17 = vpack.c.b16 %v762_v60, %v761_v59  ;;  %v450_v18 = vor.u32 %v449_v2, %v446_v62 }
  0x6b   : > { %v734_v23 = vrot.slane %v732_v10, 4  ;;  %v737_v26 = vrot.slane %v735_v12, 5  ;;  %v743_v28 = vrot.slane %v741_v15, 5  ;;  %v1210_v31 = vsel %vm2619_vm6, %v2187_v56, %v1209_v46 }
  0x6c   : > { %v460_v27 = vor.u32 %v459_v13, %v455_v3  ;;  %v747_v29 = vrot.slane %v745_v16, 4  ;;  %v803_v32 = vpack.c.b16 %v786_v8, %v785_v7  ;;  %v1213_v34 = vsel %vm2619_vm6, %v1211_v61, %v1212_v1  ;;  %v333_v61 = vld [vmem:[%s2612_s12 + $0x38] sm:$0x1] }
  0x6d   : > { %2203 = vmatmul.msk.bf16.gmra.mxu2 %vm805_vm1, %v1334_v51  ;;  %v465_v35 = vrot.slane %v463_v14, 5  ;;  %v751_v37 = vshll.u32 %v2740_v22, 16  ;;  %v451_v38 = vrot.slane %v450_v18, 4  ;;  %v738_v40 = vor.u32 %v737_v26, %v734_v23 }
  0x6e   : > { %v461_v39 = vrot.slane %v460_v27, 4  ;;  %v748_v41 = vor.u32 %v747_v29, %v743_v28  ;;  %v1306_v44 = vunpack.c.l.b16 %v1210_v31  ;;  %v1307_v45 = vunpack.c.l.b16 %v1213_v34  ;;  %v334_v27 = vld [vmem:[%s2612_s12 + $0x3c] sm:$0xf] }
  0x6f   : > { %v753_v46 = vrot.slane %v751_v37, 5  ;;  %v456_v47 = vsel %vm2641_vm7, %v451_v38, %v455_v3  ;;  %v739_v49 = vrot.slane %v738_v40, 4  ;;  %v468_v51 = vshrl.u32 %v331_v42, 16 }
  0x70   : > { %v466_v48 = vsel %vm2641_vm7, %v461_v39, %v465_v35  ;;  %v749_v50 = vrot.slane %v748_v41, 4  ;;  %v471_v52 = vshll.u32 %v331_v42, 16  ;;  %v477_v53 = vshll.u32 %v332_v43, 16 }
  0x71   : > { %v481_v54 = vshrl.u32 %v332_v43, 16  ;;  %v1335_v4 = vpack.c.b16 %v1307_v45, %v1306_v44  ;;  %v1216_v55 = vrot.slane %v332_v43, 5  ;;  %v763_v56 = vunpack.c.l.b16 %v456_v47 }
  0x72   : > { %2090 = vmatmul.msk.bf16.gmra.mxu0 %vm805_vm1, %v791_v17  ;;  %v764_v57 = vunpack.c.l.b16 %v466_v48  ;;  %v744_v59 = vsel %vm2641_vm7, %v739_v49, %v743_v28  ;;  %v754_v60 = vsel %vm2641_vm7, %v749_v50, %v753_v46  ;;  %v470_v62 = vrot.slane %v468_v51, 4  ;;  %v2260_v17 = vld [vmem:[%s2612_s12 + $0x30] sm:$0xff]  ;;  %v336_v48 = vld [vmem:[%s2612_s12 + $0x44] sm:$0x1] }
  0x73   : > { %v473_v1 = vrot.slane %v471_v52, 5  ;;  %v479_v2 = vrot.slane %v477_v53, 5  ;;  %v483_v3 = vrot.slane %v481_v54, 4  ;;  %v2188_v5 = vrot.slane %v331_v42, 9 }
  0x74   : > { %2171 = vmatmul.msk.bf16.gmra.mxu1 %vm805_vm1, %v2259_v33  ;;  %v1219_v7 = vrot.slane %v333_v61, 5  ;;  %v792_v8 = vpack.c.b16 %v764_v57, %v763_v56  ;;  %v787_v10 = vunpack.c.l.b16 %v744_v59  ;;  %v788_v12 = vunpack.c.l.b16 %v754_v60  ;;  %v2261_v57 = vld [vmem:[%s2612_s12 + $0x3c] sm:$0xff]  ;;  %v2268_v60 = vld [vmem:[%s2612_s12 + $0x90] sm:$0xff] }
  0x75   : > { %2102 = vmatmul.msk.bf16.gmra.mxu3 %vm805_vm1, %v803_v32  ;;  %v1218_v13 = vrot.slane %v1216_v55, 4  ;;  %v474_v14 = vor.u32 %v473_v1, %v470_v62  ;;  %v484_v15 = vor.u32 %v483_v3, %v479_v2  ;;  %v487_v16 = vshll.u32 %v333_v61, 16  ;;  %v335_v32 = vld [vmem:[%s2612_s12 + $0x40] sm:$0xf]  ;;  %v337_v3 = vld [vmem:[%s2612_s12 + $0x48] sm:$0xf] }
  0x76   : > { %v804_v18 = vpack.c.b16 %v788_v12, %v787_v10  ;;  %v1217_v23 = vsel %vm2619_vm6, %v2188_v5, %v1216_v55  ;;  %v492_v35 = vshrl.u32 %v334_v27, 16  ;;  %v495_v37 = vshll.u32 %v334_v27, 16  ;;  %v338_v5 = vld [vmem:[%s2612_s12 + $0x4c] sm:$0xf] }
  0x77   : > { %v1220_v26 = vsel %vm2619_vm6, %v1218_v13, %v1219_v7  ;;  %v475_v28 = vrot.slane %v474_v14, 4  ;;  %v485_v29 = vrot.slane %v484_v15, 4  ;;  %v489_v31 = vrot.slane %v487_v16, 5 }
  0x78   : > { %v1308_v33 = vunpack.c.l.b16 %v1217_v23  ;;  %v1309_v34 = vunpack.c.l.b16 %v1220_v26  ;;  %v501_v38 = vshll.u32 %v335_v32, 16  ;;  %v505_v39 = vshrl.u32 %v335_v32, 16 }
  0x79   : > { %v480_v40 = vsel %vm2641_vm7, %v475_v28, %v479_v2  ;;  %v490_v41 = vsel %vm2641_vm7, %v485_v29, %v489_v31  ;;  %v1223_v43 = vrot.slane %v335_v32, 5  ;;  %v494_v44 = vrot.slane %v492_v35, 4 }
  0x7a   : > { %v1336_v42 = vpack.c.b16 %v1309_v34, %v1308_v33  ;;  %v497_v45 = vrot.slane %v495_v37, 5  ;;  %v765_v46 = vunpack.c.l.b16 %v480_v40  ;;  %v766_v47 = vunpack.c.l.b16 %v490_v41  ;;  %v2262_v41 = vld [vmem:[%s2612_s12 + $0x48] sm:$0xff] }
  0x7b   : > { %v503_v49 = vrot.slane %v501_v38, 5  ;;  %v507_v50 = vrot.slane %v505_v39, 4  ;;  %v2189_v51 = vrot.slane %v334_v27, 9  ;;  %v1225_v52 = vrot.slane %v1223_v43, 4  ;;  %v339_v27 = vld [vmem:[%s2612_s12 + $0x50] sm:$0x1] }
  0x7c   : > { %v1226_v53 = vrot.slane %v336_v48, 5  ;;  %v793_v54 = vpack.c.b16 %v766_v47, %v765_v46  ;;  %v511_v56 = vshll.u32 %v336_v48, 16  ;;  %v516_v13 = vshrl.u32 %v337_v3, 16 }
  0x7d   : > { %2204 = vmatmul.msk.bf16.gmra.mxu2 %vm805_vm1, %v1335_v4  ;;  %v498_v4 = vor.u32 %v497_v45, %v494_v44  ;;  %v508_v55 = vor.u32 %v507_v50, %v503_v49  ;;  %v1224_v59 = vsel %vm2619_vm6, %v2189_v51, %v1223_v43  ;;  %v519_v14 = vshll.u32 %v337_v3, 16  ;;  %v340_v45 = vld [vmem:[%s2612_s12 + $0x54] sm:$0xf] }
  0x7e   : > { %v1227_v61 = vsel %vm2619_vm6, %v1225_v52, %v1226_v53  ;;  %v513_v2 = vrot.slane %v511_v56, 5  ;;  %v1310_v7 = vunpack.c.l.b16 %v1224_v59  ;;  %v525_v15 = vshll.u32 %v338_v5, 16 }
  0x7f   : > { %v499_v62 = vrot.slane %v498_v4, 4  ;;  %v509_v1 = vrot.slane %v508_v55, 4  ;;  %v529_v16 = vshrl.u32 %v338_v5, 16  ;;  %v1230_v26 = vrot.slane %v338_v5, 5 }
  0x80   : > { %v518_v28 = vrot.slane %v516_v13, 4  ;;  %v521_v29 = vrot.slane %v519_v14, 5  ;;  %v527_v31 = vrot.slane %v525_v15, 5  ;;  %v2190_v34 = vrot.slane %v337_v3, 9  ;;  %v342_v3 = vld [vmem:[%s2612_s12 + $0x5c] sm:$0x1] }
  0x81   : > { %v504_v10 = vsel %vm2641_vm7, %v499_v62, %v503_v49  ;;  %v514_v12 = vsel %vm2641_vm7, %v509_v1, %v513_v2  ;;  %v531_v32 = vrot.slane %v529_v16, 4  ;;  %v1232_v35 = vrot.slane %v1230_v26, 4  ;;  %v341_v49 = vld [vmem:[%s2612_s12 + $0x58] sm:$0xf] }
  0x82   : > { %2091 = vmatmul.msk.bf16.gmra.mxu0 %vm805_vm1, %v792_v8  ;;  %v1311_v8 = vunpack.c.l.b16 %v1227_v61  ;;  %v768_v23 = vunpack.c.l.b16 %v514_v12  ;;  %v1233_v37 = vrot.slane %v339_v27, 5  ;;  %v522_v38 = vor.u32 %v521_v29, %v518_v28  ;;  %v2270_v29 = vld [vmem:[%s2612_s12 + $0xa8] sm:$0xff] }
  0x83   : > { %v532_v39 = vor.u32 %v531_v32, %v527_v31  ;;  %v535_v40 = vshll.u32 %v339_v27, 16  ;;  %v1231_v43 = vsel %vm2619_vm6, %v2190_v34, %v1230_v26  ;;  %v540_v52 = vshrl.u32 %v340_v45, 16  ;;  %v2263_v26 = vld [vmem:[%s2612_s12 + $0x54] sm:$0xff] }
  0x84   : > { %2172 = vmatmul.msk.bf16.gmra.mxu1 %vm805_vm1, %v2260_v17  ;;  %v1337_v17 = vpack.c.b16 %v1311_v8, %v1310_v7  ;;  %v1234_v44 = vsel %vm2619_vm6, %v1232_v35, %v1233_v37  ;;  %v523_v46 = vrot.slane %v522_v38, 4  ;;  %v1312_v50 = vunpack.c.l.b16 %v1231_v43  ;;  %v343_v35 = vld [vmem:[%s2612_s12 + $0x60] sm:$0xf]  ;;  %v344_v37 = vld [vmem:[%s2612_s12 + $0x64] sm:$0xf] }
  0x85   : > { %2103 = vmatmul.msk.bf16.gmra.mxu3 %vm805_vm1, %v804_v18  ;;  %v767_v18 = vunpack.c.l.b16 %v504_v10  ;;  %v533_v47 = vrot.slane %v532_v39, 4  ;;  %v537_v48 = vrot.slane %v535_v40, 5  ;;  %v1313_v51 = vunpack.c.l.b16 %v1234_v44 }
  0x86   : > { %v543_v53 = vshll.u32 %v340_v45, 16  ;;  %v553_v4 = vshrl.u32 %v341_v49, 16  ;;  %v528_v55 = vsel %vm2641_vm7, %v523_v46, %v527_v31  ;;  %v542_v61 = vrot.slane %v540_v52, 4 }
  0x87   : > { %v794_v33 = vpack.c.b16 %v768_v23, %v767_v18  ;;  %v538_v56 = vsel %vm2641_vm7, %v533_v47, %v537_v48  ;;  %v1338_v59 = vpack.c.b16 %v1313_v51, %v1312_v50  ;;  %v769_v1 = vunpack.c.l.b16 %v528_v55  ;;  %v345_v51 = vld [vmem:[%s2612_s12 + $0x68] sm:$0x1] }
  0x88   : > { %v545_v62 = vrot.slane %v543_v53, 5  ;;  %v770_v2 = vunpack.c.l.b16 %v538_v56  ;;  %v555_v7 = vrot.slane %v553_v4, 4  ;;  %v2196_v8 = vrot.slane %v2625_v20, 9 }
  0x89   : > { %v1275_v10 = vrot.slane %v2633_v30, 5  ;;  %v2191_v12 = vrot.slane %v340_v45, 9  ;;  %v1240_v14 = vrot.slane %v342_v3, 5  ;;  %v559_v18 = vshll.u32 %v342_v3, 16 }
  0x8a   : > { %v546_v15 = vor.u32 %v545_v62, %v542_v61  ;;  %v795_v16 = vpack.c.b16 %v770_v2, %v769_v1  ;;  %v564_v43 = vshrl.u32 %v343_v35, 16  ;;  %v567_v44 = vshll.u32 %v343_v35, 16  ;;  %v2264_v1 = vld [vmem:[%s2612_s12 + $0x60] sm:$0xff]  ;;  %v2271_v2 = vld [vmem:[%s2612_s12 + $0xb4] sm:$0xff] }
  0x8b   : > { %v561_v32 = vrot.slane %v559_v18, 5  ;;  %v573_v45 = vshll.u32 %v344_v37, 16  ;;  %v577_v46 = vshrl.u32 %v344_v37, 16  ;;  %v1244_v50 = vrot.slane %v344_v37, 5 }
  0x8c   : > { %v547_v30 = vrot.slane %v546_v15, 4  ;;  %v566_v52 = vrot.slane %v564_v43, 4  ;;  %v569_v53 = vrot.slane %v567_v44, 5  ;;  %v2192_v56 = vrot.slane %v343_v35, 9 }
  0x8d   : > { %2205 = vmatmul.msk.bf16.gmra.mxu2 %vm805_vm1, %v1336_v42  ;;  %v2269_v42 = vld [vmem:[%s2612_s12 + $0x9c] sm:$0xff]  ;;  %v579_v4 = vrot.slane %v577_v46, 4  ;;  %v583_v62 = vshll.u32 %v345_v51, 16 }
  0x92   : > { %2092 = vmatmul.msk.bf16.gmra.mxu0 %vm805_vm1, %v793_v54  ;;  %v549_v54 = vshll.u32 %v341_v49, 16 }
  0x94   : > { %2173 = vmatmul.msk.bf16.gmra.mxu1 %vm805_vm1, %v2261_v57  ;;  %v1272_v57 = vrot.slane %v2630_v25, 5  ;;  %v551_v5 = vrot.slane %v549_v54, 5  ;;  %v575_v54 = vrot.slane %v573_v45, 5 }
  0x95   : > { %2180 = vmatmul.msk.bf16.vlgmr.msrb.gmra.mxu3 %vm805_vm1, %v2268_v60  ;;  %v1237_v60 = vrot.slane %v341_v49, 5 }
  0x96   : > { %v1274_v13 = vrot.slane %v1272_v57, 4  ;;  %v1273_v27 = vsel %vm2619_vm6, %v2196_v8, %v1272_v57  ;;  %v1246_v57 = vrot.slane %v1244_v50, 4  ;;  %v580_v61 = vor.u32 %v579_v4, %v575_v54  ;;  %v346_v8 = vld [vmem:[%s2612_s12 + $0x6c] sm:$0xf] }
  0x97   : > { %v1239_v25 = vrot.slane %v1237_v60, 4  ;;  %v1238_v23 = vsel %vm2619_vm6, %v2191_v12, %v1237_v60  ;;  %v570_v60 = vor.u32 %v569_v53, %v566_v52  ;;  %v1520_v52 = vld [vmem:[#allocation2 + $0xb0] sm:$0xff] }
  0x98   : > { %v1276_v28 = vsel %vm2619_vm6, %v1274_v13, %v1275_v10  ;;  %v1314_v39 = vunpack.c.l.b16 %v1238_v23  ;;  %v581_v12 = vrot.slane %v580_v61, 4  ;;  %v585_v13 = vrot.slane %v583_v62, 5  ;;  %v2265_v53 = vld [vmem:[%s2612_s12 + $0x6c] sm:$0xff]  ;;  %v350_v62 = vld [vmem:[%s2612_s12 + $0x7c] sm:$0xf] }
  0x99   : > { %v1241_v20 = vsel %vm2619_vm6, %v1239_v25, %v1240_v14  ;;  %v1325_v34 = vunpack.c.l.b16 %v1276_v28  ;;  %v571_v10 = vrot.slane %v570_v60, 4  ;;  %v347_v25 = vld [vmem:[%s2612_s12 + $0x70] sm:$0xf]  ;;  %v348_v28 = vld [vmem:[%s2612_s12 + $0x74] sm:$0x1] }
  0x9a   : > { %v1315_v40 = vunpack.c.l.b16 %v1241_v20  ;;  %v597_v18 = vshll.u32 %v347_v25, 16  ;;  %v601_v23 = vshrl.u32 %v347_v25, 16  ;;  %v586_v20 = vsel %vm2641_vm7, %v581_v12, %v585_v13 }
  0x9b   : > { %v607_v45 = vshll.u32 %v348_v28, 16  ;;  %v621_v12 = vshll.u32 %v350_v62, 16 }
  0x9c   : > { %v1339_v47 = vpack.c.b16 %v1315_v40, %v1314_v39  ;;  %v599_v35 = vrot.slane %v597_v18, 5  ;;  %v603_v37 = vrot.slane %v601_v23, 4  ;;  %v2193_v39 = vrot.slane %v346_v8, 9 }
  0x9d   : > { %2206 = vmatmul.msk.bf16.gmra.mxu2 %vm805_vm1, %v1337_v17  ;;  %v556_v17 = vor.u32 %v555_v7, %v551_v5 }
  0x9e   : > { %v604_v44 = vor.u32 %v603_v37, %v599_v35 }
  0x9f   : > { %v557_v31 = vrot.slane %v556_v17, 4  ;;  %v591_v17 = vshll.u32 %v346_v8, 16 }
  0xa2   : > { %2093 = vmatmul.msk.bf16.gmra.mxu0 %vm805_vm1, %v794_v33  ;;  %v1324_v33 = vunpack.c.l.b16 %v1273_v27 }
  0xa4   : > { %2174 = vmatmul.msk.bf16.gmra.mxu1 %vm805_vm1, %v2262_v41  ;;  %v2829_v38 = vpack.c.b16 %v1325_v34, %v1324_v33  ;;  %v552_v41 = vsel %vm2641_vm7, %v547_v30, %v551_v5  ;;  %v1245_v5 = vsel %vm2619_vm6, %v2192_v56, %v1244_v50  ;;  %v1251_v30 = vrot.slane %v347_v25, 5 }
  0xa5   : > { %2181 = vmatmul.msk.bf16.gmra.mxu3 %vm805_vm1, %v2269_v42  ;;  %v562_v42 = vsel %vm2641_vm7, %v557_v31, %v561_v32  ;;  %v771_v48 = vunpack.c.l.b16 %v552_v41  ;;  %v1316_v14 = vunpack.c.l.b16 %v1245_v5  ;;  %v593_v31 = vrot.slane %v591_v17, 5 }
  0xa6   : > { %v772_v49 = vunpack.c.l.b16 %v562_v42  ;;  %v774_v33 = vunpack.c.l.b16 %v586_v20  ;;  %v1253_v40 = vrot.slane %v1251_v30, 4  ;;  %v1254_v41 = vrot.slane %v348_v28, 5  ;;  %v351_v28 = vld [vmem:[%s2612_s12 + $0x80] sm:$0x1] }
  0xa7   : > { %v605_v56 = vrot.slane %v604_v44, 4  ;;  %v1282_v5 = vrot.slane %v2673_v24, 5  ;;  %v631_v44 = vshll.u32 %v351_v28, 16 }
  0xa8   : > { %v796_v55 = vpack.c.b16 %v772_v49, %v771_v48  ;;  %v1252_v49 = vsel %vm2619_vm6, %v2193_v39, %v1251_v30  ;;  %v1255_v50 = vsel %vm2619_vm6, %v1253_v40, %v1254_v41  ;;  %v1261_v40 = vrot.slane %v351_v28, 5 }
  0xa9   : > { %v1318_v60 = vunpack.c.l.b16 %v1252_v49  ;;  %v1319_v61 = vunpack.c.l.b16 %v1255_v50  ;;  %v1522_v49 = vld [vmem:[#allocation2 + $0xd8] sm:$0xff] }
  0xad   : > { %2207 = vmatmul.msk.bf16.gmra.mxu2 %vm805_vm1, %v1338_v59  ;;  %v1247_v59 = vrot.slane %v345_v51, 5  ;;  %v1279_v51 = vrot.slane %v2670_v19, 5 }
  0xaf   : > { %v1248_v7 = vsel %vm2619_vm6, %v1246_v57, %v1247_v59  ;;  %v609_v57 = vrot.slane %v607_v45, 5  ;;  %v349_v59 = vld [vmem:[%s2612_s12 + $0x78] sm:$0xf] }
  0xb0   : > { %v1317_v15 = vunpack.c.l.b16 %v1248_v7  ;;  %v612_v7 = vshrl.u32 %v349_v59, 16  ;;  %v2194_v37 = vrot.slane %v349_v59, 9 }
  0xb2   : > { %2094 = vmatmul.msk.bf16.gmra.mxu0 %vm805_vm1, %v795_v16  ;;  %v588_v16 = vshrl.u32 %v346_v8, 16  ;;  %v1340_v27 = vpack.c.b16 %v1317_v15, %v1316_v14  ;;  %v610_v8 = vsel %vm2641_vm7, %v605_v56, %v609_v57  ;;  %v1341_v14 = vpack.c.b16 %v1319_v61, %v1318_v60 }
  0xb3   : > { %v776_v23 = vunpack.c.l.b16 %v610_v8  ;;  %v614_v20 = vrot.slane %v612_v7, 4 }
  0xb4   : > { %2175 = vmatmul.msk.bf16.gmra.mxu1 %vm805_vm1, %v2263_v26  ;;  %v576_v26 = vsel %vm2641_vm7, %v571_v10, %v575_v54  ;;  %v615_v10 = vshll.u32 %v349_v59, 16  ;;  %v633_v59 = vrot.slane %v631_v44, 5 }
  0xb5   : > { %2182 = vmatmul.msk.bf16.gmra.mxu3 %vm805_vm1, %v2270_v29  ;;  %v590_v29 = vrot.slane %v588_v16, 4  ;;  %v773_v32 = vunpack.c.l.b16 %v576_v26  ;;  %v1258_v26 = vrot.slane %v350_v62, 5 }
  0xb7   : > { %v594_v42 = vor.u32 %v593_v31, %v590_v29  ;;  %v797_v43 = vpack.c.b16 %v774_v33, %v773_v32  ;;  %v617_v29 = vrot.slane %v615_v10, 5  ;;  %v623_v31 = vrot.slane %v621_v12, 5 }
  0xb8   : > { %v1260_v39 = vrot.slane %v1258_v26, 4 }
  0xb9   : > { %v595_v54 = vrot.slane %v594_v42, 4  ;;  %v618_v42 = vor.u32 %v617_v29, %v614_v20 }
  0xbb   : > { %v600_v19 = vsel %vm2641_vm7, %v595_v54, %v599_v35  ;;  %v1286_v54 = vrot.slane %v2699_v6, 5  ;;  %v619_v56 = vrot.slane %v618_v42, 4 }
  0xbc   : > { %v775_v18 = vunpack.c.l.b16 %v600_v19  ;;  %v1289_v19 = vrot.slane %v2708_v21, 5  ;;  %v1523_v21 = vld [vmem:[#allocation2 + $0x18] sm:$0xff] }
  0xbd   : > { %2208 = vmatmul.msk.bf16.gmra.mxu2 %vm805_vm1, %v1339_v47  ;;  %v624_v6 = vsel %vm2641_vm7, %v619_v56, %v623_v31 }
  0xbe   : > { %v798_v41 = vpack.c.b16 %v776_v23, %v775_v18  ;;  %v777_v18 = vunpack.c.l.b16 %v624_v6 }
  0xc1   : > { %v1087_v3 = vpop.f32.mrf.mxu1 }
  0xc2   : > { %2095 = vmatmul.msk.bf16.gmra.mxu0 %vm805_vm1, %v796_v55 }
  0xc4   : > { %2176 = vmatmul.msk.bf16.gmra.mxu1 %vm805_vm1, %v2264_v1 }
  0xc5   : > { %2183 = vmatmul.msk.bf16.gmra.mxu3 %vm805_vm1, %v2271_v2  ;;  %v2197_v2 = vrot.slane %v2664_v9, 9  ;;  %v625_v9 = vshrl.u32 %v350_v62, 16  ;;  %v352_v62 = vld [vmem:[%s2612_s12 + $0x84] sm:$0xf] }
  0xc6   : > { %v636_v10 = vshrl.u32 %v352_v62, 16  ;;  %v639_v12 = vshll.u32 %v352_v62, 16 }
  0xc7   : > { %v1280_v15 = vsel %vm2619_vm6, %v2197_v2, %v1279_v51  ;;  %v627_v32 = vrot.slane %v625_v9, 4 }
  0xc8   : > { %v638_v28 = vrot.slane %v636_v10, 4  ;;  %v641_v29 = vrot.slane %v639_v12, 5  ;;  %v1525_v10 = vld [vmem:[#allocation2 + $0x68] sm:$0xff] }
  0xc9   : > { %v1089_v34 = vpop.f32.mrf.mxu1 }
  0xca   : > { %v642_v42 = vor.u32 %v641_v29, %v638_v28 }
  0xcc   : > { %v643_v56 = vrot.slane %v642_v42, 4 }
  0xcd   : > { %2209 = vmatmul.msk.bf16.gmra.mxu2 %vm805_vm1, %v1340_v27 }
  0xcf   : > { %v867_v46 = vpop.f32.mrf.mxu0 }
  0xd0   : > { %v1088_v47 = vadd.f32 %v1087_v3, %v867_v46  ;;  %v1408_v48 = vpop.f32.mrf.mxu2  ;;  %v1281_v3 = vrot.slane %v1279_v51, 4  ;;  %v2266_v51 = vld [vmem:[%s2612_s12 + $0x78] sm:$0xff] }
  0xd1   : > { %v1092_v55 = vpop.f32.mrf.mxu1 }
  0xd2   : > { %v1488_v4 = vadd.f32 %v1408_v48, %v1088_v47  ;;  %2096 = vmatmul.msk.bf16.gmra.mxu0 %vm805_vm1, %v797_v43  ;;  %v1283_v16 = vsel %vm2619_vm6, %v1281_v3, %v1282_v5  ;;  %v628_v43 = vor.u32 %v627_v32, %v623_v31  ;;  %v2198_v3 = vrot.slane %v2696_v0, 9 }
  0xd3   : > { %v1327_v35 = vunpack.c.l.b16 %v1283_v16  ;;  %v1288_v5 = vrot.slane %v1286_v54, 4 }
  0xd4   : > { %v1552_v1 = vadd.f32 %v1520_v52, %v1488_v4  ;;  %2177 = vmatmul.msk.bf16.gmra.mxu1 %vm805_vm1, %v2265_v53  ;;  %v1259_v52 = vsel %vm2619_vm6, %v2194_v37, %v1258_v26  ;;  %v1262_v53 = vsel %vm2619_vm6, %v1260_v39, %v1261_v40  ;;  %v629_v57 = vrot.slane %v628_v43, 4 }
  0xd5   : > { %2213 = vmatmul.msk.bf16.vlgmr.msra.gmra.mxu3 %vm805_vm1, %v2829_v38  ;;  %v1521_v38 = vld [vmem:[#allocation2] sm:$0xff]  ;;  %v1320_v61 = vunpack.c.l.b16 %v1259_v52  ;;  %v1321_v2 = vunpack.c.l.b16 %v1262_v53  ;;  %v1290_v16 = vsel %vm2619_vm6, %v1288_v5, %v1289_v19  ;;  %v2195_v37 = vrot.slane %v352_v62, 9 }
  0xd6   : > { %1584 = vst [vmem:[#allocation2 + $0xb0] sm:$0xff] %v1552_v1  ;;  %v353_v1 = vld [vmem:[%s2612_s12 + $0x88] sm:$0xf]  ;;  %v634_v7 = vsel %vm2641_vm7, %v629_v57, %v633_v59 }
  0xd7   : > { %v869_v13 = vpop.f32.mrf.mxu0  ;;  %v645_v9 = vshll.u32 %v353_v1, 16  ;;  %v778_v23 = vunpack.c.l.b16 %v634_v7  ;;  %v1265_v20 = vrot.slane %v353_v1, 5 }
  0xd8   : > { %v1090_v25 = vadd.f32 %v1089_v34, %v869_v13  ;;  %v1410_v24 = vpop.f32.mrf.mxu2  ;;  %v2878_v17 = vpop.f32.mrf.mxu3  ;;  %v1326_v34 = vunpack.c.l.b16 %v1280_v15  ;;  %v649_v13 = vshrl.u32 %v353_v1, 16  ;;  %v1287_v15 = vsel %vm2619_vm6, %v2198_v3, %v1286_v54 }
  0xd9   : > { %v1094_v27 = vpop.f32.mrf.mxu1  ;;  %v1267_v39 = vrot.slane %v1265_v20, 4  ;;  %v1266_v54 = vsel %vm2619_vm6, %v2195_v37, %v1265_v20  ;;  %v2199_v1 = vrot.slane %v2729_v58, 9 }
  0xda   : > { %v1489_v30 = vadd.f32 %v1410_v24, %v1090_v25  ;;  %v1345_v50 = vpack.c.b16 %v1327_v35, %v1326_v34  ;;  %v651_v31 = vrot.slane %v649_v13, 4  ;;  %v1329_v34 = vunpack.c.l.b16 %v1290_v16 }
  0xdb   : > { %v799_v35 = vpack.c.b16 %v778_v23, %v777_v18 }
  0xdc   : > { %v1553_v33 = vadd.f32 %v1521_v38, %v1489_v30  ;;  %v354_v30 = vld [vmem:[%s2612_s12 + $0x8c] sm:$0x1] }
  0xdd   : > { %2210 = vmatmul.msk.bf16.gmra.mxu2 %vm805_vm1, %v1341_v14  ;;  %v1342_v14 = vpack.c.b16 %v1321_v2, %v1320_v61  ;;  %v1268_v40 = vrot.slane %v354_v30, 5  ;;  %v655_v44 = vshll.u32 %v354_v30, 16  ;;  %v1322_v61 = vunpack.c.l.b16 %v1266_v54 }
  0xde   : > { %1585 = vst [vmem:[#allocation2] sm:$0xff] %v1553_v33  ;;  %v1328_v33 = vunpack.c.l.b16 %v1287_v15 }
  0xdf   : > { %v872_v45 = vpop.f32.mrf.mxu0  ;;  %v657_v59 = vrot.slane %v655_v44, 5 }
  0xe0   : > { %v1093_v46 = vadd.f32 %v1092_v55, %v872_v45  ;;  %v1413_v47 = vpop.f32.mrf.mxu2  ;;  %v2882_v48 = vpop.f32.mrf.mxu3  ;;  %v1346_v52 = vpack.c.b16 %v1329_v34, %v1328_v33  ;;  %v1527_v33 = vld [vmem:[#allocation2 + $0x48] sm:$0xff] }
  0xe1   : > { %v1097_v55 = vpop.f32.mrf.mxu1 }
  0xe2   : > { %v1490_v4 = vadd.f32 %v1413_v47, %v1093_v46  ;;  %2097 = vmatmul.msk.bf16.gmra.mxu0 %vm805_vm1, %v798_v41 }
  0xe4   : > { %v1554_v60 = vadd.f32 %v1522_v49, %v1490_v4  ;;  %2178 = vmatmul.msk.bf16.gmra.mxu1 %vm805_vm1, %v2266_v51  ;;  %v1524_v49 = vld [vmem:[#allocation2 + $0x50] sm:$0xff]  ;;  %v1269_v4 = vsel %vm2619_vm6, %v1267_v39, %v1268_v40 }
  0xe5   : > { %2214 = vmatmul.msk.bf16.gmra.mxu3 %vm805_vm1, %v1345_v50  ;;  %v2267_v50 = vld [vmem:[%s2612_s12 + $0x84] sm:$0xff]  ;;  %v1323_v62 = vunpack.c.l.b16 %v1269_v4 }
  0xe6   : > { %1586 = vst [vmem:[#allocation2 + $0xd8] sm:$0xff] %v1554_v60 }
  0xe7   : > { %v874_v8 = vpop.f32.mrf.mxu0  ;;  %v1343_v12 = vpack.c.b16 %v1323_v62, %v1322_v61  ;;  %v1530_v61 = vld [vmem:[#allocation2 + $0xe8] sm:$0xff] }
  0xe8   : > { %v1095_v25 = vadd.f32 %v1094_v27, %v874_v8  ;;  %v1415_v0 = vpop.f32.mrf.mxu2  ;;  %v2901_v24 = vpop.f32.mrf.mxu3  ;;  %v647_v27 = vrot.slane %v645_v9, 5 }
  0xe9   : > { %v1099_v26 = vpop.f32.mrf.mxu1 }
  0xea   : > { %v1491_v38 = vadd.f32 %v1415_v0, %v1095_v25  ;;  %v652_v43 = vor.u32 %v651_v31, %v647_v27  ;;  %v648_v3 = vsel %vm2641_vm7, %v643_v56, %v647_v27 }
  0xeb   : > { %v779_v13 = vunpack.c.l.b16 %v648_v3 }
  0xec   : > { %v1555_v32 = vadd.f32 %v1523_v21, %v1491_v38  ;;  %v653_v57 = vrot.slane %v652_v43, 4  ;;  %v1528_v43 = vld [vmem:[#allocation2 + $0x80] sm:$0xff] }
  0xed   : > { %2211 = vmatmul.msk.bf16.gmra.mxu2 %vm805_vm1, %v1342_v14 }
  0xee   : > { %1587 = vst [vmem:[#allocation2 + $0x18] sm:$0xff] %v1555_v32  ;;  %v658_v5 = vsel %vm2641_vm7, %v653_v57, %v657_v59 }
  0xef   : > { %v877_v41 = vpop.f32.mrf.mxu0  ;;  %v780_v25 = vunpack.c.l.b16 %v658_v5 }
  0xf0   : > { %v1098_v45 = vadd.f32 %v1097_v55, %v877_v41  ;;  %v1418_v46 = vpop.f32.mrf.mxu2  ;;  %v2909_v47 = vpop.f32.mrf.mxu3  ;;  %v1293_v55 = vrot.slane %v2732_v63, 5  ;;  %v1296_v63 = vrot.slane %v2740_v22, 5 }
  0xf1   : > { %v1102_v53 = vpop.f32.mrf.mxu1  ;;  %v800_v22 = vpack.c.b16 %v780_v25, %v779_v13 }
  0xf2   : > { %v1492_v51 = vadd.f32 %v1418_v46, %v1098_v45  ;;  %2098 = vmatmul.msk.bf16.gmra.mxu0 %vm805_vm1, %v799_v35  ;;  %v1295_v19 = vrot.slane %v1293_v55, 4  ;;  %v1294_v0 = vsel %vm2619_vm6, %v2199_v1, %v1293_v55 }
  0xf3   : > { %v1330_v14 = vunpack.c.l.b16 %v1294_v0  ;;  %v1532_v0 = vld [vmem:[#allocation2 + $0x60] sm:$0xff] }
  0xf4   : > { %v1556_v60 = vadd.f32 %v1524_v49, %v1492_v51  ;;  %2179 = vmatmul.msk.bf16.gmra.mxu1 %vm805_vm1, %v2267_v50  ;;  %v1297_v36 = vsel %vm2619_vm6, %v1295_v19, %v1296_v63 }
  0xf5   : > { %2215 = vmatmul.msk.bf16.gmra.mxu3 %vm805_vm1, %v1346_v52  ;;  %v1331_v15 = vunpack.c.l.b16 %v1297_v36 }
  0xf6   : > { %1588 = vst [vmem:[#allocation2 + $0x50] sm:$0xff] %v1556_v60 }
  0xf7   : > { %v879_v2 = vpop.f32.mrf.mxu0  ;;  %v1347_v30 = vpack.c.b16 %v1331_v15, %v1330_v14 }
  0xf8   : > { %v1100_v6 = vadd.f32 %v1099_v26, %v879_v2  ;;  %v1420_v7 = vpop.f32.mrf.mxu2  ;;  %v2926_v8 = vpop.f32.mrf.mxu3  ;;  %v1526_v26 = vld [vmem:[#allocation2 + $0x30] sm:$0xff] }
  0xf9   : > { %v1104_v58 = vpop.f32.mrf.mxu1 }
  0xfa   : > { %v1493_v9 = vadd.f32 %v1420_v7, %v1100_v6  ;;  %v1531_v6 = vld [vmem:[#allocation2 + $0xb8] sm:$0xff] }
  0xfc   : > { %v1557_v21 = vadd.f32 %v1525_v10, %v1493_v9 }
  0xfd   : > { %2212 = vmatmul.msk.bf16.gmra.mxu2 %vm805_vm1, %v1343_v12 }
  0xfe   : > { %1589 = vst [vmem:[#allocation2 + $0x68] sm:$0xff] %v1557_v21 }
  0xff   : > { %v882_v16 = vpop.f32.mrf.mxu0 }
 0x100   : > { %v1103_v38 = vadd.f32 %v1102_v53, %v882_v16  ;;  %v1423_v18 = vpop.f32.mrf.mxu2  ;;  %v2933_v23 = vpop.f32.mrf.mxu3  ;;  %v1529_v53 = vld [vmem:[#allocation2 + $0x88] sm:$0xff] }
 0x101   : > { %v1107_v28 = vpop.f32.mrf.mxu1 }
 0x102   : > { %v1494_v20 = vadd.f32 %v1423_v18, %v1103_v38  ;;  %2099 = vmatmul.msk.bf16.gmra.mxu0 %vm805_vm1, %v800_v22  ;;  %v1533_v18 = vld [vmem:[#allocation2 + $0xf0] sm:$0xff] }
 0x104   : > { %v1558_v11 = vadd.f32 %v1526_v26, %v1494_v20 }
 0x105   : > { %2216 = vmatmul.msk.bf16.gmra.mxu3 %vm805_vm1, %v1347_v30 }
 0x106   : > { %1590 = vst [vmem:[#allocation2 + $0x30] sm:$0xff] %v1558_v11 }
 0x107   : > { %v884_v29 = vpop.f32.mrf.mxu0 }
 0x108   : > { %v1105_v27 = vadd.f32 %v1104_v58, %v884_v29  ;;  %v1425_v31 = vpop.f32.mrf.mxu2  ;;  %v2937_v32 = vpop.f32.mrf.mxu3 }
 0x109   : > { %v1109_v35 = vpop.f32.mrf.mxu1 }
 0x10a   : > { %v1495_v34 = vadd.f32 %v1425_v31, %v1105_v27  ;;  %v1534_v31 = vld [vmem:[#allocation2 + $0x8] sm:$0xff] }
 0x10c   : > { %v1559_v37 = vadd.f32 %v1527_v33, %v1495_v34 }
 0x10e   : > { %1591 = vst [vmem:[#allocation2 + $0x48] sm:$0xff] %v1559_v37 }
 0x10f   : > { %v887_v39 = vpop.f32.mrf.mxu0 }
 0x110   : > { %v1108_v40 = vadd.f32 %v1107_v28, %v887_v39  ;;  %v1428_v41 = vpop.f32.mrf.mxu2  ;;  %v2939_v42 = vpop.f32.mrf.mxu3 }
 0x111   : > { %v1112_v45 = vpop.f32.mrf.mxu1 }
 0x112   : > { %v1496_v44 = vadd.f32 %v1428_v41, %v1108_v40 }
 0x114   : > { %v1560_v46 = vadd.f32 %v1528_v43, %v1496_v44  ;;  %v1535_v43 = vld [vmem:[#allocation2 + $0x78] sm:$0xff] }
 0x116   : > { %1592 = vst [vmem:[#allocation2 + $0x80] sm:$0xff] %v1560_v46 }
 0x117   : > { %v889_v49 = vpop.f32.mrf.mxu0 }
 0x118   : > { %v1110_v50 = vadd.f32 %v1109_v35, %v889_v49  ;;  %v1430_v51 = vpop.f32.mrf.mxu2  ;;  %v2941_v52 = vpop.f32.mrf.mxu3 }
 0x119   : > { %v1114_v4 = vpop.f32.mrf.mxu1 }
 0x11a   : > { %v1497_v54 = vadd.f32 %v1430_v51, %v1110_v50 }
 0x11c   : > { %v1561_v56 = vadd.f32 %v1529_v53, %v1497_v54  ;;  %v1536_v54 = vld [vmem:[#allocation2 + $0x38] sm:$0xff] }
 0x11e   : > { %1593 = vst [vmem:[#allocation2 + $0x88] sm:$0xff] %v1561_v56 }
 0x11f   : > { %v892_v57 = vpop.f32.mrf.mxu0 }
 0x120   : > { %v1113_v59 = vadd.f32 %v1112_v45, %v892_v57  ;;  %v1433_v55 = vpop.f32.mrf.mxu2  ;;  %v2943_v60 = vpop.f32.mrf.mxu3 }
 0x121   : > { %v1117_v1 = vpop.f32.mrf.mxu1 }
 0x122   : > { %v1498_v62 = vadd.f32 %v1433_v55, %v1113_v59  ;;  %v1148_v55 = vadd.f32 %v2941_v52, %v2878_v17  ;;  %v1545_v17 = vld [vmem:[#allocation2 + $0xd0] sm:$0xff]  ;;  %v1538_v52 = vld [vmem:[#allocation2 + $0x40] sm:$0xff] }
 0x124   : > { %v1562_v2 = vadd.f32 %v1530_v61, %v1498_v62 }
 0x126   : > { %1594 = vst [vmem:[#allocation2 + $0xe8] sm:$0xff] %v1562_v2  ;;  %v1544_v2 = vld [vmem:[#allocation2 + $0xa8] sm:$0xff] }
 0x127   : > { %v894_v3 = vpop.f32.mrf.mxu0 }
 0x128   : > { %v1115_v5 = vadd.f32 %v1114_v4, %v894_v3  ;;  %v1435_v19 = vpop.f32.mrf.mxu2  ;;  %v2945_v63 = vpop.f32.mrf.mxu3  ;;  %v1537_v3 = vld [vmem:[#allocation2 + $0x58] sm:$0xff] }
 0x129   : > { %v1119_v10 = vpop.f32.mrf.mxu1 }
 0x12a   : > { %v1499_v7 = vadd.f32 %v1435_v19, %v1115_v5 }
 0x12c   : > { %v1563_v12 = vadd.f32 %v1531_v6, %v1499_v7 }
 0x12e   : > { %1595 = vst [vmem:[#allocation2 + $0xb8] sm:$0xff] %v1563_v12 }
 0x12f   : > { %v897_v9 = vpop.f32.mrf.mxu0 }
 0x130   : > { %v1118_v13 = vadd.f32 %v1117_v1, %v897_v9  ;;  %v1438_v25 = vpop.f32.mrf.mxu2  ;;  %v2947_v58 = vpop.f32.mrf.mxu3  ;;  %v1150_v9 = vadd.f32 %v2943_v60, %v2882_v48  ;;  %v1539_v48 = vld [vmem:[#allocation2 + $0xc8] sm:$0xff] }
 0x131   : > { %v1122_v21 = vpop.f32.mrf.mxu1 }
 0x132   : > { %v1500_v36 = vadd.f32 %v1438_v25, %v1118_v13 }
 0x134   : > { %v1564_v22 = vadd.f32 %v1532_v0, %v1500_v36 }
 0x136   : > { %1596 = vst [vmem:[#allocation2 + $0x60] sm:$0xff] %v1564_v22 }
 0x137   : > { %v899_v14 = vpop.f32.mrf.mxu0 }
 0x138   : > { %v1120_v15 = vadd.f32 %v1119_v10, %v899_v14  ;;  %v1440_v16 = vpop.f32.mrf.mxu2  ;;  %v2949_v38 = vpop.f32.mrf.mxu3 }
 0x139   : > { %v1124_v20 = vpop.f32.mrf.mxu1 }
 0x13a   : > { %v1501_v26 = vadd.f32 %v1440_v16, %v1120_v15  ;;  %v1153_v16 = vadd.f32 %v2945_v63, %v2901_v24  ;;  %v1547_v24 = vld [vmem:[#allocation2 + $0x28] sm:$0xff]  ;;  %v1540_v63 = vld [vmem:[#allocation2 + $0xe0] sm:$0xff] }
 0x13c   : > { %v1565_v30 = vadd.f32 %v1533_v18, %v1501_v26 }
 0x13e   : > { %1597 = vst [vmem:[#allocation2 + $0xf0] sm:$0xff] %v1565_v30  ;;  %v1546_v30 = vld [vmem:[#allocation2 + $0x10] sm:$0xff] }
 0x13f   : > { %v902_v28 = vpop.f32.mrf.mxu0 }
 0x140   : > { %v1123_v11 = vadd.f32 %v1122_v21, %v902_v28  ;;  %v1443_v29 = vpop.f32.mrf.mxu2  ;;  %v2951_v27 = vpop.f32.mrf.mxu3 }
 0x141   : > { %v1127_v34 = vpop.f32.mrf.mxu1 }
 0x142   : > { %v1502_v33 = vadd.f32 %v1443_v29, %v1123_v11 }
 0x144   : > { %v1566_v35 = vadd.f32 %v1534_v31, %v1502_v33 }
 0x146   : > { %1598 = vst [vmem:[#allocation2 + $0x8] sm:$0xff] %v1566_v35 }
 0x147   : > { %v904_v37 = vpop.f32.mrf.mxu0 }
 0x148   : > { %v1125_v39 = vadd.f32 %v1124_v20, %v904_v37  ;;  %v1445_v40 = vpop.f32.mrf.mxu2  ;;  %v2953_v41 = vpop.f32.mrf.mxu3 }
 0x149   : > { %v1129_v45 = vpop.f32.mrf.mxu1 }
 0x14a   : > { %v1503_v44 = vadd.f32 %v1445_v40, %v1125_v39 }
 0x14c   : > { %v1567_v46 = vadd.f32 %v1535_v43, %v1503_v44 }
 0x14e   : > { %1599 = vst [vmem:[#allocation2 + $0x78] sm:$0xff] %v1567_v46 }
 0x14f   : > { %v907_v49 = vpop.f32.mrf.mxu0 }
 0x150   : > { %v1128_v50 = vadd.f32 %v1127_v34, %v907_v49  ;;  %v1448_v51 = vpop.f32.mrf.mxu2  ;;  %v2955_v53 = vpop.f32.mrf.mxu3  ;;  %v1155_v34 = vadd.f32 %v2947_v58, %v2909_v47  ;;  %v1548_v47 = vld [vmem:[#allocation2 + $0xa0] sm:$0xff]  ;;  %v1541_v58 = vld [vmem:[#allocation2 + $0x90] sm:$0xff] }
 0x151   : > { %v1132_v57 = vpop.f32.mrf.mxu1 }
 0x152   : > { %v1504_v4 = vadd.f32 %v1448_v51, %v1128_v50  ;;  %v1158_v50 = vadd.f32 %v2949_v38, %v2926_v8  ;;  %v1549_v8 = vld [vmem:[#allocation2 + $0xf8] sm:$0xff]  ;;  %v1542_v38 = vld [vmem:[#allocation2 + $0x70] sm:$0xff] }
 0x154   : > { %v1568_v56 = vadd.f32 %v1536_v54, %v1504_v4 }
 0x156   : > { %1600 = vst [vmem:[#allocation2 + $0x38] sm:$0xff] %v1568_v56 }
 0x157   : > { %v909_v59 = vpop.f32.mrf.mxu0 }
 0x158   : > { %v1130_v61 = vadd.f32 %v1129_v45, %v909_v59  ;;  %v1450_v62 = vpop.f32.mrf.mxu2  ;;  %v1468_v1 = vpop.f32.mrf.mxu3 }
 0x159   : > { %v1512_v5 = vadd.f32 %v1468_v1, %v1148_v55  ;;  %v1134_v12 = vpop.f32.mrf.mxu1  ;;  %v1160_v1 = vadd.f32 %v2951_v27, %v2933_v23  ;;  %v1550_v23 = vld [vmem:[#allocation2 + $0x20] sm:$0xff] }
 0x15a   : > { %v1505_v19 = vadd.f32 %v1450_v62, %v1130_v61  ;;  %v1543_v27 = vld [vmem:[#allocation2 + $0xc0] sm:$0xff] }
 0x15b   : > { %v1576_v6 = vadd.f32 %v1544_v2, %v1512_v5 }
 0x15c   : > { %v1569_v7 = vadd.f32 %v1537_v3, %v1505_v19 }
 0x15d   : > { %1608 = vst [vmem:[#allocation2 + $0xa8] sm:$0xff] %v1576_v6 }
 0x15e   : > { %1601 = vst [vmem:[#allocation2 + $0x58] sm:$0xff] %v1569_v7 }
 0x15f   : > { %v912_v10 = vpop.f32.mrf.mxu0 }
 0x160   : > { %v1133_v13 = vadd.f32 %v1132_v57, %v912_v10  ;;  %v1453_v25 = vpop.f32.mrf.mxu2  ;;  %v1470_v0 = vpop.f32.mrf.mxu3 }
 0x161   : > { %v1513_v36 = vadd.f32 %v1470_v0, %v1150_v9  ;;  %v1137_v60 = vpop.f32.mrf.mxu1 }
 0x162   : > { %v1506_v21 = vadd.f32 %v1453_v25, %v1133_v13  ;;  %v1163_v13 = vadd.f32 %v2953_v41, %v2937_v32 }
 0x163   : > { %v1577_v22 = vadd.f32 %v1545_v17, %v1513_v36 }
 0x164   : > { %v1570_v14 = vadd.f32 %v1538_v52, %v1506_v21 }
 0x165   : > { %1609 = vst [vmem:[#allocation2 + $0xd0] sm:$0xff] %v1577_v22 }
 0x166   : > { %1602 = vst [vmem:[#allocation2 + $0x40] sm:$0xff] %v1570_v14  ;;  %v1165_v14 = vadd.f32 %v2955_v53, %v2939_v42 }
 0x167   : > { %v914_v15 = vpop.f32.mrf.mxu0 }
 0x168   : > { %v1135_v18 = vadd.f32 %v1134_v12, %v914_v15  ;;  %v1455_v26 = vpop.f32.mrf.mxu2  ;;  %v1473_v20 = vpop.f32.mrf.mxu3 }
 0x169   : > { %v1514_v28 = vadd.f32 %v1473_v20, %v1153_v16  ;;  %v1139_v44 = vpop.f32.mrf.mxu1  ;;  %v1551_v16 = vld [vmem:[#allocation2 + $0x98] sm:$0xff] }
 0x16a   : > { %v1507_v11 = vadd.f32 %v1455_v26, %v1135_v18 }
 0x16b   : > { %v1578_v29 = vadd.f32 %v1546_v30, %v1514_v28 }
 0x16c   : > { %v1571_v31 = vadd.f32 %v1539_v48, %v1507_v11 }
 0x16d   : > { %1610 = vst [vmem:[#allocation2 + $0x10] sm:$0xff] %v1578_v29 }
 0x16e   : > { %1603 = vst [vmem:[#allocation2 + $0xc8] sm:$0xff] %v1571_v31 }
 0x16f   : > { %v917_v33 = vpop.f32.mrf.mxu0 }
 0x170   : > { %v1138_v35 = vadd.f32 %v1137_v60, %v917_v33  ;;  %v1458_v37 = vpop.f32.mrf.mxu2  ;;  %v1475_v39 = vpop.f32.mrf.mxu3 }
 0x171   : > { %v1515_v40 = vadd.f32 %v1475_v39, %v1155_v34  ;;  %v1142_v61 = vpop.f32.mrf.mxu1 }
 0x172   : > { %v1508_v43 = vadd.f32 %v1458_v37, %v1138_v35 }
 0x173   : > { %v1579_v45 = vadd.f32 %v1547_v24, %v1515_v40 }
 0x174   : > { %v1572_v46 = vadd.f32 %v1540_v63, %v1508_v43 }
 0x175   : > { %1611 = vst [vmem:[#allocation2 + $0x28] sm:$0xff] %v1579_v45 }
 0x176   : > { %1604 = vst [vmem:[#allocation2 + $0xe0] sm:$0xff] %v1572_v46 }
 0x177   : > { %v919_v49 = vpop.f32.mrf.mxu0 }
 0x178   : > { %v1140_v51 = vadd.f32 %v1139_v44, %v919_v49  ;;  %v1460_v54 = vpop.f32.mrf.mxu2  ;;  %v1478_v4 = vpop.f32.mrf.mxu3 }
 0x179   : > { %v1516_v56 = vadd.f32 %v1478_v4, %v1158_v50  ;;  %v1144_v12 = vpop.f32.mrf.mxu1 }
 0x17a   : > { %v1509_v57 = vadd.f32 %v1460_v54, %v1140_v51 }
 0x17b   : > { %v1580_v59 = vadd.f32 %v1548_v47, %v1516_v56 }
 0x17c   : > { %v1573_v55 = vadd.f32 %v1541_v58, %v1509_v57 }
 0x17d   : > { %1612 = vst [vmem:[#allocation2 + $0xa0] sm:$0xff] %v1580_v59 }
 0x17e   : > { %1605 = vst [vmem:[#allocation2 + $0x90] sm:$0xff] %v1573_v55 }
 0x17f   : > { %v922_v62 = vpop.f32.mrf.mxu0 }
 0x180   : > { %v1143_v2 = vadd.f32 %v1142_v61, %v922_v62  ;;  %v1463_v3 = vpop.f32.mrf.mxu2  ;;  %v1480_v5 = vpop.f32.mrf.mxu3 }
 0x181   : > { %v1517_v19 = vadd.f32 %v1480_v5, %v1160_v1 }
 0x182   : > { %v1510_v6 = vadd.f32 %v1463_v3, %v1143_v2 }
 0x183   : > { %v1581_v7 = vadd.f32 %v1549_v8, %v1517_v19 }
 0x184   : > { %v1574_v10 = vadd.f32 %v1542_v38, %v1510_v6 }
 0x185   : > { %1613 = vst [vmem:[#allocation2 + $0xf8] sm:$0xff] %v1581_v7 }
 0x186   : > { %1606 = vst [vmem:[#allocation2 + $0x70] sm:$0xff] %v1574_v10 }
 0x187   : > { %v924_v9 = vpop.f32.mrf.mxu0 }
 0x188   : > { %v1145_v25 = vadd.f32 %v1144_v12, %v924_v9  ;;  %v1465_v0 = vpop.f32.mrf.mxu2  ;;  %v1483_v17 = vpop.f32.mrf.mxu3 }
 0x189   : > { %v1518_v52 = vadd.f32 %v1483_v17, %v1163_v13 }
 0x18a   : > { %v1511_v36 = vadd.f32 %v1465_v0, %v1145_v25 }
 0x18b   : > { %v1582_v21 = vadd.f32 %v1550_v23, %v1518_v52 }
 0x18c   : > { %v1575_v22 = vadd.f32 %v1543_v27, %v1511_v36 }
 0x18d   : > { %1614 = vst [vmem:[#allocation2 + $0x20] sm:$0xff] %v1582_v21 }
 0x18e   : > { %1607 = vst [vmem:[#allocation2 + $0xc0] sm:$0xff] %v1575_v22 }
 0x190   : > { %v1485_v15 = vpop.f32.mrf.mxu3 }
 0x191   : > { %v1519_v18 = vadd.f32 %v1485_v15, %v1165_v14  ;;  %1619 = sbr.rel (%p2217_p1) target bundleno = 631 (0x277), region = 48 }
 0x193   : > { %v1583_v26 = vadd.f32 %v1551_v16, %v1519_v18 }
 0x195   : > { %1615 = vst [vmem:[#allocation2 + $0x98] sm:$0xff] %v1583_v26 }
 0x196   : > { %v2279_v32 = vld [vmem:[%s3152_s3 + $0x38] sm:$0xff]  ;;  %v2278_v41 = vld [vmem:[%s3152_s3 + $0x30] sm:$0xff]  ;;  %v2277_v42 = vld [vmem:[%s3152_s3 + $0x28] sm:$0xff] }
 0x197   : > { %1836 = vmatpush.bf16.msra.mxu0 %v2279_v32  ;;  %2284 = vmatpush.bf16.msra.mxu1 %v2279_v32  ;;  %v2276_v53 = vld [vmem:[%s3152_s3 + $0x20] sm:$0xff]  ;;  %v2275_v30 = vld [vmem:[%s3152_s3 + $0x18] sm:$0xff]  ;;  %v1620_v48 = vld [vmem:[#allocation2 + $0xb0] sm:$0xff] }
 0x198   : > { %2285 = vmatpush.bf16.msra.mxu2 %v2279_v32  ;;  %2286 = vmatpush.bf16.msra.mxu3 %v2279_v32  ;;  %v2989_v20 = vld [vmem:[%s3151_s2] ss:$0 sm:$0xff]  ;;  %v1629_v11 = vld [vmem:[#allocation2 + $0x88] sm:$0xff]  ;;  %v1636_v29 = vld [vmem:[#allocation2 + $0x38] sm:$0xff] }
 0x199   : > { %v1621_v60 = vld [vmem:[#allocation2] sm:$0xff]  ;;  %v1637_v31 = vld [vmem:[#allocation2 + $0x58] sm:$0xff]  ;;  %v1644_v33 = vld [vmem:[#allocation2 + $0xa8] sm:$0xff]  ;;  %v1656_v35 = vadd.f32 %v2989_v20, %v1620_v48  ;;  %v1665_v24 = vadd.f32 %v2989_v20, %v1629_v11  ;;  %v1672_v63 = vadd.f32 %v2989_v20, %v1636_v29 }
 0x19a   : > { %v1628_v28 = vld [vmem:[#allocation2 + $0x80] sm:$0xff]  ;;  %v1645_v34 = vld [vmem:[#allocation2 + $0xd0] sm:$0xff]  ;;  %v1657_v37 = vadd.f32 %v2989_v20, %v1621_v60  ;;  %v1673_v43 = vadd.f32 %v2989_v20, %v1637_v31  ;;  %v1680_v44 = vadd.f32 %v2989_v20, %v1644_v33  ;;  %v2273_v46 = vld [vmem:[%s3152_s3 + $0x8] sm:$0xff] }
 0x19b   : > { %1837 = vmatpush.bf16.msra.mxu0 %v2278_v41  ;;  %2287 = vmatpush.bf16.msra.mxu1 %v2278_v41  ;;  %v1664_v39 = vadd.f32 %v2989_v20, %v1628_v28  ;;  %v2274_v40 = vld [vmem:[%s3152_s3 + $0x10] sm:$0xff]  ;;  %v1681_v45 = vadd.f32 %v2989_v20, %v1645_v34  ;;  %v1688_v49 = vmul.f32 0.1, %v1656_v35  ;;  %v1697_v54 = vmul.f32 0.1, %v1665_v24  ;;  %v2272_v1 = vld [vmem:[%s3152_s3] sm:$0xff] }
 0x19c   : > { %2288 = vmatpush.bf16.msra.mxu2 %v2278_v41  ;;  %2289 = vmatpush.bf16.msra.mxu3 %v2278_v41  ;;  %v1689_v50 = vmul.f32 0.1, %v1657_v37  ;;  %v1704_v4 = vmul.f32 0.1, %v1672_v63  ;;  %v1705_v47 = vmul.f32 0.1, %v1673_v43 }
 0x19d   : > { %v1696_v51 = vmul.f32 0.1, %v1664_v39  ;;  %v1712_v58 = vmul.f32 0.1, %v1680_v44  ;;  %v1713_v56 = vmul.f32 0.1, %v1681_v45  ;;  %v1720_v57 = vmax.f32 %v1656_v35, %v1688_v49 }
 0x19e   : > { %v1721_v59 = vmax.f32 %v1657_v37, %v1689_v50  ;;  %v1729_v61 = vmax.f32 %v1665_v24, %v1697_v54  ;;  %v1736_v62 = vmax.f32 %v1672_v63, %v1704_v4  ;;  %v1737_v2 = vmax.f32 %v1673_v43, %v1705_v47  ;;  %v1622_v19 = vld [vmem:[#allocation2 + $0xd8] sm:$0xff]  ;;  %v1630_v12 = vld [vmem:[#allocation2 + $0xe8] sm:$0xff]  ;;  %v1638_v13 = vld [vmem:[#allocation2 + $0x40] sm:$0xff] }
 0x19f   : > { %1838 = vmatpush.bf16.msra.mxu0 %v2277_v42  ;;  %2290 = vmatpush.bf16.msra.mxu1 %v2277_v42  ;;  %v1728_v55 = vmax.f32 %v1664_v39, %v1696_v51  ;;  %v1744_v3 = vmax.f32 %v1680_v44, %v1712_v58  ;;  %v1745_v5 = vmax.f32 %v1681_v45, %v1713_v56  ;;  %v1623_v6 = vld [vmem:[#allocation2 + $0x18] sm:$0xff]  ;;  %v1639_v25 = vld [vmem:[#allocation2 + $0xc8] sm:$0xff]  ;;  %v1646_v0 = vld [vmem:[#allocation2 + $0x10] sm:$0xff] }
 0x1a0   : > { %2291 = vmatpush.bf16.msra.mxu2 %v2277_v42  ;;  %2292 = vmatpush.bf16.msra.mxu3 %v2277_v42  ;;  %v1752_v8 = vpack.c.bf16 %v1721_v59, %v1720_v57  ;;  %v1760_v7 = vpack.c.bf16 %v1737_v2, %v1736_v62  ;;  %v1631_v9 = vld [vmem:[#allocation2 + $0xb8] sm:$0xff]  ;;  %v1647_v17 = vld [vmem:[#allocation2 + $0x28] sm:$0xff]  ;;  %v1658_v23 = vadd.f32 %v2989_v20, %v1622_v19  ;;  %v1624_v39 = vld [vmem:[#allocation2 + $0x50] sm:$0xff] }
 0x1a1   : > { %v1756_v38 = vpack.c.bf16 %v1729_v61, %v1728_v55  ;;  %v1764_v10 = vpack.c.bf16 %v1745_v5, %v1744_v3  ;;  %v1659_v27 = vadd.f32 %v2989_v20, %v1623_v6  ;;  %v1666_v52 = vadd.f32 %v2989_v20, %v1630_v12  ;;  %v1625_v24 = vld [vmem:[#allocation2 + $0x68] sm:$0xff]  ;;  %v1632_v43 = vld [vmem:[#allocation2 + $0x60] sm:$0xff]  ;;  %v1633_v44 = vld [vmem:[#allocation2 + $0xf0] sm:$0xff] }
 0x1a2   : > { %v1667_v36 = vadd.f32 %v2989_v20, %v1631_v9  ;;  %v1674_v21 = vadd.f32 %v2989_v20, %v1638_v13  ;;  %v1675_v22 = vadd.f32 %v2989_v20, %v1639_v25  ;;  %v1682_v14 = vadd.f32 %v2989_v20, %v1646_v0  ;;  %v1640_v45 = vld [vmem:[#allocation2 + $0xe0] sm:$0xff]  ;;  %v1649_v50 = vld [vmem:[#allocation2 + $0xf8] sm:$0xff] }
 0x1a3   : > { %1839 = vmatpush.bf16.msra.mxu0 %v2276_v53  ;;  %2293 = vmatpush.bf16.msra.mxu1 %v2276_v53  ;;  %v1683_v15 = vadd.f32 %v2989_v20, %v1647_v17  ;;  %v1690_v16 = vmul.f32 0.1, %v1658_v23  ;;  %v1691_v18 = vmul.f32 0.1, %v1659_v27  ;;  %v1698_v26 = vmul.f32 0.1, %v1666_v52 }
 0x1a4   : > { %2294 = vmatpush.bf16.msra.mxu2 %v2276_v53  ;;  %2295 = vmatpush.bf16.msra.mxu3 %v2276_v53  ;;  %v1699_v32 = vmul.f32 0.1, %v1667_v36  ;;  %v1706_v41 = vmul.f32 0.1, %v1674_v21  ;;  %v1707_v42 = vmul.f32 0.1, %v1675_v22  ;;  %v1660_v51 = vadd.f32 %v2989_v20, %v1624_v39 }
 0x1a5   : > { %v1714_v53 = vmul.f32 0.1, %v1682_v14  ;;  %v1722_v48 = vmax.f32 %v1658_v23, %v1690_v16  ;;  %v1723_v60 = vmax.f32 %v1659_v27, %v1691_v18  ;;  %v1730_v28 = vmax.f32 %v1666_v52, %v1698_v26  ;;  %v1648_v49 = vld [vmem:[#allocation2 + $0xa0] sm:$0xff]  ;;  %v1626_v17 = vld [vmem:[#allocation2 + $0x30] sm:$0xff]  ;;  %v1627_v23 = vld [vmem:[#allocation2 + $0x48] sm:$0xff] }
 0x1a6   : > { %v1731_v11 = vmax.f32 %v1667_v36, %v1699_v32  ;;  %v1738_v29 = vmax.f32 %v1674_v21, %v1706_v41  ;;  %v1739_v31 = vmax.f32 %v1675_v22, %v1707_v42  ;;  %v1661_v54 = vadd.f32 %v2989_v20, %v1625_v24  ;;  %v1634_v36 = vld [vmem:[#allocation2 + $0x8] sm:$0xff]  ;;  %v1635_v21 = vld [vmem:[#allocation2 + $0x78] sm:$0xff]  ;;  %v1642_v22 = vld [vmem:[#allocation2 + $0x70] sm:$0xff] }
 0x1a7   : > { %1840 = vmatpush.bf16.msra.mxu0 %v2275_v30  ;;  %2296 = vmatpush.bf16.msra.mxu1 %v2275_v30  ;;  %v1746_v33 = vmax.f32 %v1682_v14, %v1714_v53  ;;  %v1753_v35 = vpack.c.bf16 %v1723_v60, %v1722_v48  ;;  %v1668_v4 = vadd.f32 %v2989_v20, %v1632_v43  ;;  %v1692_v55 = vmul.f32 0.1, %v1660_v51  ;;  %v1643_v14 = vld [vmem:[#allocation2 + $0xc0] sm:$0xff]  ;;  %v1651_v16 = vld [vmem:[#allocation2 + $0x98] sm:$0xff] }
 0x1a8   : > { %2297 = vmatpush.bf16.msra.mxu2 %v2275_v30  ;;  %2298 = vmatpush.bf16.msra.mxu3 %v2275_v30  ;;  %v1715_v30 = vmul.f32 0.1, %v1683_v15  ;;  %v1757_v37 = vpack.c.bf16 %v1731_v11, %v1730_v28  ;;  %v1761_v63 = vpack.c.bf16 %v1739_v31, %v1738_v29  ;;  %v1669_v47 = vadd.f32 %v2989_v20, %v1633_v44 }
 0x1a9   : > { %v1676_v58 = vadd.f32 %v2989_v20, %v1640_v45  ;;  %v1684_v57 = vadd.f32 %v2989_v20, %v1648_v49  ;;  %v1685_v59 = vadd.f32 %v2989_v20, %v1649_v50  ;;  %v1693_v61 = vmul.f32 0.1, %v1661_v54 }
 0x1aa   : > { %v1747_v34 = vmax.f32 %v1683_v15, %v1715_v30  ;;  %v1700_v62 = vmul.f32 0.1, %v1668_v4  ;;  %v1650_v15 = vld [vmem:[#allocation2 + $0x20] sm:$0xff]  ;;  %v1662_v18 = vadd.f32 %v2989_v20, %v1626_v17  ;;  %v1663_v26 = vadd.f32 %v2989_v20, %v1627_v23 }
 0x1ab   : > { %1841 = vmatpush.bf16.msra.mxu0 %v2274_v40  ;;  %2299 = vmatpush.bf16.msra.mxu1 %v2274_v40  ;;  %v1708_v2 = vmul.f32 0.1, %v1676_v58  ;;  %v1716_v5 = vmul.f32 0.1, %v1684_v57  ;;  %v1725_v19 = vmax.f32 %v1661_v54, %v1693_v61  ;;  %v1670_v32 = vadd.f32 %v2989_v20, %v1634_v36 }
 0x1ac   : > { %2300 = vmatpush.bf16.msra.mxu2 %v2274_v40  ;;  %2301 = vmatpush.bf16.msra.mxu3 %v2274_v40  ;;  %v1765_v40 = vpack.c.bf16 %v1747_v34, %v1746_v33  ;;  %v1732_v6 = vmax.f32 %v1668_v4, %v1700_v62  ;;  %v1671_v41 = vadd.f32 %v2989_v20, %v1635_v21  ;;  %v1694_v60 = vmul.f32 0.1, %v1662_v18 }
 0x1ad   : > { %v1748_v9 = vmax.f32 %v1684_v57, %v1716_v5  ;;  %v1678_v42 = vadd.f32 %v2989_v20, %v1642_v22  ;;  %v1679_v53 = vadd.f32 %v2989_v20, %v1643_v14  ;;  %v1686_v30 = vadd.f32 %v2989_v20, %v1650_v15 }
 0x1ae   : > { %v1687_v48 = vadd.f32 %v2989_v20, %v1651_v16  ;;  %v1695_v28 = vmul.f32 0.1, %v1663_v26  ;;  %v1702_v11 = vmul.f32 0.1, %v1670_v32  ;;  %v1703_v29 = vmul.f32 0.1, %v1671_v41 }
 0x1af   : > { %1842 = vmatpush.bf16.msra.mxu0 %v2273_v46  ;;  %2302 = vmatpush.bf16.msra.mxu1 %v2273_v46  ;;  %v1710_v31 = vmul.f32 0.1, %v1678_v42  ;;  %v1711_v33 = vmul.f32 0.1, %v1679_v53  ;;  %v1718_v34 = vmul.f32 0.1, %v1686_v30 }
 0x1b0   : > { %2303 = vmatpush.bf16.msra.mxu2 %v2273_v46  ;;  %2304 = vmatpush.bf16.msra.mxu3 %v2273_v46  ;;  %v1641_v46 = vld [vmem:[#allocation2 + $0x90] sm:$0xff]  ;;  %v1727_v39 = vmax.f32 %v1663_v26, %v1695_v28  ;;  %v1734_v24 = vmax.f32 %v1670_v32, %v1702_v11 }
 0x1b1   : > { %v1677_v56 = vadd.f32 %v2989_v20, %v1641_v46  ;;  %v1743_v43 = vmax.f32 %v1679_v53, %v1711_v33  ;;  %v1750_v44 = vmax.f32 %v1686_v30, %v1718_v34 }
 0x1b3   : > { %1843 = vmatpush.bf16.msra.mxu0 %v2272_v1  ;;  %2305 = vmatpush.bf16.msra.mxu1 %v2272_v1  ;;  %v1709_v3 = vmul.f32 0.1, %v1677_v56 }
 0x1b4   : > { %2306 = vmatpush.bf16.msra.mxu2 %v2272_v1  ;;  %2307 = vmatpush.bf16.msra.mxu3 %v2272_v1  ;;  %v1701_v1 = vmul.f32 0.1, %v1669_v47 }
 0x1b5   : > { %v1741_v12 = vmax.f32 %v1677_v56, %v1709_v3 }
 0x1b6   : > { %1844 = vmatmul.bf16.vlgmr.msra.gmra.mxu0 %v1752_v8  ;;  %1864 = vmatmul.bf16.vlgmr.msra.gmra.mxu1 %v1756_v38  ;;  %v1717_v8 = vmul.f32 0.1, %v1685_v59  ;;  %v1724_v38 = vmax.f32 %v1660_v51, %v1692_v55  ;;  %v3038_v51 = vld [vmem:[%s3153_s4] ss:$0 sm:$0xff] }
 0x1b7   : > { %1884 = vmatmul.bf16.vlgmr.msra.gmra.mxu2 %v1760_v7  ;;  %1904 = vmatmul.bf16.vlgmr.msra.gmra.mxu3 %v1764_v10  ;;  %v1733_v7 = vmax.f32 %v1669_v47, %v1701_v1  ;;  %v1740_v10 = vmax.f32 %v1676_v58, %v1708_v2 }
 0x1b8   : > { %v1749_v13 = vmax.f32 %v1685_v59, %v1717_v8  ;;  %v1754_v25 = vpack.c.bf16 %v1725_v19, %v1724_v38 }
 0x1b9   : > { %v1758_v0 = vpack.c.bf16 %v1733_v7, %v1732_v6  ;;  %v1762_v27 = vpack.c.bf16 %v1741_v12, %v1740_v10 }
 0x1ba   : > { %v1766_v52 = vpack.c.bf16 %v1749_v13, %v1748_v9 }
 0x1c6   : > { %1849 = vmatmul.bf16.gmra.mxu0 %v1753_v35  ;;  %1869 = vmatmul.bf16.gmra.mxu1 %v1757_v37  ;;  %v1719_v35 = vmul.f32 0.1, %v1687_v48  ;;  %v1726_v37 = vmax.f32 %v1662_v18, %v1694_v60 }
 0x1c7   : > { %1889 = vmatmul.bf16.gmra.mxu2 %v1761_v63  ;;  %1909 = vmatmul.bf16.gmra.mxu3 %v1765_v40  ;;  %v1735_v63 = vmax.f32 %v1671_v41, %v1703_v29  ;;  %v1742_v40 = vmax.f32 %v1678_v42, %v1710_v31 }
 0x1c8   : > { %v1751_v45 = vmax.f32 %v1687_v48, %v1719_v35  ;;  %v1755_v46 = vpack.c.bf16 %v1727_v39, %v1726_v37 }
 0x1c9   : > { %v1759_v20 = vpack.c.bf16 %v1735_v63, %v1734_v24  ;;  %v1763_v49 = vpack.c.bf16 %v1743_v43, %v1742_v40 }
 0x1ca   : > { %v1767_v50 = vpack.c.bf16 %v1751_v45, %v1750_v44 }
 0x1d6   : > { %1854 = vmatmul.bf16.gmra.mxu0 %v1754_v25  ;;  %1874 = vmatmul.bf16.gmra.mxu1 %v1758_v0 }
 0x1d7   : > { %1894 = vmatmul.bf16.gmra.mxu2 %v1762_v27  ;;  %1914 = vmatmul.bf16.gmra.mxu3 %v1766_v52 }
 0x1e6   : > { %1859 = vmatmul.bf16.gmra.mxu0 %v1755_v46  ;;  %1879 = vmatmul.bf16.gmra.mxu1 %v1759_v20 }
 0x1e7   : > { %1899 = vmatmul.bf16.gmra.mxu2 %v1763_v49  ;;  %1919 = vmatmul.bf16.gmra.mxu3 %v1767_v50 }
 0x233   : > { %v1845_v54 = vpop.f32.mrf.mxu0  ;;  %v1865_v4 = vpop.f32.mrf.mxu1 }
 0x234   : > { %v1846_v47 = vadd.f32 %v3038_v51, %v1845_v54  ;;  %v1866_v58 = vadd.f32 %v3038_v51, %v1865_v4 }
 0x236   : > { %1925 = vst [vmem:[%s2601_s29] sm:$0xff] %v1846_v47 }
 0x237   : > { %1933 = vst [vmem:[%s2601_s29 + $0x40] sm:$0xff] %v1866_v58 }
 0x23a   : > { %v1885_v56 = vpop.f32.mrf.mxu2  ;;  %v1905_v57 = vpop.f32.mrf.mxu3 }
 0x23b   : > { %v1886_v59 = vadd.f32 %v3038_v51, %v1885_v56  ;;  %v1906_v55 = vadd.f32 %v3038_v51, %v1905_v57  ;;  %v1847_v61 = vpop.f32.mrf.mxu0  ;;  %v1867_v62 = vpop.f32.mrf.mxu1 }
 0x23c   : > { %v1848_v1 = vadd.f32 %v3038_v51, %v1847_v61  ;;  %v1868_v2 = vadd.f32 %v3038_v51, %v1867_v62 }
 0x23d   : > { %1941 = vst [vmem:[%s2601_s29 + $0x80] sm:$0xff] %v1886_v59 }
 0x23e   : > { %1949 = vst [vmem:[%s2601_s29 + $0xc0] sm:$0xff] %v1906_v55 }
 0x23f   : > { %1926 = vst [vmem:[%s2601_s29 + $0x8] sm:$0xff] %v1848_v1 }
 0x240   : > { %1934 = vst [vmem:[%s2601_s29 + $0x48] sm:$0xff] %v1868_v2 }
 0x242   : > { %v1887_v3 = vpop.f32.mrf.mxu2  ;;  %v1907_v5 = vpop.f32.mrf.mxu3 }
 0x243   : > { %v1888_v8 = vadd.f32 %v3038_v51, %v1887_v3  ;;  %v1908_v38 = vadd.f32 %v3038_v51, %v1907_v5  ;;  %v1850_v19 = vpop.f32.mrf.mxu0  ;;  %v1870_v6 = vpop.f32.mrf.mxu1 }
 0x244   : > { %v1851_v7 = vadd.f32 %v3038_v51, %v1850_v19  ;;  %v1871_v10 = vadd.f32 %v3038_v51, %v1870_v6 }
 0x245   : > { %1942 = vst [vmem:[%s2601_s29 + $0x88] sm:$0xff] %v1888_v8 }
 0x246   : > { %1950 = vst [vmem:[%s2601_s29 + $0xc8] sm:$0xff] %v1908_v38 }
 0x247   : > { %1927 = vst [vmem:[%s2601_s29 + $0x10] sm:$0xff] %v1851_v7 }
 0x248   : > { %1935 = vst [vmem:[%s2601_s29 + $0x50] sm:$0xff] %v1871_v10 }
 0x24a   : > { %v1890_v12 = vpop.f32.mrf.mxu2  ;;  %v1910_v9 = vpop.f32.mrf.mxu3 }
 0x24b   : > { %v1891_v13 = vadd.f32 %v3038_v51, %v1890_v12  ;;  %v1911_v25 = vadd.f32 %v3038_v51, %v1910_v9  ;;  %v1852_v0 = vpop.f32.mrf.mxu0  ;;  %v1872_v17 = vpop.f32.mrf.mxu1 }
 0x24c   : > { %v1853_v23 = vadd.f32 %v3038_v51, %v1852_v0  ;;  %v1873_v27 = vadd.f32 %v3038_v51, %v1872_v17 }
 0x24d   : > { %1943 = vst [vmem:[%s2601_s29 + $0x90] sm:$0xff] %v1891_v13 }
 0x24e   : > { %1951 = vst [vmem:[%s2601_s29 + $0xd0] sm:$0xff] %v1911_v25 }
 0x24f   : > { %1928 = vst [vmem:[%s2601_s29 + $0x18] sm:$0xff] %v1853_v23 }
 0x250   : > { %1936 = vst [vmem:[%s2601_s29 + $0x58] sm:$0xff] %v1873_v27 }
 0x252   : > { %v1892_v52 = vpop.f32.mrf.mxu2  ;;  %v1912_v36 = vpop.f32.mrf.mxu3 }
 0x253   : > { %v1893_v21 = vadd.f32 %v3038_v51, %v1892_v52  ;;  %v1913_v22 = vadd.f32 %v3038_v51, %v1912_v36  ;;  %v1855_v14 = vpop.f32.mrf.mxu0  ;;  %v1875_v15 = vpop.f32.mrf.mxu1 }
 0x254   : > { %v1856_v16 = vadd.f32 %v3038_v51, %v1855_v14  ;;  %v1876_v18 = vadd.f32 %v3038_v51, %v1875_v15 }
 0x255   : > { %1944 = vst [vmem:[%s2601_s29 + $0x98] sm:$0xff] %v1893_v21 }
 0x256   : > { %1952 = vst [vmem:[%s2601_s29 + $0xd8] sm:$0xff] %v1913_v22 }
 0x257   : > { %1929 = vst [vmem:[%s2601_s29 + $0x20] sm:$0xff] %v1856_v16 }
 0x258   : > { %1937 = vst [vmem:[%s2601_s29 + $0x60] sm:$0xff] %v1876_v18 }
 0x25a   : > { %v1895_v26 = vpop.f32.mrf.mxu2  ;;  %v1915_v32 = vpop.f32.mrf.mxu3 }
 0x25b   : > { %v1896_v41 = vadd.f32 %v3038_v51, %v1895_v26  ;;  %v1916_v42 = vadd.f32 %v3038_v51, %v1915_v32  ;;  %v1857_v53 = vpop.f32.mrf.mxu0  ;;  %v1877_v30 = vpop.f32.mrf.mxu1 }
 0x25c   : > { %v1858_v48 = vadd.f32 %v3038_v51, %v1857_v53  ;;  %v1878_v60 = vadd.f32 %v3038_v51, %v1877_v30 }
 0x25d   : > { %1945 = vst [vmem:[%s2601_s29 + $0xa0] sm:$0xff] %v1896_v41 }
 0x25e   : > { %1953 = vst [vmem:[%s2601_s29 + $0xe0] sm:$0xff] %v1916_v42 }
 0x25f   : > { %1930 = vst [vmem:[%s2601_s29 + $0x28] sm:$0xff] %v1858_v48 }
 0x260   : > { %1938 = vst [vmem:[%s2601_s29 + $0x68] sm:$0xff] %v1878_v60 }
 0x262   : > { %v1897_v28 = vpop.f32.mrf.mxu2  ;;  %v1917_v11 = vpop.f32.mrf.mxu3 }
 0x263   : > { %v1898_v29 = vadd.f32 %v3038_v51, %v1897_v28  ;;  %v1918_v31 = vadd.f32 %v3038_v51, %v1917_v11  ;;  %v1860_v33 = vpop.f32.mrf.mxu0  ;;  %v1880_v34 = vpop.f32.mrf.mxu1 }
 0x264   : > { %v1861_v35 = vadd.f32 %v3038_v51, %v1860_v33  ;;  %v1881_v37 = vadd.f32 %v3038_v51, %v1880_v34 }
 0x265   : > { %1946 = vst [vmem:[%s2601_s29 + $0xa8] sm:$0xff] %v1898_v29 }
 0x266   : > { %1954 = vst [vmem:[%s2601_s29 + $0xe8] sm:$0xff] %v1918_v31 }
 0x267   : > { %1931 = vst [vmem:[%s2601_s29 + $0x30] sm:$0xff] %v1861_v35 }
 0x268   : > { %1939 = vst [vmem:[%s2601_s29 + $0x70] sm:$0xff] %v1881_v37 }
 0x26a   : > { %v1900_v39 = vpop.f32.mrf.mxu2  ;;  %v1920_v24 = vpop.f32.mrf.mxu3 }
 0x26b   : > { %v1901_v63 = vadd.f32 %v3038_v51, %v1900_v39  ;;  %v1921_v40 = vadd.f32 %v3038_v51, %v1920_v24  ;;  %v1862_v43 = vpop.f32.mrf.mxu0  ;;  %v1882_v44 = vpop.f32.mrf.mxu1 }
 0x26c   : > { %v1863_v45 = vadd.f32 %v3038_v51, %v1862_v43  ;;  %v1883_v46 = vadd.f32 %v3038_v51, %v1882_v44 }
 0x26d   : > { %1947 = vst [vmem:[%s2601_s29 + $0xb0] sm:$0xff] %v1901_v63 }
 0x26e   : > { %1955 = vst [vmem:[%s2601_s29 + $0xf0] sm:$0xff] %v1921_v40 }
 0x26f   : > { %1932 = vst [vmem:[%s2601_s29 + $0x38] sm:$0xff] %v1863_v45 }
 0x270   : > { %1940 = vst [vmem:[%s2601_s29 + $0x78] sm:$0xff] %v1883_v46 }
 0x272   : > { %v1902_v20 = vpop.f32.mrf.mxu2  ;;  %v1922_v49 = vpop.f32.mrf.mxu3 }
 0x273   : > { %v1903_v50 = vadd.f32 %v3038_v51, %v1902_v20  ;;  %v1923_v54 = vadd.f32 %v3038_v51, %v1922_v49 }
 0x275   : > { %1948 = vst [vmem:[%s2601_s29 + $0xb8] sm:$0xff] %v1903_v50 }
 0x276   : > { %1956 = vst [vmem:[%s2601_s29 + $0xf8] sm:$0xff] %v1923_v54 }
 0x277 PF: > { %s2280_s7 = sshll.u32 %s2468_s22, 8  ;;  %s1972_s13 = sshll.u32 %s2601_s29, 4  ;;  %s1973_s13 = int_to_ptr.vmem [resolvable:$true] %s1972_s13 }
 0x278   : > { %s1971_s12 = scalar_lea.hbm %s3154_s5, %s2280_s7  ;;  %s1958_s15 = scalar_lea.sflag [#allocation4], %s261_s10 }
 0x279   : > { %s1974_s14 = sshll.u32 %s1971_s12, 4  ;;  %s2406_s22 = scalar_lea.hbm %s3154_s5, 512  ;;  %s1975_s14 = int_to_ptr.hbm [resolvable:$true] %s1974_s14 }
 0x27a   : > { %s2400_s16 = sshra.s32 %s1975_s14, 4  ;;  %s2401_s16 = int_to_ptr.hbm [resolvable:$true] %s2400_s16 }
 0x27b   : > { %s2402_s17 = scalar_lea.hbm %s2401_s16, 256  ;;  %p2407_p6 = scmp.lt.s32.totalorder %s2401_s16, %s3154_s5 }
 0x27c   : > { %p2403_p2 = scmp.ne.s32.totalorder %s2401_s16, %s2402_s17  ;;  %p2408_p7 = scmp.lt.s32.totalorder %s2406_s22, %s2402_s17 }
 0x27e   : > { %p2404_p4 = pnand %p2403_p2, %p2564_p3  ;;  %p2409_p8 = por %p2408_p7, %p2407_p6 }
 0x280   : > { %p2405_p5 = pneg %p2404_p4 }
 0x282   : > { %p2410_p10 = pnand %p2409_p8, %p2405_p5 }
 0x284   : > { %2413 = shalt.err (!%p2410_p10)
}
 0x285   : > { %s2483_s29 = smov 128   ;;  %s2484_s10 = smov 8  }
 0x286   : > { %2310 = dma.vmem_to_hbm [thread:$0]  (%p2564_p3), %s1973_s13, 4096, %s1975_s14, %s1958_s15, %s2483_s29, %s2483_s29, %s2484_s10  }
 0x287 PF: > { %p2316_p11 = scmp.ge.s32.totalorder %s2480_s25, 2  ;;  %s1989_s7 = sand.u32 1, %s2452_s18  }
 0x288   : > { %s1990_s11 = scalar_lea.sflag [#allocation4], %s1989_s7 }
 0x289   : > { %p2313_p12 = pnand %p2316_p11, %p2574_p9 }
 0x28b   : > { %p2314_p13 = pneg %p2313_p12 }
 0x28d   : > { %2447 = dma.done.wait (%p2314_p13), %s1990_s11, 4096  }
 0x28e   : > { %2449 = vsyncadd (%p2314_p13), %s1990_s11, 4294963200  ;;  %s18_s25 = sadd.s32 1, %s2480_s25   ;;  %s3163_s30 = sld [smem:[#allocation6_spill]] }
 0x28f   : > { %p15_p0 = scmp.ge.s32.totalorder %s18_s25, 8   ;;  %s3164_s18 = smov %s2456_s19 }
 0x290   : > { %s3165_s19 = smov %s2460_s20  ;;  %s3166_s20 = smov %s2582_s9 }
 0x291   : > { %s3167_s21 = smov %s2472_s23  ;;  %s3168_s22 = smov %s2476_s24 }
 0x292   : > { %s3169_s23 = smov %s3172_s28  ;;  %17 = sbr.rel (!%p15_p0) target bundleno = 5 (0x5), region = 89 }
 0x294   : > { %s3170_s24 = smov %s3163_s30 }
 0x297   :  { %1996 = vsyncpa [#allocation4], 1 }
 0x298   :  { %1998 = vsyncpa [#allocation4 + $0x1], 1 }

</bundles_post_ra>
